<compile_context>
chip_gen: v6e
topology: v6e:2x2x1
jax: 0.10.0
libtpu: 0.0.40
codegen_flags: <defaults>
</compile_context>

<pallas_src>
import functools

import jax
import jax.numpy as jnp
from jax.experimental import pallas as pl
from jax.experimental.pallas import tpu as pltpu

PADL = 8  # sublane-aligned left zero-pad width inside the conv halo scratch


# ----------------------------------------------------------------------------
# In-kernel helpers
# ----------------------------------------------------------------------------
def _fill_pad(pad_ref, x_spatial, H, W):
    """Zero the halo scratch and copy the (H, W, C) interior at column PADL."""
    pad_ref[...] = jnp.zeros(pad_ref.shape, pad_ref.dtype)
    pad_ref[pl.ds(1, H), pl.ds(PADL, W), :] = x_spatial.astype(pad_ref.dtype)


def _conv3x3_from_pad(pad_ref, w_ref, b_ref, H, W, cin):
    """3x3 'same' conv + ReLU as a single im2col matmul (K = 9*cin) on the MXU."""
    xp = pad_ref[...]                                   # (H+2, W+2*PADL, cin) f32
    cols = []
    for dy in range(3):
        for dx in range(3):
            c0 = PADL - 1 + dx
            cols.append(xp[dy:dy + H, c0:c0 + W, :].reshape(H * W, cin))
    patches = jnp.concatenate(cols, axis=1).astype(jnp.bfloat16)   # (H*W, 9*cin)
    y = jnp.dot(patches, w_ref[...], preferred_element_type=jnp.float32)
    return jnp.maximum(y + b_ref[...], 0.0)             # (H*W, cout) f32


def _maxpool2x2_flat(y, pool_ref, H, W, C):
    """2x2 / stride-2 max pool of a row-major flattened (H*W, C) activation."""
    Hh, Wh = H // 2, W // 2
    yr = y.reshape(Hh, 2, W, C)                  # splits the row dim only
    rm = jnp.maximum(yr[:, 0], yr[:, 1])         # pool along H -> (Hh, W, C)
    pool_ref[...] = rm.reshape(Hh * W, C)
    n = Hh * Wh
    # pool along W: even / odd rows of the flattened scratch (sublane stride 2)
    return jnp.maximum(pool_ref[pl.ds(0, n, 2), :],
                       pool_ref[pl.ds(1, n, 2), :])      # (Hh*Wh, C)


# ----------------------------------------------------------------------------
# Stage kernels
# ----------------------------------------------------------------------------
def _encmid_kernel(p1_ref, we1_ref, be1_ref, we2_ref, be2_ref,
                   wm1_ref, bm1_ref, wm2_ref, bm2_ref, wt_ref, bt_ref,
                   o_ref, pad_e2, pool_e, pad_m1, pad_m2, pool_m,
                   *, H, W, CE1, CE2, CM1, CM2):
    # ---------------- encoder ----------------
    # conv1 (Cin=3): im2col patches come pre-built from the wrapper (tiny Cin)
    y1 = jnp.dot(p1_ref[0], we1_ref[...], preferred_element_type=jnp.float32)
    y1 = jnp.maximum(y1 + be1_ref[...], 0.0)                       # (H*W, CE1)
    # conv2 + ReLU (in-kernel zero pad, single matmul)
    _fill_pad(pad_e2, y1.reshape(H, W, CE1), H, W)
    y2 = _conv3x3_from_pad(pad_e2, we2_ref, be2_ref, H, W, CE1)    # (H*W, CE2)
    # 2x2 max pool -> encoder output (stays in VMEM)
    x1 = _maxpool2x2_flat(y2, pool_e, H, W, CE2)                   # (H2*W2, CE2)

    # ---------------- middle ----------------
    H2, W2 = H // 2, W // 2
    _fill_pad(pad_m1, x1.reshape(H2, W2, CE2), H2, W2)
    z1 = _conv3x3_from_pad(pad_m1, wm1_ref, bm1_ref, H2, W2, CE2)  # (H2*W2, CM1)
    _fill_pad(pad_m2, z1.reshape(H2, W2, CM1), H2, W2)
    z2 = _conv3x3_from_pad(pad_m2, wm2_ref, bm2_ref, H2, W2, CM1)  # (H2*W2, CM2)
    x2 = _maxpool2x2_flat(z2, pool_m, H2, W2, CM2)                 # (H4*W4, CM2)

    # ---- first transposed conv (128->64), all 4 taps in one matmul, + ReLU ----
    yt = jnp.dot(x2.astype(jnp.bfloat16), wt_ref[...],
                 preferred_element_type=jnp.float32)
    yt = jnp.maximum(yt + bt_ref[...], 0.0)                        # (H4*W4, 4*CT)
    o_ref[0] = yt.astype(o_ref.dtype)


def _decoder_kernel(x_ref, w1_ref, b1_ref, wt_ref, bt_ref, o_ref, pad1,
                    *, H, W, C0, C1):
    x = x_ref[0]                                               # (H*W, C0) bf16
    _fill_pad(pad1, x.reshape(H, W, C0), H, W)
    y1 = _conv3x3_from_pad(pad1, w1_ref, b1_ref, H, W, C0)     # (H*W, C1)
    # fused final 2x2 transposed conv + sigmoid
    yt = jnp.dot(y1.astype(jnp.bfloat16), wt_ref[...],
                 preferred_element_type=jnp.float32) + bt_ref[...]
    o_ref[0] = jax.nn.sigmoid(yt)                              # (H*W, 4) f32


# ----------------------------------------------------------------------------
# Stage wrappers (pallas_call plumbing)
# ----------------------------------------------------------------------------
def encmid_stage(patches, we1, be1, we2, be2, wm1, bm1, wm2, bm2, wt, bt, H, W):
    N, _, K1 = patches.shape
    CE1, CE2 = we1.shape[1], we2.shape[1]
    CM1, CM2 = wm1.shape[1], wm2.shape[1]
    CT4 = wt.shape[1]
    H2, W2 = H // 2, W // 2
    H4, W4 = H2 // 2, W2 // 2
    kernel = functools.partial(_encmid_kernel, H=H, W=W,
                               CE1=CE1, CE2=CE2, CM1=CM1, CM2=CM2)
    return pl.pallas_call(
        kernel,
        out_shape=jax.ShapeDtypeStruct((N, H4 * W4, CT4), jnp.bfloat16),
        grid_spec=pltpu.PrefetchScalarGridSpec(
            num_scalar_prefetch=0,
            grid=(N,),
            in_specs=[
                pl.BlockSpec((1, H * W, K1), lambda n: (n, 0, 0)),
                pl.BlockSpec((K1, CE1), lambda n: (0, 0)),
                pl.BlockSpec((1, CE1), lambda n: (0, 0)),
                pl.BlockSpec((9 * CE1, CE2), lambda n: (0, 0)),
                pl.BlockSpec((1, CE2), lambda n: (0, 0)),
                pl.BlockSpec((9 * CE2, CM1), lambda n: (0, 0)),
                pl.BlockSpec((1, CM1), lambda n: (0, 0)),
                pl.BlockSpec((9 * CM1, CM2), lambda n: (0, 0)),
                pl.BlockSpec((1, CM2), lambda n: (0, 0)),
                pl.BlockSpec((CM2, CT4), lambda n: (0, 0)),
                pl.BlockSpec((1, CT4), lambda n: (0, 0)),
            ],
            out_specs=pl.BlockSpec((1, H4 * W4, CT4), lambda n: (n, 0, 0)),
            scratch_shapes=[
                pltpu.VMEM((H + 2, W + 2 * PADL, CE1), jnp.float32),    # pad_e2
                pltpu.VMEM((H2 * W, CE2), jnp.float32),                 # pool_e
                pltpu.VMEM((H2 + 2, W2 + 2 * PADL, CE2), jnp.float32),  # pad_m1
                pltpu.VMEM((H2 + 2, W2 + 2 * PADL, CM1), jnp.float32),  # pad_m2
                pltpu.VMEM((H4 * W2, CM2), jnp.float32),                # pool_m
            ],
        ),
        compiler_params=pltpu.CompilerParams(dimension_semantics=("parallel",)),
    )(patches, we1, be1, we2, be2, wm1, bm1, wm2, bm2, wt, bt)


def decoder_stage(x_flat, w1, b1, wt, bt, H, W):
    N, _, C0 = x_flat.shape
    C1, CT4 = w1.shape[1], wt.shape[1]
    kernel = functools.partial(_decoder_kernel, H=H, W=W, C0=C0, C1=C1)
    return pl.pallas_call(
        kernel,
        out_shape=jax.ShapeDtypeStruct((N, H * W, CT4), jnp.float32),
        grid_spec=pltpu.PrefetchScalarGridSpec(
            num_scalar_prefetch=0,
            grid=(N,),
            in_specs=[
                pl.BlockSpec((1, H * W, C0), lambda n: (n, 0, 0)),
                pl.BlockSpec((9 * C0, C1), lambda n: (0, 0)),
                pl.BlockSpec((1, C1), lambda n: (0, 0)),
                pl.BlockSpec((C1, CT4), lambda n: (0, 0)),
                pl.BlockSpec((1, CT4), lambda n: (0, 0)),
            ],
            out_specs=pl.BlockSpec((1, H * W, CT4), lambda n: (n, 0, 0)),
            scratch_shapes=[
                pltpu.VMEM((H + 2, W + 2 * PADL, C0), jnp.float32),
            ],
        ),
        compiler_params=pltpu.CompilerParams(dimension_semantics=("parallel",)),
    )(x_flat, w1, b1, wt, bt)


# ----------------------------------------------------------------------------
# XLA-side glue (tiny reshapes only)
# ----------------------------------------------------------------------------
def _im2col_3x3_xla(x_nhwc):
    """im2col for the network input layer only (Cin=3 is too narrow for lanes)."""
    N, H, W, C = x_nhwc.shape
    xp = jnp.pad(x_nhwc, ((0, 0), (1, 1), (1, 1), (0, 0)))
    cols = [xp[:, dy:dy + H, dx:dx + W, :] for dy in range(3) for dx in range(3)]
    return jnp.concatenate(cols, axis=-1).reshape(N, H * W, 9 * C)


def _interleave2x2(y_flat, H, W, cout):
    """(N, H*W, 4*cout) tap-major transposed-conv output -> (N, 2H, 2W, cout)."""
    N = y_flat.shape[0]
    y = y_flat.reshape(N, H, W, 2, 2, cout)
    y = jnp.transpose(y, (0, 1, 3, 2, 4, 5))
    return y.reshape(N, 2 * H, 2 * W, cout)


# ----------------------------------------------------------------------------
# Parameter init (deterministic, synthetic) and full forward pass
# ----------------------------------------------------------------------------
def init_params(key):
    def w_init(k, shape):
        fan_in = 1
        for d in shape[1:]:
            fan_in *= d
        return jax.random.normal(k, shape, jnp.float32) / jnp.sqrt(float(fan_in))

    def b_init(k, n):
        return 0.01 * jax.random.normal(k, (n,), jnp.float32)

    ks = jax.random.split(key, 14)
    return {
        # encoder
        "enc1_w": w_init(ks[0], (64, 3, 3, 3)),    "enc1_b": b_init(ks[1], 64),
        "enc2_w": w_init(ks[2], (64, 64, 3, 3)),   "enc2_b": b_init(ks[3], 64),
        # middle
        "mid1_w": w_init(ks[4], (128, 64, 3, 3)),  "mid1_b": b_init(ks[5], 128),
        "mid2_w": w_init(ks[6], (128, 128, 3, 3)), "mid2_b": b_init(ks[7], 128),
        # decoder
        "dec1_w": w_init(ks[8], (128, 64, 2, 2)),  "dec1_b": b_init(ks[9], 64),
        "dec2_w": w_init(ks[10], (64, 64, 3, 3)),  "dec2_b": b_init(ks[11], 64),
        "dec3_w": w_init(ks[12], (64, 1, 2, 2)),   "dec3_b": b_init(ks[13], 1),
    }


@jax.jit
def unet_forward(params, x_nchw):
    p = params
    x = jnp.transpose(x_nchw.astype(jnp.float32), (0, 2, 3, 1))   # NCHW -> NHWC
    N, H, W, _ = x.shape

    def conv_w(w):   # (Cout, Cin, 3, 3) -> (9*Cin, Cout), bf16, rows in (dy,dx,ci)
        cout, cin = w.shape[0], w.shape[1]
        return jnp.transpose(w, (2, 3, 1, 0)).reshape(9 * cin, cout).astype(jnp.bfloat16)

    def tconv_w(w):  # (Cin, Cout, 2, 2) -> (Cin, 4*Cout), bf16, cols in (ty,tx,co)
        cin, cout = w.shape[0], w.shape[1]
        return jnp.transpose(w, (0, 2, 3, 1)).reshape(cin, 4 * cout).astype(jnp.bfloat16)

    def vec_b(b):
        return b.reshape(1, -1).astype(jnp.float32)

    def tconv_b(b):
        return jnp.tile(b, 4).reshape(1, -1).astype(jnp.float32)

    # ---- encoder + middle + first up-convolution, fully fused in one kernel ----
    patches1 = _im2col_3x3_xla(x.astype(jnp.bfloat16))            # (N, H*W, 27)
    x2 = encmid_stage(patches1,
                      conv_w(p["enc1_w"]), vec_b(p["enc1_b"]),
                      conv_w(p["enc2_w"]), vec_b(p["enc2_b"]),
                      conv_w(p["mid1_w"]), vec_b(p["mid1_b"]),
                      conv_w(p["mid2_w"]), vec_b(p["mid2_b"]),
                      tconv_w(p["dec1_w"]), tconv_b(p["dec1_b"]), H, W)

    # depth-to-space pixel interleave of the fused ConvT output (pure layout)
    H2, W2 = H // 2, W // 2
    H4, W4 = H2 // 2, W2 // 2
    up1 = _interleave2x2(x2, H4, W4, p["dec1_w"].shape[1])        # (N, H2, W2, 64)
    up1 = up1.reshape(N, H2 * W2, -1)

    # ---- decoder conv + final up-convolution + sigmoid ----
    x3 = decoder_stage(up1,
                       conv_w(p["dec2_w"]), vec_b(p["dec2_b"]),
                       tconv_w(p["dec3_w"]), tconv_b(p["dec3_b"]), H2, W2)
    out = _interleave2x2(x3, H2, W2, p["dec3_w"].shape[1])        # (N, H, W, 1)
    return jnp.transpose(out, (0, 3, 1, 2))                       # NHWC -> NCHW


if __name__ == "__main__":
    key = jax.random.PRNGKey(0)
    pkey, xkey = jax.random.split(key)
    params = init_params(pkey)
    x = jax.random.normal(xkey, (2, 3, 16, 16), jnp.float32)      # NCHW like PyTorch

    y = unet_forward(params, x)
    y = jax.block_until_ready(y)

    assert y.shape == (2, 1, 16, 16), y.shape
    assert bool(jnp.all(jnp.isfinite(y)))
    assert bool(jnp.all(y >= 0.0)) and bool(jnp.all(y <= 1.0))    # sigmoid range
    print("KERNEL_OK")
</pallas_src>

<mosaic_0001>
module attributes {stable_mosaic.version = 11 : i64} {
  func.func @_encmid_kernel(%arg0: i32, %arg1: memref<1x256x27xbf16, #tpu.memory_space<vmem>>, %arg2: memref<27x64xbf16, #tpu.memory_space<vmem>>, %arg3: memref<1x64xf32, #tpu.memory_space<vmem>>, %arg4: memref<576x64xbf16, #tpu.memory_space<vmem>>, %arg5: memref<1x64xf32, #tpu.memory_space<vmem>>, %arg6: memref<576x128xbf16, #tpu.memory_space<vmem>>, %arg7: memref<1x128xf32, #tpu.memory_space<vmem>>, %arg8: memref<1152x128xbf16, #tpu.memory_space<vmem>>, %arg9: memref<1x128xf32, #tpu.memory_space<vmem>>, %arg10: memref<128x256xbf16, #tpu.memory_space<vmem>>, %arg11: memref<1x256xf32, #tpu.memory_space<vmem>>, %arg12: memref<1x16x256xbf16, #tpu.memory_space<vmem>>, %arg13: memref<18x32x64xf32, #tpu.memory_space<vmem>>, %arg14: memref<128x64xf32, #tpu.memory_space<vmem>>, %arg15: memref<10x24x64xf32, #tpu.memory_space<vmem>>, %arg16: memref<10x24x128xf32, #tpu.memory_space<vmem>>, %arg17: memref<32x128xf32, #tpu.memory_space<vmem>>) attributes {dimension_semantics = [#tpu.dimension_semantics<parallel>], iteration_bounds = array<i64: 2>, scalar_prefetch = 0 : i64, scratch_operands = 5 : i64, tpu.core_type = #tpu.core_type<tc>, window_params = [{transform_indices = @transform_0, window_bounds = array<i64: 1, 256, 27>}, {pipeline_mode = #tpu.pipeline_mode<synchronous>, transform_indices = @transform_1, window_bounds = array<i64: 27, 64>}, {pipeline_mode = #tpu.pipeline_mode<synchronous>, transform_indices = @transform_2, window_bounds = array<i64: 1, 64>}, {pipeline_mode = #tpu.pipeline_mode<synchronous>, transform_indices = @transform_3, window_bounds = array<i64: 576, 64>}, {pipeline_mode = #tpu.pipeline_mode<synchronous>, transform_indices = @transform_4, window_bounds = array<i64: 1, 64>}, {pipeline_mode = #tpu.pipeline_mode<synchronous>, transform_indices = @transform_5, window_bounds = array<i64: 576, 128>}, {pipeline_mode = #tpu.pipeline_mode<synchronous>, transform_indices = @transform_6, window_bounds = array<i64: 1, 128>}, {pipeline_mode = #tpu.pipeline_mode<synchronous>, transform_indices = @transform_7, window_bounds = array<i64: 1152, 128>}, {pipeline_mode = #tpu.pipeline_mode<synchronous>, transform_indices = @transform_8, window_bounds = array<i64: 1, 128>}, {pipeline_mode = #tpu.pipeline_mode<synchronous>, transform_indices = @transform_9, window_bounds = array<i64: 128, 256>}, {pipeline_mode = #tpu.pipeline_mode<synchronous>, transform_indices = @transform_10, window_bounds = array<i64: 1, 256>}, {transform_indices = @transform_11, window_bounds = array<i64: 1, 16, 256>}]} {
    %c0 = arith.constant 0 : index
    %c0_0 = arith.constant 0 : index
    %c0_1 = arith.constant 0 : index
    %0 = vector.load %arg1[%c0, %c0_0, %c0_1] : memref<1x256x27xbf16, #tpu.memory_space<vmem>>, vector<1x256x27xbf16>
    %1 = vector.shape_cast %0 : vector<1x256x27xbf16> to vector<256x27xbf16>
    %c0_2 = arith.constant 0 : index
    %c0_3 = arith.constant 0 : index
    %2 = vector.load %arg2[%c0_2, %c0_3] : memref<27x64xbf16, #tpu.memory_space<vmem>>, vector<27x64xbf16>
    %cst = arith.constant dense<0.000000e+00> : vector<256x64xf32>
    %3 = tpu.matmul %1, %2, %cst {dimension_numbers = #tpu.dot_dimension_numbers<[1], [0], [0], [1], [0, 0, 1, 1], [], []>} : vector<256x27xbf16>, vector<27x64xbf16>, vector<256x64xf32> -> vector<256x64xf32>
    %c0_4 = arith.constant 0 : index
    %c0_5 = arith.constant 0 : index
    %4 = vector.load %arg3[%c0_4, %c0_5] : memref<1x64xf32, #tpu.memory_space<vmem>>, vector<1x64xf32>
    %5 = vector.broadcast %4 : vector<1x64xf32> to vector<256x64xf32>
    %6 = arith.addf %3, %5 : vector<256x64xf32>
    %cst_6 = arith.constant 0.000000e+00 : f32
    %7 = vector.broadcast %cst_6 : f32 to vector<256x64xf32>
    %8 = arith.maximumf %6, %7 : vector<256x64xf32>
    %9 = vector.shape_cast %8 : vector<256x64xf32> to vector<16x16x64xf32>
    %cst_7 = arith.constant 0.000000e+00 : f32
    %10 = vector.broadcast %cst_7 : f32 to vector<18x32x64xf32>
    %c0_8 = arith.constant 0 : index
    %c0_9 = arith.constant 0 : index
    %c0_10 = arith.constant 0 : index
    %11 = vector.load %arg13[%c0_8, %c0_9, %c0_10] : memref<18x32x64xf32, #tpu.memory_space<vmem>>, vector<18x32x64xf32>
    tpu.vector_store %arg13[%c0_8, %c0_9, %c0_10], %10 {strides = array<i32>} : memref<18x32x64xf32, #tpu.memory_space<vmem>>, vector<18x32x64xf32>,
    %c1 = arith.constant 1 : index
    %c8 = arith.constant 8 : index
    %c0_11 = arith.constant 0 : index
    %12 = vector.load %arg13[%c1, %c8, %c0_11] : memref<18x32x64xf32, #tpu.memory_space<vmem>>, vector<16x16x64xf32>
    tpu.vector_store %arg13[%c1, %c8, %c0_11], %9 {strides = array<i32>} : memref<18x32x64xf32, #tpu.memory_space<vmem>>, vector<16x16x64xf32>,
    %c0_12 = arith.constant 0 : index
    %c0_13 = arith.constant 0 : index
    %c0_14 = arith.constant 0 : index
    %13 = vector.load %arg13[%c0_12, %c0_13, %c0_14] : memref<18x32x64xf32, #tpu.memory_space<vmem>>, vector<18x32x64xf32>
    %14 = vector.extract_strided_slice %13 {offsets = [0, 7, 0], sizes = [16, 16, 64], strides = [1, 1, 1]} : vector<18x32x64xf32> to vector<16x16x64xf32>
    %15 = vector.shape_cast %14 : vector<16x16x64xf32> to vector<256x64xf32>
    %16 = vector.extract_strided_slice %13 {offsets = [0, 8, 0], sizes = [16, 16, 64], strides = [1, 1, 1]} : vector<18x32x64xf32> to vector<16x16x64xf32>
    %17 = vector.shape_cast %16 : vector<16x16x64xf32> to vector<256x64xf32>
    %18 = vector.extract_strided_slice %13 {offsets = [0, 9, 0], sizes = [16, 16, 64], strides = [1, 1, 1]} : vector<18x32x64xf32> to vector<16x16x64xf32>
    %19 = vector.shape_cast %18 : vector<16x16x64xf32> to vector<256x64xf32>
    %20 = vector.extract_strided_slice %13 {offsets = [1, 7, 0], sizes = [16, 16, 64], strides = [1, 1, 1]} : vector<18x32x64xf32> to vector<16x16x64xf32>
    %21 = vector.shape_cast %20 : vector<16x16x64xf32> to vector<256x64xf32>
    %22 = vector.extract_strided_slice %13 {offsets = [1, 8, 0], sizes = [16, 16, 64], strides = [1, 1, 1]} : vector<18x32x64xf32> to vector<16x16x64xf32>
    %23 = vector.shape_cast %22 : vector<16x16x64xf32> to vector<256x64xf32>
    %24 = vector.extract_strided_slice %13 {offsets = [1, 9, 0], sizes = [16, 16, 64], strides = [1, 1, 1]} : vector<18x32x64xf32> to vector<16x16x64xf32>
    %25 = vector.shape_cast %24 : vector<16x16x64xf32> to vector<256x64xf32>
    %26 = vector.extract_strided_slice %13 {offsets = [2, 7, 0], sizes = [16, 16, 64], strides = [1, 1, 1]} : vector<18x32x64xf32> to vector<16x16x64xf32>
    %27 = vector.shape_cast %26 : vector<16x16x64xf32> to vector<256x64xf32>
    %28 = vector.extract_strided_slice %13 {offsets = [2, 8, 0], sizes = [16, 16, 64], strides = [1, 1, 1]} : vector<18x32x64xf32> to vector<16x16x64xf32>
    %29 = vector.shape_cast %28 : vector<16x16x64xf32> to vector<256x64xf32>
    %30 = vector.extract_strided_slice %13 {offsets = [2, 9, 0], sizes = [16, 16, 64], strides = [1, 1, 1]} : vector<18x32x64xf32> to vector<16x16x64xf32>
    %31 = vector.shape_cast %30 : vector<16x16x64xf32> to vector<256x64xf32>
    %32 = tpu.concatenate %15, %17, %19, %21, %23, %25, %27, %29, %31 in 1 : vector<256x64xf32>, vector<256x64xf32>, vector<256x64xf32>, vector<256x64xf32>, vector<256x64xf32>, vector<256x64xf32>, vector<256x64xf32>, vector<256x64xf32>, vector<256x64xf32> -> vector<256x576xf32>
    %33 = arith.truncf %32 : vector<256x576xf32> to vector<256x576xbf16>
    %c0_15 = arith.constant 0 : index
    %c0_16 = arith.constant 0 : index
    %34 = vector.load %arg4[%c0_15, %c0_16] : memref<576x64xbf16, #tpu.memory_space<vmem>>, vector<576x64xbf16>
    %cst_17 = arith.constant dense<0.000000e+00> : vector<256x64xf32>
    %35 = tpu.matmul %33, %34, %cst_17 {dimension_numbers = #tpu.dot_dimension_numbers<[1], [0], [0], [1], [0, 0, 1, 1], [], []>} : vector<256x576xbf16>, vector<576x64xbf16>, vector<256x64xf32> -> vector<256x64xf32>
    %c0_18 = arith.constant 0 : index
    %c0_19 = arith.constant 0 : index
    %36 = vector.load %arg5[%c0_18, %c0_19] : memref<1x64xf32, #tpu.memory_space<vmem>>, vector<1x64xf32>
    %37 = vector.broadcast %36 : vector<1x64xf32> to vector<256x64xf32>
    %38 = arith.addf %35, %37 : vector<256x64xf32>
    %cst_20 = arith.constant 0.000000e+00 : f32
    %39 = vector.broadcast %cst_20 : f32 to vector<256x64xf32>
    %40 = arith.maximumf %38, %39 : vector<256x64xf32>
    %41 = vector.shape_cast %40 : vector<256x64xf32> to vector<8x2x16x64xf32>
    %42 = vector.extract_strided_slice %41 {offsets = [0, 0, 0, 0], sizes = [8, 1, 16, 64], strides = [1, 1, 1, 1]} : vector<8x2x16x64xf32> to vector<8x1x16x64xf32>
    %43 = vector.shape_cast %42 : vector<8x1x16x64xf32> to vector<8x16x64xf32>
    %44 = vector.extract_strided_slice %41 {offsets = [0, 1, 0, 0], sizes = [8, 1, 16, 64], strides = [1, 1, 1, 1]} : vector<8x2x16x64xf32> to vector<8x1x16x64xf32>
    %45 = vector.shape_cast %44 : vector<8x1x16x64xf32> to vector<8x16x64xf32>
    %46 = arith.maximumf %43, %45 : vector<8x16x64xf32>
    %47 = vector.shape_cast %46 : vector<8x16x64xf32> to vector<128x64xf32>
    %c0_21 = arith.constant 0 : index
    %c0_22 = arith.constant 0 : index
    %48 = vector.load %arg14[%c0_21, %c0_22] : memref<128x64xf32, #tpu.memory_space<vmem>>, vector<128x64xf32>
    tpu.vector_store %arg14[%c0_21, %c0_22], %47 {strides = array<i32>} : memref<128x64xf32, #tpu.memory_space<vmem>>, vector<128x64xf32>,
    %c0_23 = arith.constant 0 : index
    %c0_24 = arith.constant 0 : index
    %49 = tpu.strided_load %arg14[%c0_23, %c0_24] {strides = array<i32: 2, 1>} : memref<128x64xf32, #tpu.memory_space<vmem>>, vector<64x64xf32>
    %c1_25 = arith.constant 1 : index
    %c0_26 = arith.constant 0 : index
    %50 = tpu.strided_load %arg14[%c1_25, %c0_26] {strides = array<i32: 2, 1>} : memref<128x64xf32, #tpu.memory_space<vmem>>, vector<64x64xf32>
    %51 = arith.maximumf %49, %50 : vector<64x64xf32>
    %52 = vector.shape_cast %51 : vector<64x64xf32> to vector<8x8x64xf32>
    %cst_27 = arith.constant 0.000000e+00 : f32
    %53 = vector.broadcast %cst_27 : f32 to vector<10x24x64xf32>
    %c0_28 = arith.constant 0 : index
    %c0_29 = arith.constant 0 : index
    %c0_30 = arith.constant 0 : index
    %54 = vector.load %arg15[%c0_28, %c0_29, %c0_30] : memref<10x24x64xf32, #tpu.memory_space<vmem>>, vector<10x24x64xf32>
    tpu.vector_store %arg15[%c0_28, %c0_29, %c0_30], %53 {strides = array<i32>} : memref<10x24x64xf32, #tpu.memory_space<vmem>>, vector<10x24x64xf32>,
    %c1_31 = arith.constant 1 : index
    %c8_32 = arith.constant 8 : index
    %c0_33 = arith.constant 0 : index
    %55 = vector.load %arg15[%c1_31, %c8_32, %c0_33] : memref<10x24x64xf32, #tpu.memory_space<vmem>>, vector<8x8x64xf32>
    tpu.vector_store %arg15[%c1_31, %c8_32, %c0_33], %52 {strides = array<i32>} : memref<10x24x64xf32, #tpu.memory_space<vmem>>, vector<8x8x64xf32>,
    %c0_34 = arith.constant 0 : index
    %c0_35 = arith.constant 0 : index
    %c0_36 = arith.constant 0 : index
    %56 = vector.load %arg15[%c0_34, %c0_35, %c0_36] : memref<10x24x64xf32, #tpu.memory_space<vmem>>, vector<10x24x64xf32>
    %57 = vector.extract_strided_slice %56 {offsets = [0, 7, 0], sizes = [8, 8, 64], strides = [1, 1, 1]} : vector<10x24x64xf32> to vector<8x8x64xf32>
    %58 = vector.shape_cast %57 : vector<8x8x64xf32> to vector<64x64xf32>
    %59 = vector.extract_strided_slice %56 {offsets = [0, 8, 0], sizes = [8, 8, 64], strides = [1, 1, 1]} : vector<10x24x64xf32> to vector<8x8x64xf32>
    %60 = vector.shape_cast %59 : vector<8x8x64xf32> to vector<64x64xf32>
    %61 = vector.extract_strided_slice %56 {offsets = [0, 9, 0], sizes = [8, 8, 64], strides = [1, 1, 1]} : vector<10x24x64xf32> to vector<8x8x64xf32>
    %62 = vector.shape_cast %61 : vector<8x8x64xf32> to vector<64x64xf32>
    %63 = vector.extract_strided_slice %56 {offsets = [1, 7, 0], sizes = [8, 8, 64], strides = [1, 1, 1]} : vector<10x24x64xf32> to vector<8x8x64xf32>
    %64 = vector.shape_cast %63 : vector<8x8x64xf32> to vector<64x64xf32>
    %65 = vector.extract_strided_slice %56 {offsets = [1, 8, 0], sizes = [8, 8, 64], strides = [1, 1, 1]} : vector<10x24x64xf32> to vector<8x8x64xf32>
    %66 = vector.shape_cast %65 : vector<8x8x64xf32> to vector<64x64xf32>
    %67 = vector.extract_strided_slice %56 {offsets = [1, 9, 0], sizes = [8, 8, 64], strides = [1, 1, 1]} : vector<10x24x64xf32> to vector<8x8x64xf32>
    %68 = vector.shape_cast %67 : vector<8x8x64xf32> to vector<64x64xf32>
    %69 = vector.extract_strided_slice %56 {offsets = [2, 7, 0], sizes = [8, 8, 64], strides = [1, 1, 1]} : vector<10x24x64xf32> to vector<8x8x64xf32>
    %70 = vector.shape_cast %69 : vector<8x8x64xf32> to vector<64x64xf32>
    %71 = vector.extract_strided_slice %56 {offsets = [2, 8, 0], sizes = [8, 8, 64], strides = [1, 1, 1]} : vector<10x24x64xf32> to vector<8x8x64xf32>
    %72 = vector.shape_cast %71 : vector<8x8x64xf32> to vector<64x64xf32>
    %73 = vector.extract_strided_slice %56 {offsets = [2, 9, 0], sizes = [8, 8, 64], strides = [1, 1, 1]} : vector<10x24x64xf32> to vector<8x8x64xf32>
    %74 = vector.shape_cast %73 : vector<8x8x64xf32> to vector<64x64xf32>
    %75 = tpu.concatenate %58, %60, %62, %64, %66, %68, %70, %72, %74 in 1 : vector<64x64xf32>, vector<64x64xf32>, vector<64x64xf32>, vector<64x64xf32>, vector<64x64xf32>, vector<64x64xf32>, vector<64x64xf32>, vector<64x64xf32>, vector<64x64xf32> -> vector<64x576xf32>
    %76 = arith.truncf %75 : vector<64x576xf32> to vector<64x576xbf16>
    %c0_37 = arith.constant 0 : index
    %c0_38 = arith.constant 0 : index
    %77 = vector.load %arg6[%c0_37, %c0_38] : memref<576x128xbf16, #tpu.memory_space<vmem>>, vector<576x128xbf16>
    %cst_39 = arith.constant dense<0.000000e+00> : vector<64x128xf32>
    %78 = tpu.matmul %76, %77, %cst_39 {dimension_numbers = #tpu.dot_dimension_numbers<[1], [0], [0], [1], [0, 0, 1, 1], [], []>} : vector<64x576xbf16>, vector<576x128xbf16>, vector<64x128xf32> -> vector<64x128xf32>
    %c0_40 = arith.constant 0 : index
    %c0_41 = arith.constant 0 : index
    %79 = vector.load %arg7[%c0_40, %c0_41] : memref<1x128xf32, #tpu.memory_space<vmem>>, vector<1x128xf32>
    %80 = vector.broadcast %79 : vector<1x128xf32> to vector<64x128xf32>
    %81 = arith.addf %78, %80 : vector<64x128xf32>
    %cst_42 = arith.constant 0.000000e+00 : f32
    %82 = vector.broadcast %cst_42 : f32 to vector<64x128xf32>
    %83 = arith.maximumf %81, %82 : vector<64x128xf32>
    %84 = vector.shape_cast %83 : vector<64x128xf32> to vector<8x8x128xf32>
    %cst_43 = arith.constant 0.000000e+00 : f32
    %85 = vector.broadcast %cst_43 : f32 to vector<10x24x128xf32>
    %c0_44 = arith.constant 0 : index
    %c0_45 = arith.constant 0 : index
    %c0_46 = arith.constant 0 : index
    %86 = vector.load %arg16[%c0_44, %c0_45, %c0_46] : memref<10x24x128xf32, #tpu.memory_space<vmem>>, vector<10x24x128xf32>
    tpu.vector_store %arg16[%c0_44, %c0_45, %c0_46], %85 {strides = array<i32>} : memref<10x24x128xf32, #tpu.memory_space<vmem>>, vector<10x24x128xf32>,
    %c1_47 = arith.constant 1 : index
    %c8_48 = arith.constant 8 : index
    %c0_49 = arith.constant 0 : index
    %87 = vector.load %arg16[%c1_47, %c8_48, %c0_49] : memref<10x24x128xf32, #tpu.memory_space<vmem>>, vector<8x8x128xf32>
    tpu.vector_store %arg16[%c1_47, %c8_48, %c0_49], %84 {strides = array<i32>} : memref<10x24x128xf32, #tpu.memory_space<vmem>>, vector<8x8x128xf32>,
    %c0_50 = arith.constant 0 : index
    %c0_51 = arith.constant 0 : index
    %c0_52 = arith.constant 0 : index
    %88 = vector.load %arg16[%c0_50, %c0_51, %c0_52] : memref<10x24x128xf32, #tpu.memory_space<vmem>>, vector<10x24x128xf32>
    %89 = vector.extract_strided_slice %88 {offsets = [0, 7, 0], sizes = [8, 8, 128], strides = [1, 1, 1]} : vector<10x24x128xf32> to vector<8x8x128xf32>
    %90 = vector.shape_cast %89 : vector<8x8x128xf32> to vector<64x128xf32>
    %91 = vector.extract_strided_slice %88 {offsets = [0, 8, 0], sizes = [8, 8, 128], strides = [1, 1, 1]} : vector<10x24x128xf32> to vector<8x8x128xf32>
    %92 = vector.shape_cast %91 : vector<8x8x128xf32> to vector<64x128xf32>
    %93 = vector.extract_strided_slice %88 {offsets = [0, 9, 0], sizes = [8, 8, 128], strides = [1, 1, 1]} : vector<10x24x128xf32> to vector<8x8x128xf32>
    %94 = vector.shape_cast %93 : vector<8x8x128xf32> to vector<64x128xf32>
    %95 = vector.extract_strided_slice %88 {offsets = [1, 7, 0], sizes = [8, 8, 128], strides = [1, 1, 1]} : vector<10x24x128xf32> to vector<8x8x128xf32>
    %96 = vector.shape_cast %95 : vector<8x8x128xf32> to vector<64x128xf32>
    %97 = vector.extract_strided_slice %88 {offsets = [1, 8, 0], sizes = [8, 8, 128], strides = [1, 1, 1]} : vector<10x24x128xf32> to vector<8x8x128xf32>
    %98 = vector.shape_cast %97 : vector<8x8x128xf32> to vector<64x128xf32>
    %99 = vector.extract_strided_slice %88 {offsets = [1, 9, 0], sizes = [8, 8, 128], strides = [1, 1, 1]} : vector<10x24x128xf32> to vector<8x8x128xf32>
    %100 = vector.shape_cast %99 : vector<8x8x128xf32> to vector<64x128xf32>
    %101 = vector.extract_strided_slice %88 {offsets = [2, 7, 0], sizes = [8, 8, 128], strides = [1, 1, 1]} : vector<10x24x128xf32> to vector<8x8x128xf32>
    %102 = vector.shape_cast %101 : vector<8x8x128xf32> to vector<64x128xf32>
    %103 = vector.extract_strided_slice %88 {offsets = [2, 8, 0], sizes = [8, 8, 128], strides = [1, 1, 1]} : vector<10x24x128xf32> to vector<8x8x128xf32>
    %104 = vector.shape_cast %103 : vector<8x8x128xf32> to vector<64x128xf32>
    %105 = vector.extract_strided_slice %88 {offsets = [2, 9, 0], sizes = [8, 8, 128], strides = [1, 1, 1]} : vector<10x24x128xf32> to vector<8x8x128xf32>
    %106 = vector.shape_cast %105 : vector<8x8x128xf32> to vector<64x128xf32>
    %107 = tpu.concatenate %90, %92, %94, %96, %98, %100, %102, %104, %106 in 1 : vector<64x128xf32>, vector<64x128xf32>, vector<64x128xf32>, vector<64x128xf32>, vector<64x128xf32>, vector<64x128xf32>, vector<64x128xf32>, vector<64x128xf32>, vector<64x128xf32> -> vector<64x1152xf32>
    %108 = arith.truncf %107 : vector<64x1152xf32> to vector<64x1152xbf16>
    %c0_53 = arith.constant 0 : index
    %c0_54 = arith.constant 0 : index
    %109 = vector.load %arg8[%c0_53, %c0_54] : memref<1152x128xbf16, #tpu.memory_space<vmem>>, vector<1152x128xbf16>
    %cst_55 = arith.constant dense<0.000000e+00> : vector<64x128xf32>
    %110 = tpu.matmul %108, %109, %cst_55 {dimension_numbers = #tpu.dot_dimension_numbers<[1], [0], [0], [1], [0, 0, 1, 1], [], []>} : vector<64x1152xbf16>, vector<1152x128xbf16>, vector<64x128xf32> -> vector<64x128xf32>
    %c0_56 = arith.constant 0 : index
    %c0_57 = arith.constant 0 : index
    %111 = vector.load %arg9[%c0_56, %c0_57] : memref<1x128xf32, #tpu.memory_space<vmem>>, vector<1x128xf32>
    %112 = vector.broadcast %111 : vector<1x128xf32> to vector<64x128xf32>
    %113 = arith.addf %110, %112 : vector<64x128xf32>
    %cst_58 = arith.constant 0.000000e+00 : f32
    %114 = vector.broadcast %cst_58 : f32 to vector<64x128xf32>
    %115 = arith.maximumf %113, %114 : vector<64x128xf32>
    %116 = vector.shape_cast %115 : vector<64x128xf32> to vector<4x2x8x128xf32>
    %117 = vector.extract_strided_slice %116 {offsets = [0, 0, 0, 0], sizes = [4, 1, 8, 128], strides = [1, 1, 1, 1]} : vector<4x2x8x128xf32> to vector<4x1x8x128xf32>
    %118 = vector.shape_cast %117 : vector<4x1x8x128xf32> to vector<4x8x128xf32>
    %119 = vector.extract_strided_slice %116 {offsets = [0, 1, 0, 0], sizes = [4, 1, 8, 128], strides = [1, 1, 1, 1]} : vector<4x2x8x128xf32> to vector<4x1x8x128xf32>
    %120 = vector.shape_cast %119 : vector<4x1x8x128xf32> to vector<4x8x128xf32>
    %121 = arith.maximumf %118, %120 : vector<4x8x128xf32>
    %122 = vector.shape_cast %121 : vector<4x8x128xf32> to vector<32x128xf32>
    %c0_59 = arith.constant 0 : index
    %c0_60 = arith.constant 0 : index
    %123 = vector.load %arg17[%c0_59, %c0_60] : memref<32x128xf32, #tpu.memory_space<vmem>>, vector<32x128xf32>
    tpu.vector_store %arg17[%c0_59, %c0_60], %122 {strides = array<i32>} : memref<32x128xf32, #tpu.memory_space<vmem>>, vector<32x128xf32>,
    %c0_61 = arith.constant 0 : index
    %c0_62 = arith.constant 0 : index
    %124 = tpu.strided_load %arg17[%c0_61, %c0_62] {strides = array<i32: 2, 1>} : memref<32x128xf32, #tpu.memory_space<vmem>>, vector<16x128xf32>
    %c1_63 = arith.constant 1 : index
    %c0_64 = arith.constant 0 : index
    %125 = tpu.strided_load %arg17[%c1_63, %c0_64] {strides = array<i32: 2, 1>} : memref<32x128xf32, #tpu.memory_space<vmem>>, vector<16x128xf32>
    %126 = arith.maximumf %124, %125 : vector<16x128xf32>
    %127 = arith.truncf %126 : vector<16x128xf32> to vector<16x128xbf16>
    %c0_65 = arith.constant 0 : index
    %c0_66 = arith.constant 0 : index
    %128 = vector.load %arg10[%c0_65, %c0_66] : memref<128x256xbf16, #tpu.memory_space<vmem>>, vector<128x256xbf16>
    %cst_67 = arith.constant dense<0.000000e+00> : vector<16x256xf32>
    %129 = tpu.matmul %127, %128, %cst_67 {dimension_numbers = #tpu.dot_dimension_numbers<[1], [0], [0], [1], [0, 0, 1, 1], [], []>} : vector<16x128xbf16>, vector<128x256xbf16>, vector<16x256xf32> -> vector<16x256xf32>
    %c0_68 = arith.constant 0 : index
    %c0_69 = arith.constant 0 : index
    %130 = vector.load %arg11[%c0_68, %c0_69] : memref<1x256xf32, #tpu.memory_space<vmem>>, vector<1x256xf32>
    %131 = vector.broadcast %130 : vector<1x256xf32> to vector<16x256xf32>
    %132 = arith.addf %129, %131 : vector<16x256xf32>
    %cst_70 = arith.constant 0.000000e+00 : f32
    %133 = vector.broadcast %cst_70 : f32 to vector<16x256xf32>
    %134 = arith.maximumf %132, %133 : vector<16x256xf32>
    %135 = arith.truncf %134 : vector<16x256xf32> to vector<16x256xbf16>
    %c0_71 = arith.constant 0 : index
    %c0_72 = arith.constant 0 : index
    %c0_73 = arith.constant 0 : index
    %136 = vector.load %arg12[%c0_71, %c0_72, %c0_73] : memref<1x16x256xbf16, #tpu.memory_space<vmem>>, vector<1x16x256xbf16>
    %137 = vector.shape_cast %136 : vector<1x16x256xbf16> to vector<16x256xbf16>
    %138 = vector.shape_cast %135 : vector<16x256xbf16> to vector<1x16x256xbf16>
    tpu.vector_store %arg12[%c0_71, %c0_72, %c0_73], %138 {strides = array<i32>} : memref<1x16x256xbf16, #tpu.memory_space<vmem>>, vector<1x16x256xbf16>,
    return
  }
  func.func @transform_0(%arg0: i32) -> (i32, i32, i32) {
    %c0_i32 = arith.constant 0 : i32
    %c0_i32_0 = arith.constant 0 : i32
    %c0_i32_1 = arith.constant 0 : i32
    return %arg0, %c0_i32, %c0_i32_0 : i32, i32, i32
  }
  func.func @transform_1(%arg0: i32) -> (i32, i32) {
    %c0_i32 = arith.constant 0 : i32
    %c0_i32_0 = arith.constant 0 : i32
    %c0_i32_1 = arith.constant 0 : i32
    return %c0_i32, %c0_i32_0 : i32, i32
  }
  func.func @transform_2(%arg0: i32) -> (i32, i32) {
    %c0_i32 = arith.constant 0 : i32
    %c0_i32_0 = arith.constant 0 : i32
    %c0_i32_1 = arith.constant 0 : i32
    return %c0_i32, %c0_i32_0 : i32, i32
  }
  func.func @transform_3(%arg0: i32) -> (i32, i32) {
    %c0_i32 = arith.constant 0 : i32
    %c0_i32_0 = arith.constant 0 : i32
    %c0_i32_1 = arith.constant 0 : i32
    return %c0_i32, %c0_i32_0 : i32, i32
  }
  func.func @transform_4(%arg0: i32) -> (i32, i32) {
    %c0_i32 = arith.constant 0 : i32
    %c0_i32_0 = arith.constant 0 : i32
    %c0_i32_1 = arith.constant 0 : i32
    return %c0_i32, %c0_i32_0 : i32, i32
  }
  func.func @transform_5(%arg0: i32) -> (i32, i32) {
    %c0_i32 = arith.constant 0 : i32
    %c0_i32_0 = arith.constant 0 : i32
    %c0_i32_1 = arith.constant 0 : i32
    return %c0_i32, %c0_i32_0 : i32, i32
  }
  func.func @transform_6(%arg0: i32) -> (i32, i32) {
    %c0_i32 = arith.constant 0 : i32
    %c0_i32_0 = arith.constant 0 : i32
    %c0_i32_1 = arith.constant 0 : i32
    return %c0_i32, %c0_i32_0 : i32, i32
  }
  func.func @transform_7(%arg0: i32) -> (i32, i32) {
    %c0_i32 = arith.constant 0 : i32
    %c0_i32_0 = arith.constant 0 : i32
    %c0_i32_1 = arith.constant 0 : i32
    return %c0_i32, %c0_i32_0 : i32, i32
  }
  func.func @transform_8(%arg0: i32) -> (i32, i32) {
    %c0_i32 = arith.constant 0 : i32
    %c0_i32_0 = arith.constant 0 : i32
    %c0_i32_1 = arith.constant 0 : i32
    return %c0_i32, %c0_i32_0 : i32, i32
  }
  func.func @transform_9(%arg0: i32) -> (i32, i32) {
    %c0_i32 = arith.constant 0 : i32
    %c0_i32_0 = arith.constant 0 : i32
    %c0_i32_1 = arith.constant 0 : i32
    return %c0_i32, %c0_i32_0 : i32, i32
  }
  func.func @transform_10(%arg0: i32) -> (i32, i32) {
    %c0_i32 = arith.constant 0 : i32
    %c0_i32_0 = arith.constant 0 : i32
    %c0_i32_1 = arith.constant 0 : i32
    return %c0_i32, %c0_i32_0 : i32, i32
  }
  func.func @transform_11(%arg0: i32) -> (i32, i32, i32) {
    %c0_i32 = arith.constant 0 : i32
    %c0_i32_0 = arith.constant 0 : i32
    %c0_i32_1 = arith.constant 0 : i32
    return %arg0, %c0_i32, %c0_i32_0 : i32, i32, i32
  }
}

module attributes {stable_mosaic.version = 11 : i64} {
  func.func @_decoder_kernel(%arg0: i32, %arg1: memref<1x64x64xbf16, #tpu.memory_space<vmem>>, %arg2: memref<576x64xbf16, #tpu.memory_space<vmem>>, %arg3: memref<1x64xf32, #tpu.memory_space<vmem>>, %arg4: memref<64x4xbf16, #tpu.memory_space<vmem>>, %arg5: memref<1x4xf32, #tpu.memory_space<vmem>>, %arg6: memref<1x64x4xf32, #tpu.memory_space<vmem>>, %arg7: memref<10x24x64xf32, #tpu.memory_space<vmem>>) attributes {dimension_semantics = [#tpu.dimension_semantics<parallel>], iteration_bounds = array<i64: 2>, scalar_prefetch = 0 : i64, scratch_operands = 1 : i64, tpu.core_type = #tpu.core_type<tc>, window_params = [{transform_indices = @transform_0, window_bounds = array<i64: 1, 64, 64>}, {pipeline_mode = #tpu.pipeline_mode<synchronous>, transform_indices = @transform_1, window_bounds = array<i64: 576, 64>}, {pipeline_mode = #tpu.pipeline_mode<synchronous>, transform_indices = @transform_2, window_bounds = array<i64: 1, 64>}, {pipeline_mode = #tpu.pipeline_mode<synchronous>, transform_indices = @transform_3, window_bounds = array<i64: 64, 4>}, {pipeline_mode = #tpu.pipeline_mode<synchronous>, transform_indices = @transform_4, window_bounds = array<i64: 1, 4>}, {transform_indices = @transform_5, window_bounds = array<i64: 1, 64, 4>}]} {
    %c0 = arith.constant 0 : index
    %c0_0 = arith.constant 0 : index
    %c0_1 = arith.constant 0 : index
    %0 = vector.load %arg1[%c0, %c0_0, %c0_1] : memref<1x64x64xbf16, #tpu.memory_space<vmem>>, vector<1x64x64xbf16>
    %1 = vector.shape_cast %0 : vector<1x64x64xbf16> to vector<64x64xbf16>
    %2 = vector.shape_cast %1 : vector<64x64xbf16> to vector<8x8x64xbf16>
    %cst = arith.constant 0.000000e+00 : f32
    %3 = vector.broadcast %cst : f32 to vector<10x24x64xf32>
    %c0_2 = arith.constant 0 : index
    %c0_3 = arith.constant 0 : index
    %c0_4 = arith.constant 0 : index
    %4 = vector.load %arg7[%c0_2, %c0_3, %c0_4] : memref<10x24x64xf32, #tpu.memory_space<vmem>>, vector<10x24x64xf32>
    tpu.vector_store %arg7[%c0_2, %c0_3, %c0_4], %3 {strides = array<i32>} : memref<10x24x64xf32, #tpu.memory_space<vmem>>, vector<10x24x64xf32>,
    %5 = arith.extf %2 : vector<8x8x64xbf16> to vector<8x8x64xf32>
    %c1 = arith.constant 1 : index
    %c8 = arith.constant 8 : index
    %c0_5 = arith.constant 0 : index
    %6 = vector.load %arg7[%c1, %c8, %c0_5] : memref<10x24x64xf32, #tpu.memory_space<vmem>>, vector<8x8x64xf32>
    tpu.vector_store %arg7[%c1, %c8, %c0_5], %5 {strides = array<i32>} : memref<10x24x64xf32, #tpu.memory_space<vmem>>, vector<8x8x64xf32>,
    %c0_6 = arith.constant 0 : index
    %c0_7 = arith.constant 0 : index
    %c0_8 = arith.constant 0 : index
    %7 = vector.load %arg7[%c0_6, %c0_7, %c0_8] : memref<10x24x64xf32, #tpu.memory_space<vmem>>, vector<10x24x64xf32>
    %8 = vector.extract_strided_slice %7 {offsets = [0, 7, 0], sizes = [8, 8, 64], strides = [1, 1, 1]} : vector<10x24x64xf32> to vector<8x8x64xf32>
    %9 = vector.shape_cast %8 : vector<8x8x64xf32> to vector<64x64xf32>
    %10 = vector.extract_strided_slice %7 {offsets = [0, 8, 0], sizes = [8, 8, 64], strides = [1, 1, 1]} : vector<10x24x64xf32> to vector<8x8x64xf32>
    %11 = vector.shape_cast %10 : vector<8x8x64xf32> to vector<64x64xf32>
    %12 = vector.extract_strided_slice %7 {offsets = [0, 9, 0], sizes = [8, 8, 64], strides = [1, 1, 1]} : vector<10x24x64xf32> to vector<8x8x64xf32>
    %13 = vector.shape_cast %12 : vector<8x8x64xf32> to vector<64x64xf32>
    %14 = vector.extract_strided_slice %7 {offsets = [1, 7, 0], sizes = [8, 8, 64], strides = [1, 1, 1]} : vector<10x24x64xf32> to vector<8x8x64xf32>
    %15 = vector.shape_cast %14 : vector<8x8x64xf32> to vector<64x64xf32>
    %16 = vector.extract_strided_slice %7 {offsets = [1, 8, 0], sizes = [8, 8, 64], strides = [1, 1, 1]} : vector<10x24x64xf32> to vector<8x8x64xf32>
    %17 = vector.shape_cast %16 : vector<8x8x64xf32> to vector<64x64xf32>
    %18 = vector.extract_strided_slice %7 {offsets = [1, 9, 0], sizes = [8, 8, 64], strides = [1, 1, 1]} : vector<10x24x64xf32> to vector<8x8x64xf32>
    %19 = vector.shape_cast %18 : vector<8x8x64xf32> to vector<64x64xf32>
    %20 = vector.extract_strided_slice %7 {offsets = [2, 7, 0], sizes = [8, 8, 64], strides = [1, 1, 1]} : vector<10x24x64xf32> to vector<8x8x64xf32>
    %21 = vector.shape_cast %20 : vector<8x8x64xf32> to vector<64x64xf32>
    %22 = vector.extract_strided_slice %7 {offsets = [2, 8, 0], sizes = [8, 8, 64], strides = [1, 1, 1]} : vector<10x24x64xf32> to vector<8x8x64xf32>
    %23 = vector.shape_cast %22 : vector<8x8x64xf32> to vector<64x64xf32>
    %24 = vector.extract_strided_slice %7 {offsets = [2, 9, 0], sizes = [8, 8, 64], strides = [1, 1, 1]} : vector<10x24x64xf32> to vector<8x8x64xf32>
    %25 = vector.shape_cast %24 : vector<8x8x64xf32> to vector<64x64xf32>
    %26 = tpu.concatenate %9, %11, %13, %15, %17, %19, %21, %23, %25 in 1 : vector<64x64xf32>, vector<64x64xf32>, vector<64x64xf32>, vector<64x64xf32>, vector<64x64xf32>, vector<64x64xf32>, vector<64x64xf32>, vector<64x64xf32>, vector<64x64xf32> -> vector<64x576xf32>
    %27 = arith.truncf %26 : vector<64x576xf32> to vector<64x576xbf16>
    %c0_9 = arith.constant 0 : index
    %c0_10 = arith.constant 0 : index
    %28 = vector.load %arg2[%c0_9, %c0_10] : memref<576x64xbf16, #tpu.memory_space<vmem>>, vector<576x64xbf16>
    %cst_11 = arith.constant dense<0.000000e+00> : vector<64x64xf32>
    %29 = tpu.matmul %27, %28, %cst_11 {dimension_numbers = #tpu.dot_dimension_numbers<[1], [0], [0], [1], [0, 0, 1, 1], [], []>} : vector<64x576xbf16>, vector<576x64xbf16>, vector<64x64xf32> -> vector<64x64xf32>
    %c0_12 = arith.constant 0 : index
    %c0_13 = arith.constant 0 : index
    %30 = vector.load %arg3[%c0_12, %c0_13] : memref<1x64xf32, #tpu.memory_space<vmem>>, vector<1x64xf32>
    %31 = vector.broadcast %30 : vector<1x64xf32> to vector<64x64xf32>
    %32 = arith.addf %29, %31 : vector<64x64xf32>
    %cst_14 = arith.constant 0.000000e+00 : f32
    %33 = vector.broadcast %cst_14 : f32 to vector<64x64xf32>
    %34 = arith.maximumf %32, %33 : vector<64x64xf32>
    %35 = arith.truncf %34 : vector<64x64xf32> to vector<64x64xbf16>
    %c0_15 = arith.constant 0 : index
    %c0_16 = arith.constant 0 : index
    %36 = vector.load %arg4[%c0_15, %c0_16] : memref<64x4xbf16, #tpu.memory_space<vmem>>, vector<64x4xbf16>
    %cst_17 = arith.constant dense<0.000000e+00> : vector<64x4xf32>
    %37 = tpu.matmul %35, %36, %cst_17 {dimension_numbers = #tpu.dot_dimension_numbers<[1], [0], [0], [1], [0, 0, 1, 1], [], []>} : vector<64x64xbf16>, vector<64x4xbf16>, vector<64x4xf32> -> vector<64x4xf32>
    %c0_18 = arith.constant 0 : index
    %c0_19 = arith.constant 0 : index
    %38 = vector.load %arg5[%c0_18, %c0_19] : memref<1x4xf32, #tpu.memory_space<vmem>>, vector<1x4xf32>
    %39 = vector.broadcast %38 : vector<1x4xf32> to vector<64x4xf32>
    %40 = arith.addf %37, %39 : vector<64x4xf32>
    %41 = arith.negf %40 : vector<64x4xf32>
    %42 = math.exp %41 : vector<64x4xf32>
    %cst_20 = arith.constant 1.000000e+00 : f32
    %43 = vector.broadcast %cst_20 : f32 to vector<64x4xf32>
    %44 = arith.addf %43, %42 : vector<64x4xf32>
    %45 = arith.divf %43, %44 : vector<64x4xf32>
    %c0_21 = arith.constant 0 : index
    %c0_22 = arith.constant 0 : index
    %c0_23 = arith.constant 0 : index
    %46 = vector.load %arg6[%c0_21, %c0_22, %c0_23] : memref<1x64x4xf32, #tpu.memory_space<vmem>>, vector<1x64x4xf32>
    %47 = vector.shape_cast %46 : vector<1x64x4xf32> to vector<64x4xf32>
    %48 = vector.shape_cast %45 : vector<64x4xf32> to vector<1x64x4xf32>
    tpu.vector_store %arg6[%c0_21, %c0_22, %c0_23], %48 {strides = array<i32>} : memref<1x64x4xf32, #tpu.memory_space<vmem>>, vector<1x64x4xf32>,
    return
  }
  func.func @transform_0(%arg0: i32) -> (i32, i32, i32) {
    %c0_i32 = arith.constant 0 : i32
    %c0_i32_0 = arith.constant 0 : i32
    %c0_i32_1 = arith.constant 0 : i32
    return %arg0, %c0_i32, %c0_i32_0 : i32, i32, i32
  }
  func.func @transform_1(%arg0: i32) -> (i32, i32) {
    %c0_i32 = arith.constant 0 : i32
    %c0_i32_0 = arith.constant 0 : i32
    %c0_i32_1 = arith.constant 0 : i32
    return %c0_i32, %c0_i32_0 : i32, i32
  }
  func.func @transform_2(%arg0: i32) -> (i32, i32) {
    %c0_i32 = arith.constant 0 : i32
    %c0_i32_0 = arith.constant 0 : i32
    %c0_i32_1 = arith.constant 0 : i32
    return %c0_i32, %c0_i32_0 : i32, i32
  }
  func.func @transform_3(%arg0: i32) -> (i32, i32) {
    %c0_i32 = arith.constant 0 : i32
    %c0_i32_0 = arith.constant 0 : i32
    %c0_i32_1 = arith.constant 0 : i32
    return %c0_i32, %c0_i32_0 : i32, i32
  }
  func.func @transform_4(%arg0: i32) -> (i32, i32) {
    %c0_i32 = arith.constant 0 : i32
    %c0_i32_0 = arith.constant 0 : i32
    %c0_i32_1 = arith.constant 0 : i32
    return %c0_i32, %c0_i32_0 : i32, i32
  }
  func.func @transform_5(%arg0: i32) -> (i32, i32, i32) {
    %c0_i32 = arith.constant 0 : i32
    %c0_i32_0 = arith.constant 0 : i32
    %c0_i32_1 = arith.constant 0 : i32
    return %arg0, %c0_i32, %c0_i32_0 : i32, i32, i32
  }
}

</mosaic_0001>

<bundles_post_ra>
// kernel: tile.13
= control target key start
LH: loop header
LB: loop body
LE: loop exit
PB: predicated region body
PF: predicated region fallthrough
CT: control target
= control target key end

     0   :  { %s22_s0 = inlined_call_operand.vmem [shape: f32[64], index: 0, kind: input, shape index: {}]   ;;  %s23_s1 = inlined_call_operand.vmem [shape: f32[4,64], index: 1, kind: output, shape index: {}]  }
   0x1   :  { %v4_v0 = vld [vmem:[%s22_s0] ss:$0 sm:$0xff] }
   0x2   :  { %5 = vst [vmem:[%s23_s1] sm:$0xf] %v4_v0 }

// kernel: tile.14
= control target key start
LH: loop header
LB: loop body
LE: loop exit
PB: predicated region body
PF: predicated region fallthrough
CT: control target
= control target key end

     0   :  { %s7_s8 = smov 3  ;;  %vm9_vm0 = vcmask 523264   ;;  %s34_s9 = smov 64   ;;  %vm16_vm1 = vcmask 1048064   ;;  %s54_s0 = inlined_call_operand.vmem [shape: f32[4,64], index: 0, kind: input, shape index: {}]   ;;  %s55_s1 = inlined_call_operand.vmem [shape: f32[1,256], index: 1, kind: output, shape index: {}]  }
   0x1   :  { %v5_v0 = vld [vmem:[%s54_s0] sm:$0xf]  ;;  %s12_s0 = smov 3 }
   0x2   :  { %6 = vst [vmem:[#allocation1] sm:$0xf] %v5_v0 }
   0x9   :  { %v13_v1 = vld [vmem:[#allocation1 + $0x1] ss:$2 sm:%s12_s0]   ;;  %v8_v2 = vld [vmem:[#allocation1] ss:$2 sm:%s7_s8]  }
   0xa   :  { %14 = vrot.lane.b32.xlu0 %v13_v1, %s34_s9  ;;  %10 = vst.msk [vmem:[#allocation0] ss:$8 sm:$0x3] %vm9_vm0, %v8_v2  }
  0x7c   :  { %v15_v3 = vpop.permute.xlu0 %14  }
  0x7d   :  { %17 = vst.msk [vmem:[#allocation0] ss:$8 sm:$0x3] %vm16_vm1, %v15_v3  }
  0x84   :  { %v22_v4 = vld [vmem:[#allocation0] sm:$0x1]  ;;  %v27_v5 = vld [vmem:[#allocation0 + $0x8] sm:$0x1] }
  0x85   :  { %25 = vst [vmem:[%s55_s1] sm:$0x1] %v22_v4  ;;  %32 = vst [vmem:[%s55_s1 + $0x1] sm:$0x1] %v27_v5 }

// kernel: unet_forward.3
= control target key start
LH: loop header
LB: loop body
LE: loop exit
PB: predicated region body
PF: predicated region fallthrough
CT: control target
= control target key end

     0   :  { %s1692_s18 = smov 0   ;;  %s2134_s0 = inlined_call_operand.vmem [shape: bf16[2,64,64], index: 0, kind: input, shape index: {}]   ;;  %s2135_s1 = inlined_call_operand.vmem [shape: bf16[576,64], index: 1, kind: input, shape index: {}]   ;;  %s2136_s2 = inlined_call_operand.vmem [shape: f32[1,64], index: 2, kind: input, shape index: {}]   ;;  %s2137_s3 = inlined_call_operand.vmem [shape: bf16[64,4], index: 3, kind: input, shape index: {}]   ;;  %s2138_s4 = inlined_call_operand.vmem [shape: f32[1,4], index: 4, kind: input, shape index: {}]   ;;  %s2139_s5 = inlined_call_operand.vmem [shape: f32[2,64,4], index: 5, kind: output, shape index: {}]  }
   0x1 LB: > { %s1287_s19 = sadd.s32 4294967295, %s1658_s18   ;;  %p1291_p0 = scmp.ge.s32.totalorder %s1658_s18, 1  ;;  %s1658_s18 = sphi %s1692_s18, %s15_s18  }
   0x2   : > { %p187_p1 = scmp.lt.s32.totalorder %s1658_s18, 3 }
   0x4   : > { %p188_p2 = pnand %p1291_p0, %p187_p1 }
   0x5   : > { %p1702_p3 = scmp.lt.s32.totalorder (!%p188_p2), %s1287_s19, 1  ;;  %s1661_s22 = smov (!%p188_p2), 64  }
   0x6   : > { %191 = sbr.rel (%p188_p2) target bundleno = 644 (0x284), region = 40 }
   0xb   : > { %vm234_vm0 = vcmask 523264   ;;  %v1660_v0 = vmov 0.0   ;;  %v1580_v1 = vld [vmem:[%s2135_s1 + $0x78] sm:$0xff]   ;;  %s2142_s19 = smov (!%p1702_p3, %s1287_s19), 1  ;;  %v1582_v3 = vld [vmem:[%s2135_s1 + $0x70] sm:$0xff]   ;;  %vm328_vm1 = vcmask 1040384  }
   0xc   : > { %238 = vst.msk [vmem:[#allocation2 + $0x18] sm:$0xff] %vm234_vm0, %v1660_v0  ;;  %239 = vst.msk [vmem:[#allocation2 + $0x20] sm:$0xff] %vm234_vm0, %v1660_v0  ;;  %v1581_v2 = vld [vmem:[%s2135_s1 + $0x38] sm:$0xff]   ;;  %1377 = vmatprep.subr.bf16.mxu0 %v1580_v1  ;;  %s1356_s27 = sshll.u32 %s2142_s19, 5  ;;  %v1583_v4 = vld [vmem:[%s2135_s1 + $0x30] sm:$0xff]   ;;  %vm369_vm2 = vcmask 1046528  }
   0xd   : > { %241 = vst.msk [vmem:[#allocation2 + $0x30] sm:$0xff] %vm234_vm0, %v1660_v0  ;;  %242 = vst.msk [vmem:[#allocation2 + $0x38] sm:$0xff] %vm234_vm0, %v1660_v0  ;;  %1378 = vmatpush3.bf16.msra.mxu0 %v1581_v2  ;;  %s219_s7 = scalar_lea.vmem %s2134_s0, %s1356_s27  ;;  %v1584_v5 = vld [vmem:[%s2135_s1 + $0xf8] sm:$0xff]   ;;  %v1586_v41 = vld [vmem:[%s2135_s1 + $0x68] sm:$0xff]   ;;  %s1357_s17 = sshll.u32 %s2142_s19, 6  ;;  %vm1223_vm3 = vcmask 31744  }
   0xe   : > { %235 = vst.msk [vmem:[#allocation2] sm:$0xff] %vm234_vm0, %v1660_v0  ;;  %236 = vst.msk [vmem:[#allocation2 + $0x8] sm:$0xff] %vm234_vm0, %v1660_v0  ;;  %1379 = vmatprep.subr.bf16.mxu0 %v1582_v3  ;;  %v1359_v6 = vld [vmem:[%s219_s7] sm:$0xff]   ;;  %v1374_v7 = vld [vmem:[%s219_s7 + $0x8] sm:$0xff]   ;;  %1417 = vmatprep.subr.bf16.mxu1 %v1584_v5  ;;  %s224_s23 = scalar_lea.vmem %s2139_s5, %s1357_s17 }
   0xf   : > { %237 = vst.msk [vmem:[#allocation2 + $0x10] sm:$0xff] %vm234_vm0, %v1660_v0  ;;  %240 = vst.msk [vmem:[#allocation2 + $0x28] sm:$0xff] %vm234_vm0, %v1660_v0  ;;  %v1375_v8 = vld [vmem:[%s219_s7 + $0x10] sm:$0xff]   ;;  %v1360_v9 = vunpack.c.l.bf16 %v1359_v6  ;;  %v1361_v10 = vunpack.c.h.bf16 %v1359_v6  ;;  %v1364_v11 = vunpack.c.l.bf16 %v1374_v7  ;;  %v1365_v12 = vunpack.c.h.bf16 %v1374_v7  ;;  %v1376_v13 = vld [vmem:[%s219_s7 + $0x18] sm:$0xff]  }
  0x10   : > { %243 = vst.msk [vmem:[#allocation2 + $0x40] sm:$0xff] %vm234_vm0, %v1660_v0  ;;  %244 = vst.msk [vmem:[#allocation2 + $0x48] sm:$0xff] %vm234_vm0, %v1660_v0  ;;  %v1368_v14 = vunpack.c.l.bf16 %v1375_v8  ;;  %v1369_v15 = vunpack.c.h.bf16 %v1375_v8  ;;  %v1372_v16 = vunpack.c.l.bf16 %v1376_v13  ;;  %v1373_v17 = vunpack.c.h.bf16 %v1376_v13  ;;  %v1585_v39 = vld [vmem:[%s2135_s1 + $0xb8] sm:$0xff]   ;;  %v1587_v61 = vld [vmem:[%s2135_s1 + $0x28] sm:$0xff]  }
  0x11   : > { %245 = vst.msk [vmem:[#allocation2 + $0x50] sm:$0xff] %vm234_vm0, %v1660_v0  ;;  %246 = vst.msk [vmem:[#allocation2 + $0x58] sm:$0xff] %vm234_vm0, %v1660_v0  ;;  %1380 = vmatpush3.bf16.msra.mxu0 %v1583_v4  ;;  %1418 = vmatpush3.bf16.msra.mxu1 %v1585_v39  ;;  %v1588_v2 = vld [vmem:[%s2135_s1 + $0xf0] sm:$0xff]  }
  0x12   : > { %247 = vst.msk [vmem:[#allocation2 + $0x60] sm:$0xff] %vm234_vm0, %v1660_v0  ;;  %248 = vst.msk [vmem:[#allocation2 + $0x68] sm:$0xff] %vm234_vm0, %v1660_v0  ;;  %1381 = vmatprep.subr.bf16.mxu0 %v1586_v41  ;;  %1419 = vmatprep.subr.bf16.mxu1 %v1588_v2  ;;  %v1589_v7 = vld [vmem:[%s2135_s1 + $0xb0] sm:$0xff]  }
  0x13   : > { %249 = vst.msk [vmem:[#allocation2 + $0x70] sm:$0xff] %vm234_vm0, %v1660_v0  ;;  %250 = vst.msk [vmem:[#allocation2 + $0x78] sm:$0xff] %vm234_vm0, %v1660_v0  ;;  %v285_v18 = vld [vmem:[#allocation2 + $0x18] sm:$0xff] }
  0x14   : > { %251 = vst.msk [vmem:[#allocation2 + $0x80] sm:$0xff] %vm234_vm0, %v1660_v0  ;;  %252 = vst.msk [vmem:[#allocation2 + $0x88] sm:$0xff] %vm234_vm0, %v1660_v0  ;;  %v288_v19 = vld [vmem:[#allocation2 + $0x30] sm:$0xff]  ;;  %v332_v26 = vrot.slane %v285_v18, 7 }
  0x15   : > { %253 = vst.msk [vmem:[#allocation2 + $0x90] sm:$0xff] %vm234_vm0, %v1660_v0  ;;  %254 = vst.msk [vmem:[#allocation2 + $0x98] sm:$0xff] %vm234_vm0, %v1660_v0  ;;  %v335_v28 = vrot.slane %v288_v19, 7  ;;  %v1812_v52 = vld [vmem:[#allocation2 + $0x8] sm:$0xff]  ;;  %1382 = vmatpush3.bf16.msra.mxu0 %v1587_v61  ;;  %1420 = vmatpush3.bf16.msra.mxu1 %v1589_v7  ;;  %v1598_v61 = vld [vmem:[%s2135_s1 + $0x50] sm:$0xff]  }
  0x16   : > { %255 = vst.msk [vmem:[#allocation2 + $0xa0] sm:$0xff] %vm234_vm0, %v1660_v0  ;;  %256 = vst.msk [vmem:[#allocation2 + $0xa8] sm:$0xff] %vm234_vm0, %v1660_v0  ;;  %v1765_v22 = vld [vmem:[#allocation2 + $0x28] sm:$0xff] }
  0x17   : > { %257 = vst.msk [vmem:[#allocation2 + $0xb0] sm:$0xff] %vm234_vm0, %v1660_v0  ;;  %258 = vst.msk [vmem:[#allocation2 + $0xb8] sm:$0xff] %vm234_vm0, %v1660_v0  ;;  %v291_v20 = vld [vmem:[#allocation2 + $0x48] sm:$0xff]  ;;  %v1771_v23 = vld [vmem:[#allocation2 + $0x40] sm:$0xff]  ;;  %v374_v34 = vrot.slane %v1765_v22, 1 }
  0x18   : > { %259 = vst.msk [vmem:[#allocation2 + $0xc0] sm:$0xff] %vm234_vm0, %v1660_v0  ;;  %260 = vst.msk [vmem:[#allocation2 + $0xc8] sm:$0xff] %vm234_vm0, %v1660_v0  ;;  %v1777_v27 = vld [vmem:[#allocation2 + $0x58] sm:$0xff]  ;;  %v338_v29 = vrot.slane %v291_v20, 7  ;;  %v377_v35 = vrot.slane %v1771_v23, 1  ;;  %v1591_v23 = vld [vmem:[%s2135_s1 + $0x20] sm:$0xff]  }
  0x19   : > { %261 = vst.msk [vmem:[#allocation2 + $0xd0] sm:$0xff] %vm234_vm0, %v1660_v0  ;;  %262 = vst.msk [vmem:[#allocation2 + $0xd8] sm:$0xff] %vm234_vm0, %v1660_v0  ;;  %v294_v21 = vld [vmem:[#allocation2 + $0x60] sm:$0xff]  ;;  %v380_v40 = vrot.slane %v1777_v27, 1  ;;  %v1602_v7 = vld [vmem:[%s2135_s1 + $0x48] sm:$0xff]  }
  0x1a   : > { %263 = vst.msk [vmem:[#allocation2 + $0xe0] sm:$0xff] %vm234_vm0, %v1660_v0  ;;  %264 = vst.msk [vmem:[#allocation2 + $0xe8] sm:$0xff] %vm234_vm0, %v1660_v0  ;;  %v1773_v24 = vld [vmem:[#allocation2 + $0x78] sm:$0xff]  ;;  %v341_v30 = vrot.slane %v294_v21, 7  ;;  %v1779_v31 = vld [vmem:[#allocation2 + $0x70] sm:$0xff] }
  0x1b   : > { %274 = vst.msk [vmem:[#allocation2 + $0x20] sm:$0xff] %vm234_vm0, %v1360_v9  ;;  %275 = vst.msk [vmem:[#allocation2 + $0x38] sm:$0xff] %vm234_vm0, %v1361_v10  ;;  %v344_v36 = vrot.slane %v1773_v24, 7  ;;  %v383_v45 = vrot.slane %v1779_v31, 1  ;;  %v299_v18 = vld [vmem:[#allocation2 + $0x88] sm:$0xff]  ;;  %v1596_v27 = vld [vmem:[%s2135_s1 + $0xe0] sm:$0xff]  }
  0x1c   : > { %276 = vst.msk [vmem:[#allocation2 + $0x50] sm:$0xff] %vm234_vm0, %v1364_v11  ;;  %277 = vst.msk [vmem:[#allocation2 + $0x68] sm:$0xff] %vm234_vm0, %v1365_v12  ;;  %v1775_v25 = vld [vmem:[#allocation2 + $0x90] sm:$0xff]  ;;  %v1590_v12 = vld [vmem:[%s2135_s1 + $0x60] sm:$0xff]   ;;  %v386_v41 = vrot.slane %v299_v18, 1 }
  0x1d   : > { %278 = vst.msk [vmem:[#allocation2 + $0x80] sm:$0xff] %vm234_vm0, %v1368_v14  ;;  %279 = vst.msk [vmem:[#allocation2 + $0x98] sm:$0xff] %vm234_vm0, %v1369_v15  ;;  %v1781_v32 = vld [vmem:[#allocation2 + $0xa8] sm:$0xff]  ;;  %v347_v37 = vrot.slane %v1775_v25, 7  ;;  %v302_v22 = vld [vmem:[#allocation2 + $0xa0] sm:$0xff]  ;;  %1383 = vmatprep.subr.bf16.mxu0 %v1590_v12 }
  0x1e   : > { %280 = vst.msk [vmem:[#allocation2 + $0xb0] sm:$0xff] %vm234_vm0, %v1372_v16  ;;  %281 = vst.msk [vmem:[#allocation2 + $0xc8] sm:$0xff] %vm234_vm0, %v1373_v17  ;;  %v350_v46 = vrot.slane %v1781_v32, 7  ;;  %v1592_v25 = vld [vmem:[%s2135_s1 + $0xe8] sm:$0xff]   ;;  %1384 = vmatpush3.bf16.msra.mxu0 %v1591_v23  ;;  %v1599_v32 = vld [vmem:[%s2135_s1 + $0x10] sm:$0xff]  }
  0x1f   : > { %v1783_v33 = vld [vmem:[#allocation2 + $0xc0] sm:$0xff]  ;;  %1421 = vmatprep.subr.bf16.mxu1 %v1592_v25  ;;  %v1605_v12 = vld [vmem:[%s2135_s1 + $0x90] sm:$0xff]   ;;  %v1608_v25 = vld [vmem:[%s2135_s1 + $0xc8] sm:$0xff]  }
  0x20   : > { %v404_v47 = vrot.slane %v1783_v33, 7  ;;  %v1817_v55 = vld [vmem:[#allocation2 + $0xd0] sm:$0xff]  ;;  %v1600_v33 = vld [vmem:[%s2135_s1 + $0xd8] sm:$0xff]   ;;  %v1606_v18 = vld [vmem:[%s2135_s1 + $0x40] sm:$0xff]  }
  0x21   : > { %v1789_v38 = vld [vmem:[#allocation2 + $0xe0] sm:$0xff]  ;;  %v311_v60 = vld [vmem:[#allocation2 + $0xe8] sm:$0xff]  ;;  %v409_v10 = vrot.slane %v1817_v55, 1  ;;  %v284_v23 = vld [vmem:[#allocation2 + $0x10] sm:$0xff] }
  0x22   : > { %v1798_v42 = vld [vmem:[#allocation2 + $0x20] sm:$0xff]  ;;  %v1800_v43 = vld [vmem:[#allocation2 + $0x38] sm:$0xff]  ;;  %v419_v54 = vrot.slane %v1789_v38, 1  ;;  %v420_v11 = vrot.slane %v311_v60, 1 }
  0x23   : > { %v1802_v44 = vld [vmem:[#allocation2 + $0x50] sm:$0xff]  ;;  %v333_v48 = vrot.slane %v1798_v42, 7  ;;  %v336_v49 = vrot.slane %v1800_v43, 7  ;;  %v1809_v50 = vld [vmem:[#allocation2 + $0x68] sm:$0xff]  ;;  %v373_v57 = vrot.slane %v1798_v42, 1  ;;  %v376_v58 = vrot.slane %v1800_v43, 1 }
  0x24   : > { %v339_v51 = vrot.slane %v1802_v44, 7  ;;  %v1814_v53 = vld [vmem:[#allocation2 + $0x80] sm:$0xff]  ;;  %v342_v56 = vrot.slane %v1809_v50, 7  ;;  %v1822_v59 = vld [vmem:[#allocation2 + $0x98] sm:$0xff]  ;;  %v1520_v8 = vpack.i.bf16 %v1798_v42, %v1812_v52  ;;  %v1530_v13 = vpack.i.bf16 %v1802_v44, %v1800_v43 }
  0x25   : > { %v1828_v62 = vsel %vm328_vm1, %v332_v26, %v333_v48  ;;  %v1831_v63 = vsel %vm328_vm1, %v335_v28, %v336_v49  ;;  %v345_v1 = vrot.slane %v1814_v53, 7  ;;  %v348_v6 = vrot.slane %v1822_v59, 7  ;;  %v1854_v9 = vld [vmem:[#allocation2 + $0xb0] sm:$0xff]  ;;  %v1870_v17 = vld [vmem:[#allocation2 + $0xc8] sm:$0xff]  ;;  %v1595_v48 = vld [vmem:[%s2135_s1 + $0x18] sm:$0xff]  }
  0x26   : > { %v1834_v0 = vsel %vm328_vm1, %v338_v29, %v339_v51  ;;  %v1515_v3 = vpack.i.bf16 %v1831_v63, %v1828_v62  ;;  %v1843_v4 = vsel %vm328_vm1, %v341_v30, %v342_v56  ;;  %v1864_v14 = vsel %vm369_vm2, %v373_v57, %v374_v34  ;;  %v1593_v29 = vld [vmem:[%s2135_s1 + $0xa8] sm:$0xff]   ;;  %v305_v51 = vld [vmem:[#allocation2 + $0xb8] sm:$0xff]  ;;  %v1597_v55 = vld [vmem:[%s2135_s1 + $0xa0] sm:$0xff]  }
  0x27   : > { %v1525_v5 = vpack.i.bf16 %v1843_v4, %v1834_v0  ;;  %v1867_v15 = vsel %vm369_vm2, %v376_v58, %v377_v35  ;;  %v379_v16 = vrot.slane %v1802_v44, 1  ;;  %v1873_v19 = vsel %vm328_vm1, %v344_v36, %v345_v1  ;;  %v1594_v36 = vld [vmem:[%s2135_s1 + $0x58] sm:$0xff]   ;;  %1422 = vmatpush3.bf16.msra.mxu1 %v1593_v29  ;;  %v1609_v29 = vld [vmem:[%s2135_s1 + $0x88] sm:$0xff]  }
  0x28   : > { %1516 = vrot.lane.b32.xlu0 %v1515_v3, %s1661_s22  ;;  %v1876_v20 = vsel %vm328_vm1, %v347_v37, %v348_v6  ;;  %v382_v21 = vrot.slane %v1809_v50, 1  ;;  %v351_v24 = vrot.slane %v1854_v9, 7  ;;  %v1535_v26 = vpack.i.bf16 %v1867_v15, %v1864_v14  ;;  %1385 = vmatprep.subr.bf16.mxu0 %v1594_v36  ;;  %v1601_v1 = vld [vmem:[%s2135_s1 + $0x98] sm:$0xff]  }
  0x29   : > { %1526 = vrot.lane.b32.xlu1 %v1525_v5, %s1661_s22  ;;  %v405_v28 = vrot.slane %v1870_v17, 7  ;;  %v1540_v30 = vpack.i.bf16 %v1876_v20, %v1873_v19  ;;  %v408_v34 = vrot.slane %v1870_v17, 1  ;;  %v1898_v35 = vsel %vm369_vm2, %v419_v54, %v420_v11  ;;  %1386 = vmatpush3.bf16.msra.mxu0 %v1595_v48  ;;  %v1612_v48 = vld [vmem:[%s2135_s1 + $0x80] sm:$0xff]  }
  0x2a   : > { %v1906_v37 = vsel %vm369_vm2, %v379_v16, %v380_v40  ;;  %v1911_v39 = vsel %vm369_vm2, %v382_v21, %v383_v45  ;;  %v389_v49 = vrot.slane %v302_v22, 1  ;;  %v1545_v31 = vpack.i.bf16 %v1814_v53, %v1809_v50  ;;  %1423 = vmatprep.subr.bf16.mxu1 %v1596_v27  ;;  %1387 = vmatprep.subr.bf16.mxu0 %v1598_v61  ;;  %v1607_v22 = vld [vmem:[%s2135_s1] sm:$0xff]   ;;  %v309_v27 = vld [vmem:[#allocation2 + $0xd8] sm:$0xff] }
  0x2b   : > { %v1917_v54 = vsel %vm369_vm2, %v408_v34, %v409_v10  ;;  %v385_v40 = vrot.slane %v1814_v53, 1  ;;  %v1550_v56 = vpack.i.bf16 %v1911_v39, %v1906_v37  ;;  %v1937_v57 = vsel %vm328_vm1, %v350_v46, %v351_v24  ;;  %1424 = vmatpush3.bf16.msra.mxu1 %v1597_v55  ;;  %v1604_v10 = vld [vmem:[%s2135_s1 + $0xd0] sm:$0xff]   ;;  %v1610_v34 = vld [vmem:[%s2135_s1 + $0x118] sm:$0xff]  }
  0x2c   : > { %1521 = vrot.lane.b32.xlu0 %v1520_v8, %s1661_s22  ;;  %v544_v45 = vpack.c.bf16 %v1898_v35, %v1917_v54  ;;  %v1942_v58 = vsel %vm328_vm1, %v404_v47, %v405_v28  ;;  %v388_v60 = vrot.slane %v1822_v59, 1  ;;  %v392_v47 = vrot.slane %v305_v51, 1  ;;  %1425 = vmatprep.subr.bf16.mxu1 %v1600_v33  ;;  %v1603_v8 = vld [vmem:[%s2135_s1 + $0x8] sm:$0xff]   ;;  %v1619_v35 = vld [vmem:[%s2137_s3] sm:$0xff]  }
  0x2d   : > { %1531 = vrot.lane.b32.xlu1 %v1530_v13, %s1661_s22  ;;  %v1555_v46 = vpack.i.bf16 %v1942_v58, %v1937_v57  ;;  %1388 = vmatpush3.bf16.msra.mxu0 %v1599_v32  ;;  %v1560_v2 = vpack.i.bf16 %v1854_v9, %v1822_v59  ;;  %v1964_v3 = vsel %vm369_vm2, %v385_v40, %v386_v41  ;;  %v391_v6 = vrot.slane %v1854_v9, 1  ;;  %v1611_v41 = vld [vmem:[%s2135_s1 + $0xc0] sm:$0xff]  }
  0x2e   : > { %v1967_v5 = vsel %vm369_vm2, %v388_v60, %v389_v49  ;;  %1389 = vmatprep.subr.bf16.mxu0 %v1602_v7  ;;  %v1570_v13 = vpack.i.bf16 %v1789_v38, %v1870_v17  ;;  %v370_v21 = vrot.slane %v1812_v52, 1  ;;  %v371_v24 = vrot.slane %v284_v23, 1 }
  0x2f   : > { %1426 = vmatpush3.bf16.msra.mxu1 %v1601_v1  ;;  %v1565_v11 = vpack.i.bf16 %v1967_v5, %v1964_v3  ;;  %v1989_v16 = vsel %vm369_vm2, %v391_v6, %v392_v47  ;;  %v414_v51 = vrot.slane %v1789_v38, 7 }
  0x30   : > { %1536 = vrot.lane.b32.xlu0 %v1535_v26, %s1661_s22  ;;  %1427 = vmatprep.subr.bf16.mxu1 %v1604_v10  ;;  %v330_v26 = vrot.slane %v1812_v52, 7  ;;  %v1575_v28 = vpack.i.bf16 %v1917_v54, %v1989_v16  ;;  %v282_v52 = vld [vmem:[#allocation2] sm:$0xff] }
  0x31   : > { %1541 = vrot.lane.b32.xlu1 %v1540_v30, %s1661_s22  ;;  %1390 = vmatpush3.bf16.msra.mxu0 %v1603_v8  ;;  %v372_v30 = vsel %vm369_vm2, %v370_v21, %v371_v24  ;;  %v329_v36 = vrot.slane %v282_v52, 7 }
  0x32   : > { %1391 = vmatprep.subr.bf16.mxu0 %v1606_v18 }
  0x33   : > { %1428 = vmatpush3.bf16.msra.mxu1 %v1605_v12  ;;  %v331_v49 = vsel %vm328_vm1, %v329_v36, %v330_v26 }
  0x34   : > { %1546 = vrot.lane.b32.xlu0 %v1545_v31, %s1661_s22  ;;  %1429 = vmatprep.subr.bf16.mxu1 %v1608_v25  ;;  %v413_v31 = vrot.slane %v309_v27, 7  ;;  %v1613_v25 = vld [vmem:[%s2135_s1 + $0x110] sm:$0xff]  }
  0x35   : > { %1551 = vrot.lane.b32.xlu1 %v1550_v56, %s1661_s22  ;;  %1392 = vmatpush3.bf16.msra.mxu0 %v1607_v22 }
  0x36   : > { %1473 = vmatprep.subr.bf16.mxu0 %v1610_v34  ;;  %v2023_v40 = vsel %vm328_vm1, %v413_v31, %v414_v51 }
  0x37   : > { %1430 = vmatpush3.bf16.msra.mxu1 %v1609_v29 }
  0x38   : > { %1556 = vrot.lane.b32.xlu0 %v1555_v46, %s1661_s22  ;;  %1431 = vmatprep.subr.bf16.mxu1 %v1611_v41 }
  0x39   : > { %1561 = vrot.lane.b32.xlu1 %v1560_v2, %s1661_s22 }
  0x3b   : > { %1432 = vmatpush3.bf16.msra.mxu1 %v1612_v48 }
  0x3c   : > { %1566 = vrot.lane.b32.xlu0 %v1565_v11, %s1661_s22 }
  0x3d   : > { %1571 = vrot.lane.b32.xlu1 %v1570_v13, %s1661_s22 }
  0x40   : > { %1576 = vrot.lane.b32.xlu0 %v1575_v28, %s1661_s22 }
  0x9a   : > { %v1517_v55 = vpop.permute.xlu0 %1516 }
  0x9b   : > { %v1519_v56 = vunpack.i.h.bf16 %v1517_v55  ;;  %v1518_v60 = vunpack.i.l.bf16 %v1517_v55  ;;  %v1527_v61 = vpop.permute.xlu1 %1526 }
  0x9c   : > { %v1529_v32 = vunpack.i.h.bf16 %v1527_v61  ;;  %v1528_v33 = vunpack.i.l.bf16 %v1527_v61 }
  0x9d   : > { %v510_v46 = vsel %vm234_vm0, %v372_v30, %v1518_v60  ;;  %v511_v47 = vsel %vm234_vm0, %v1864_v14, %v1519_v56 }
  0x9e   : > { %v1522_v1 = vpop.permute.xlu0 %1521  ;;  %v529_v2 = vpack.c.bf16 %v511_v47, %v510_v46  ;;  %v512_v8 = vsel %vm234_vm0, %v1867_v15, %v1528_v33  ;;  %v513_v10 = vsel %vm234_vm0, %v1906_v37, %v1529_v32  ;;  %v1615_v47 = vld [vmem:[%s2135_s1 + $0x100] sm:$0xff]  }
  0x9f   : > { %v1524_v38 = vunpack.i.h.bf16 %v1522_v1  ;;  %v1523_v6 = vunpack.i.l.bf16 %v1522_v1  ;;  %v1532_v7 = vpop.permute.xlu1 %1531  ;;  %v533_v24 = vpack.c.bf16 %v513_v10, %v512_v8 }
  0xa0   : > { %884 = vmatprep.mubr.bf16.mxu0 %v529_v2  ;;  %v1534_v11 = vunpack.i.h.bf16 %v1532_v7  ;;  %v1533_v12 = vunpack.i.l.bf16 %v1532_v7 }
  0xa1   : > { %v502_v13 = vsel %vm234_vm0, %v331_v49, %v1523_v6  ;;  %v503_v18 = vsel %vm234_vm0, %v1828_v62, %v1524_v38 }
  0xa2   : > { %v1537_v14 = vpop.permute.xlu0 %1536  ;;  %v528_v21 = vpack.c.bf16 %v503_v18, %v502_v13  ;;  %v504_v22 = vsel %vm234_vm0, %v1831_v63, %v1533_v12  ;;  %v505_v23 = vsel %vm234_vm0, %v1834_v0, %v1534_v11 }
  0xa3   : > { %v1539_v26 = vunpack.i.h.bf16 %v1537_v14  ;;  %v1538_v28 = vunpack.i.l.bf16 %v1537_v14  ;;  %v1542_v29 = vpop.permute.xlu1 %1541  ;;  %v531_v30 = vpack.c.bf16 %v505_v23, %v504_v22 }
  0xa4   : > { %885 = vmatmul.mubr.bf16.vlgmr.msra.gmra.mxu0 %v528_v21  ;;  %v1544_v52 = vunpack.i.h.bf16 %v1542_v29  ;;  %v1543_v62 = vunpack.i.l.bf16 %v1542_v29 }
  0xa5   : > { %1474 = vmatpush3.bf16.msra.mxu0 %v1610_v34  ;;  %949 = vmatprep.mubr.bf16.mxu1 %v531_v30  ;;  %v518_v63 = vsel %vm234_vm0, %v1798_v42, %v1538_v28  ;;  %v519_v0 = vsel %vm234_vm0, %v1800_v43, %v1539_v26  ;;  %v1614_v34 = vld [vmem:[%s2135_s1 + $0x108] sm:$0xff]  }
  0xa6   : > { %892 = vmatprep.mubr.bf16.mxu0 %v533_v24  ;;  %v530_v36 = vpack.c.bf16 %v519_v0, %v518_v63  ;;  %v1547_v41 = vpop.permute.xlu0 %1546  ;;  %1475 = vmatprep.subr.bf16.mxu0 %v1613_v25  ;;  %v514_v48 = vsel %vm234_vm0, %v1911_v39, %v1543_v62  ;;  %v515_v49 = vsel %vm234_vm0, %v1964_v3, %v1544_v52 }
  0xa7   : > { %v1549_v51 = vunpack.i.h.bf16 %v1547_v41  ;;  %v1548_v27 = vunpack.i.l.bf16 %v1547_v41  ;;  %v1552_v42 = vpop.permute.xlu1 %1551  ;;  %v537_v60 = vpack.c.bf16 %v515_v49, %v514_v48  ;;  %v540_v62 = vpack.c.bf16 %v1989_v16, %v1967_v5 }
  0xa8   : > { %950 = vmatmul.mubr.bf16.vlgmr.msra.gmra.mxu1 %v530_v36  ;;  %v1554_v31 = vunpack.i.h.bf16 %v1552_v42  ;;  %v1553_v43 = vunpack.i.l.bf16 %v1552_v42 }
  0xa9   : > { %1476 = vmatpush3.bf16.msra.mxu0 %v1613_v25  ;;  %v506_v55 = vsel %vm234_vm0, %v1843_v4, %v1548_v27  ;;  %v507_v56 = vsel %vm234_vm0, %v1873_v19, %v1549_v51 }
  0xaa   : > { %v1557_v61 = vpop.permute.xlu0 %1556  ;;  %v535_v32 = vpack.c.bf16 %v507_v56, %v506_v55  ;;  %v520_v33 = vsel %vm234_vm0, %v1802_v44, %v1553_v43  ;;  %v521_v46 = vsel %vm234_vm0, %v1809_v50, %v1554_v31  ;;  %1477 = vmatprep.subr.bf16.mxu0 %v1614_v34 }
  0xab   : > { %v1559_v1 = vunpack.i.h.bf16 %v1557_v61  ;;  %v1558_v2 = vunpack.i.l.bf16 %v1557_v61  ;;  %v1562_v4 = vpop.permute.xlu1 %1561  ;;  %v534_v19 = vpack.c.bf16 %v521_v46, %v520_v33 }
  0xac   : > { %893 = vmatmul.mubr.bf16.gmra.mxu0 %v531_v30  ;;  %957 = vmatprep.mubr.bf16.mxu1 %v535_v32  ;;  %v1564_v38 = vunpack.i.h.bf16 %v1562_v4  ;;  %v1563_v6 = vunpack.i.l.bf16 %v1562_v4 }
  0xad   : > { %900 = vmatprep.mubr.bf16.mxu0 %v537_v60  ;;  %1478 = vmatpush3.bf16.msra.mxu0 %v1614_v34  ;;  %v516_v8 = vsel %vm234_vm0, %v1967_v5, %v1558_v2  ;;  %v517_v10 = vsel %vm234_vm0, %v1989_v16, %v1559_v1 }
  0xae   : > { %v1567_v7 = vpop.permute.xlu0 %1566  ;;  %v508_v44 = vsel %vm234_vm0, %v1876_v20, %v1563_v6  ;;  %v509_v50 = vsel %vm234_vm0, %v1937_v57, %v1564_v38  ;;  %1479 = vmatprep.subr.bf16.mxu0 %v1615_v47  ;;  %v541_v22 = vpack.c.bf16 %v517_v10, %v516_v8 }
  0xaf   : > { %v1569_v11 = vunpack.i.h.bf16 %v1567_v7  ;;  %v1568_v12 = vunpack.i.l.bf16 %v1567_v7  ;;  %v539_v13 = vpack.c.bf16 %v509_v50, %v508_v44  ;;  %v1572_v18 = vpop.permute.xlu1 %1571 }
  0xb0   : > { %958 = vmatmul.mubr.bf16.gmra.mxu1 %v534_v19  ;;  %v1574_v14 = vunpack.i.h.bf16 %v1572_v18  ;;  %v1573_v21 = vunpack.i.l.bf16 %v1572_v18  ;;  %v1296_v19 = vld [vmem:[%s2136_s2] ss:$0 sm:$0xff] }
  0xb1   : > { %965 = vmatprep.mubr.bf16.mxu1 %v539_v13  ;;  %v522_v20 = vsel %vm234_vm0, %v1814_v53, %v1568_v12  ;;  %v523_v57 = vsel %vm234_vm0, %v1822_v59, %v1569_v11  ;;  %1480 = vmatpush3.bf16.msra.mxu0 %v1615_v47 }
  0xb2   : > { %v1577_v23 = vpop.permute.xlu0 %1576  ;;  %v526_v24 = vsel %vm234_vm0, %v1942_v58, %v1573_v21  ;;  %v527_v25 = vsel %vm234_vm0, %v2023_v40, %v1574_v14  ;;  %v538_v26 = vpack.c.bf16 %v523_v57, %v522_v20  ;;  %v532_v58 = vpack.c.bf16 %v1906_v37, %v1867_v15  ;;  %v1617_v15 = vld [vmem:[%s2137_s3 + $0x10] sm:$0xff]  }
  0xb3   : > { %v1579_v28 = vunpack.i.h.bf16 %v1577_v23  ;;  %v1578_v29 = vunpack.i.l.bf16 %v1577_v23  ;;  %v543_v30 = vpack.c.bf16 %v527_v25, %v526_v24  ;;  %v536_v40 = vpack.c.bf16 %v1964_v3, %v1911_v39 }
  0xb4   : > { %901 = vmatmul.mubr.bf16.gmra.mxu0 %v535_v32 }
  0xb5   : > { %908 = vmatprep.mubr.bf16.mxu0 %v541_v22  ;;  %v524_v53 = vsel %vm234_vm0, %v1854_v9, %v1578_v29  ;;  %v525_v59 = vsel %vm234_vm0, %v1870_v17, %v1579_v28  ;;  %v1616_v9 = vld [vmem:[%s2137_s3 + $0x18] sm:$0xff]   ;;  %v1618_v17 = vld [vmem:[%s2137_s3 + $0x8] sm:$0xff]  }
  0xb6   : > { %v542_v52 = vpack.c.bf16 %v525_v59, %v524_v53  ;;  %1489 = vmatprep.subr.bf16.mxu1 %v1616_v9 }
  0xb7   : > { %1490 = vmatpush3.bf16.msra.mxu1 %v1616_v9 }
  0xb8   : > { %966 = vmatmul.mubr.bf16.gmra.mxu1 %v538_v26  ;;  %1491 = vmatprep.subr.bf16.mxu1 %v1617_v15 }
  0xb9   : > { %973 = vmatprep.mubr.bf16.mxu1 %v543_v30 }
  0xbb   : > { %1492 = vmatpush3.bf16.msra.mxu1 %v1617_v15 }
  0xbc   : > { %909 = vmatmul.mubr.bf16.gmra.mxu0 %v539_v13  ;;  %1493 = vmatprep.subr.bf16.mxu1 %v1618_v17 }
  0xbd   : > { %1481 = vmatprep.mubr.msk.bf16.mxu0 %vm234_vm0, %v532_v58 }
  0xbf   : > { %1494 = vmatpush3.bf16.msra.mxu1 %v1618_v17 }
  0xc0   : > { %974 = vmatmul.mubr.bf16.gmra.mxu1 %v542_v52  ;;  %1495 = vmatprep.subr.bf16.mxu1 %v1619_v35 }
  0xc3   : > { %1496 = vmatpush3.bf16.msra.mxu1 %v1619_v35 }
  0xc4   : > { %1482 = vmatmul.mubr.msk.bf16.vlgmr.msra.gmra.mxu0 %vm234_vm0, %v536_v40 }
  0xc5   : > { %1485 = vmatprep.mubr.msk.bf16.mxu0 %vm234_vm0, %v540_v62 }
  0xcc   : > { %1486 = vmatmul.mubr.msk.bf16.gmra.mxu0 %vm234_vm0, %v544_v45 }
 0x164   : > { %v1393_v37 = vpop.f32.mrf.mxu0 }
 0x166   : > { %v1394_v39 = vpop.f32.mrf.mxu0 }
 0x167   : > { %v1395_v2 = vadd.f32 %v1394_v39, %v1393_v37 }
 0x168   : > { %v1396_v54 = vpop.f32.mrf.mxu0  ;;  %v1433_v45 = vpop.f32.mrf.mxu1 }
 0x169   : > { %v887_v13 = vadd.f32 %v1395_v2, %v1296_v19 }
 0x16a   : > { %v1397_v3 = vpop.f32.mrf.mxu0  ;;  %v1434_v5 = vpop.f32.mrf.mxu1 }
 0x16b   : > { %v1398_v44 = vadd.f32 %v1397_v3, %v1396_v54  ;;  %v1435_v50 = vadd.f32 %v1434_v5, %v1433_v45 }
 0x16c   : > { %v1399_v16 = vpop.f32.mrf.mxu0  ;;  %v1436_v63 = vpop.f32.mrf.mxu1 }
 0x16d   : > { %v890_v57 = vadd.f32 %v1398_v44, %v1296_v19  ;;  %v952_v22 = vadd.f32 %v1435_v50, %v887_v13 }
 0x16e   : > { %v1400_v0 = vpop.f32.mrf.mxu0  ;;  %v1437_v36 = vpop.f32.mrf.mxu1 }
 0x16f   : > { %v1401_v38 = vadd.f32 %v1400_v0, %v1399_v16  ;;  %v1438_v18 = vadd.f32 %v1437_v36, %v1436_v63 }
 0x170   : > { %v1402_v41 = vpop.f32.mrf.mxu0  ;;  %v1439_v48 = vpop.f32.mrf.mxu1 }
 0x171   : > { %v895_v21 = vadd.f32 %v1401_v38, %v1296_v19  ;;  %v955_v59 = vadd.f32 %v1438_v18, %v890_v57 }
 0x172   : > { %v1403_v49 = vpop.f32.mrf.mxu0  ;;  %v1440_v34 = vpop.f32.mrf.mxu1 }
 0x173   : > { %v1404_v4 = vadd.f32 %v1403_v49, %v1402_v41  ;;  %v1441_v10 = vadd.f32 %v1440_v34, %v1439_v48 }
 0x174   : > { %v1405_v51 = vpop.f32.mrf.mxu0  ;;  %v1442_v27 = vpop.f32.mrf.mxu1 }
 0x175   : > { %v898_v14 = vadd.f32 %v1404_v4, %v1296_v19  ;;  %v960_v25 = vadd.f32 %v1441_v10, %v895_v21  ;;  %v1337_v4 = vld [vmem:[%s2138_s4] ss:$0 sm:$0xff] }
 0x176   : > { %v1406_v42 = vpop.f32.mrf.mxu0  ;;  %v1443_v31 = vpop.f32.mrf.mxu1 }
 0x177   : > { %v1444_v8 = vadd.f32 %v1443_v31, %v1442_v27  ;;  %v1407_v24 = vadd.f32 %v1406_v42, %v1405_v51 }
 0x178   : > { %v1408_v43 = vpop.f32.mrf.mxu0  ;;  %v1445_v55 = vpop.f32.mrf.mxu1 }
 0x179   : > { %v963_v23 = vadd.f32 %v1444_v8, %v898_v14  ;;  %v903_v35 = vadd.f32 %v1407_v24, %v1296_v19 }
 0x17a   : > { %v1409_v56 = vpop.f32.mrf.mxu0  ;;  %v1446_v60 = vpop.f32.mrf.mxu1 }
 0x17b   : > { %v1410_v62 = vadd.f32 %v1409_v56, %v1408_v43  ;;  %v1447_v9 = vadd.f32 %v1446_v60, %v1445_v55 }
 0x17c   : > { %v1411_v61 = vpop.f32.mrf.mxu0  ;;  %v1448_v32 = vpop.f32.mrf.mxu1 }
 0x17d   : > { %v906_v41 = vadd.f32 %v1410_v62, %v1296_v19  ;;  %v968_v49 = vadd.f32 %v1447_v9, %v903_v35 }
 0x17e   : > { %v1412_v33 = vpop.f32.mrf.mxu0  ;;  %v1449_v46 = vpop.f32.mrf.mxu1 }
 0x17f   : > { %v1413_v58 = vadd.f32 %v1412_v33, %v1411_v61  ;;  %v1450_v45 = vadd.f32 %v1449_v46, %v1448_v32 }
 0x180   : > { %v1414_v47 = vpop.f32.mrf.mxu0  ;;  %v1451_v1 = vpop.f32.mrf.mxu1 }
 0x181   : > { %v911_v63 = vadd.f32 %v1413_v58, %v1296_v19  ;;  %v971_v55 = vadd.f32 %v1450_v45, %v906_v41 }
 0x182   : > { %v1415_v6 = vpop.f32.mrf.mxu0  ;;  %v1452_v7 = vpop.f32.mrf.mxu1 }
 0x183   : > { %v1416_v29 = vadd.f32 %v1415_v6, %v1414_v47  ;;  %v1453_v37 = vadd.f32 %v1452_v7, %v1451_v1 }
 0x184   : > { %v1454_v11 = vpop.f32.mrf.mxu1  ;;  %v1483_v12 = vpop.f32.mrf.mxu0 }
 0x185   : > { %v1025_v52 = vadd.f32 %v1483_v12, %v960_v25  ;;  %v914_v3 = vadd.f32 %v1416_v29, %v1296_v19  ;;  %v976_v27 = vadd.f32 %v1453_v37, %v911_v63 }
 0x186   : > { %v1016_v20 = vpop.f32.mrf.mxu0  ;;  %v1455_v26 = vpop.f32.mrf.mxu1 }
 0x187   : > { %v1017_v30 = vadd.f32 %v1016_v20, %v952_v22  ;;  %v1456_v15 = vadd.f32 %v1455_v26, %v1454_v11  ;;  %v1049_v0 = vmax.f32 %v1025_v52, 0.0 }
 0x188   : > { %v1484_v28 = vpop.f32.mrf.mxu0 }
 0x189   : > { %v1028_v53 = vadd.f32 %v1484_v28, %v963_v23  ;;  %v1047_v5 = vmax.f32 %v1017_v30, 0.0  ;;  %v979_v34 = vadd.f32 %v1456_v15, %v914_v3 }
 0x18a   : > { %v1019_v40 = vpop.f32.mrf.mxu0 }
 0x18b   : > { %v1020_v17 = vadd.f32 %v1019_v40, %v955_v59  ;;  %v1050_v39 = vmax.f32 %v1028_v53, 0.0 }
 0x18c   : > { %v1487_v54 = vpop.f32.mrf.mxu0 }
 0x18d   : > { %v1048_v16 = vmax.f32 %v1020_v17, 0.0  ;;  %v1056_v51 = vpack.c.bf16 %v1050_v39, %v1049_v0  ;;  %v1041_v56 = vadd.f32 %v1487_v54, %v976_v27 }
 0x18e   : > { %v1032_v36 = vpop.f32.mrf.mxu0 }
 0x18f   : > { %v1055_v48 = vpack.c.bf16 %v1048_v16, %v1047_v5  ;;  %v1033_v31 = vadd.f32 %v1032_v36, %v968_v49  ;;  %v1053_v47 = vmax.f32 %v1041_v56, 0.0 }
 0x190   : > { %v1488_v42 = vpop.f32.mrf.mxu0 }
 0x191   : > { %v1044_v43 = vadd.f32 %v1488_v42, %v979_v34  ;;  %1497 = vmatprep.mubr.msk.bf16.mxu1 %vm234_vm0, %v1055_v48  ;;  %v1051_v33 = vmax.f32 %v1033_v31, 0.0 }
 0x192   : > { %v1035_v60 = vpop.f32.mrf.mxu0  ;;  %1498 = vmatmul.mubr.msk.bf16.vlgmr.msra.gmra.mxu1 %vm234_vm0, %v1056_v51 }
 0x193   : > { %v1036_v61 = vadd.f32 %v1035_v60, %v971_v55  ;;  %v1054_v32 = vmax.f32 %v1044_v43, 0.0 }
 0x195   : > { %v1052_v46 = vmax.f32 %v1036_v61, 0.0  ;;  %v1058_v2 = vpack.c.bf16 %v1054_v32, %v1053_v47 }
 0x197   : > { %v1057_v1 = vpack.c.bf16 %v1052_v46, %v1051_v33 }
 0x199   : > { %1501 = vmatprep.mubr.msk.bf16.mxu1 %vm234_vm0, %v1057_v1 }
 0x19a   : > { %1502 = vmatmul.mubr.msk.bf16.gmra.mxu1 %vm234_vm0, %v1058_v2 }
 0x252   : > { %v1499_v19 = vpop.f32.mrf.mxu1 }
 0x253   : > { %v1153_v38 = vadd.f32 %v1499_v19, %v1337_v4 }
 0x254   : > { %v1144_v6 = vpop.f32.mrf.mxu1 }
 0x255   : > { %v1348_v7 = vmul.f32 -1.442695, %v1153_v38  ;;  %v1145_v44 = vadd.f32 %v1337_v4, %v1144_v6 }
 0x256   : > { %v1500_v50 = vpop.f32.mrf.mxu1 }
 0x257   : > { %1620 = vpow2.f32 %v1348_v7  ;;  %v1346_v8 = vmul.f32 -1.442695, %v1145_v44  ;;  %v1156_v10 = vadd.f32 %v1500_v50, %v1337_v4 }
 0x258   : > { %v1147_v11 = vpop.f32.mrf.mxu1 }
 0x259   : > { %1622 = vpow2.f32 %v1346_v8  ;;  %v1349_v12 = vmul.f32 -1.442695, %v1156_v10  ;;  %v1148_v13 = vadd.f32 %v1337_v4, %v1147_v11 }
 0x25a   : > { %v1503_v18 = vpop.f32.mrf.mxu1 }
 0x25b   : > { %1624 = vpow2.f32 %v1349_v12  ;;  %v1347_v14 = vmul.f32 -1.442695, %v1148_v13  ;;  %v1169_v21 = vadd.f32 %v1503_v18, %v1337_v4 }
 0x25c   : > { %v1160_v20 = vpop.f32.mrf.mxu1 }
 0x25d   : > { %1626 = vpow2.f32 %v1347_v14  ;;  %v1352_v57 = vmul.f32 -1.442695, %v1169_v21  ;;  %v1161_v22 = vadd.f32 %v1337_v4, %v1160_v20 }
 0x25e   : > { %v1504_v23 = vpop.f32.mrf.mxu1 }
 0x25f   : > { %1628 = vpow2.f32 %v1352_v57  ;;  %v1350_v24 = vmul.f32 -1.442695, %v1161_v22  ;;  %v1172_v25 = vadd.f32 %v1504_v23, %v1337_v4 }
 0x260   : > { %v1163_v26 = vpop.f32.mrf.mxu1 }
 0x261   : > { %1630 = vpow2.f32 %v1350_v24  ;;  %v1353_v28 = vmul.f32 -1.442695, %v1172_v25  ;;  %v1164_v29 = vadd.f32 %v1337_v4, %v1163_v26 }
 0x263   : > { %1632 = vpow2.f32 %v1353_v28  ;;  %v1351_v30 = vmul.f32 -1.442695, %v1164_v29 }
 0x264   : > { %v1621_v53 = vpop.eup %1620 }
 0x265   : > { %v1201_v59 = vadd.f32 1.0, %v1621_v53  ;;  %1634 = vpow2.f32 %v1351_v30 }
 0x266   : > { %v1623_v58 = vpop.eup %1622 }
 0x267   : > { %1636 = vrcp.f32 %v1201_v59  ;;  %v1199_v52 = vadd.f32 1.0, %v1623_v58 }
 0x268   : > { %v1625_v40 = vpop.eup %1624 }
 0x269   : > { %1638 = vrcp.f32 %v1199_v52  ;;  %v1202_v62 = vadd.f32 1.0, %v1625_v40 }
 0x26a   : > { %v1627_v9 = vpop.eup %1626 }
 0x26b   : > { %1640 = vrcp.f32 %v1202_v62  ;;  %v1200_v15 = vadd.f32 1.0, %v1627_v9 }
 0x26c   : > { %v1629_v17 = vpop.eup %1628 }
 0x26d   : > { %1642 = vrcp.f32 %v1200_v15  ;;  %v1205_v35 = vadd.f32 1.0, %v1629_v17 }
 0x26e   : > { %v1631_v37 = vpop.eup %1630 }
 0x26f   : > { %1644 = vrcp.f32 %v1205_v35  ;;  %v1203_v39 = vadd.f32 1.0, %v1631_v37 }
 0x270   : > { %v1633_v54 = vpop.eup %1632 }
 0x271   : > { %1646 = vrcp.f32 %v1203_v39  ;;  %v1206_v45 = vadd.f32 1.0, %v1633_v54 }
 0x272   : > { %v1635_v3 = vpop.eup %1634 }
 0x273   : > { %1648 = vrcp.f32 %v1206_v45  ;;  %v1204_v5 = vadd.f32 1.0, %v1635_v3 }
 0x274   : > { %v1637_v16 = vpop.eup %1636 }
 0x275   : > { %1226 = vst.msk [vmem:[%s224_s23 + $0x10] sm:$0xff] %vm1223_vm3, %v1637_v16  ;;  %1650 = vrcp.f32 %v1204_v5 }
 0x276   : > { %v1639_v63 = vpop.eup %1638 }
 0x277   : > { %1224 = vst.msk [vmem:[%s224_s23] sm:$0xff] %vm1223_vm3, %v1639_v63 }
 0x278   : > { %v1641_v0 = vpop.eup %1640 }
 0x279   : > { %1227 = vst.msk [vmem:[%s224_s23 + $0x18] sm:$0xff] %vm1223_vm3, %v1641_v0 }
 0x27a   : > { %v1643_v36 = vpop.eup %1642 }
 0x27b   : > { %1225 = vst.msk [vmem:[%s224_s23 + $0x8] sm:$0xff] %vm1223_vm3, %v1643_v36 }
 0x27c   : > { %v1645_v41 = vpop.eup %1644 }
 0x27d   : > { %1230 = vst.msk [vmem:[%s224_s23 + $0x30] sm:$0xff] %vm1223_vm3, %v1645_v41 }
 0x27e   : > { %v1647_v48 = vpop.eup %1646 }
 0x27f   : > { %1228 = vst.msk [vmem:[%s224_s23 + $0x20] sm:$0xff] %vm1223_vm3, %v1647_v48 }
 0x280   : > { %v1649_v49 = vpop.eup %1648 }
 0x281   : > { %1231 = vst.msk [vmem:[%s224_s23 + $0x38] sm:$0xff] %vm1223_vm3, %v1649_v49 }
 0x282   : > { %v1651_v34 = vpop.eup %1650 }
 0x283   : > { %1229 = vst.msk [vmem:[%s224_s23 + $0x28] sm:$0xff] %vm1223_vm3, %v1651_v34 }
 0x284 PF: > { %s15_s18 = sadd.s32 1, %s1658_s18  }
 0x285   : > { %p12_p4 = scmp.ge.s32.totalorder %s15_s18, 4  }
 0x287   :  { %14 = sbr.rel (!%p12_p4) target bundleno = 1 (0x1), region = 71 }

// kernel: unet_forward.2
= control target key start
LH: loop header
LB: loop body
LE: loop exit
PB: predicated region body
PF: predicated region fallthrough
CT: control target
= control target key end

     0   :  { %s6332_s17 = smov 0   ;;  %s8766_s0 = inlined_call_operand.vmem [shape: bf16[2,256,27], index: 0, kind: input, shape index: {}]   ;;  %s8767_s1 = inlined_call_operand.vmem [shape: bf16[27,64], index: 1, kind: input, shape index: {}]   ;;  %s8768_s2 = inlined_call_operand.vmem [shape: f32[1,64], index: 2, kind: input, shape index: {}]   ;;  %s8769_s3 = inlined_call_operand.vmem [shape: bf16[576,64], index: 3, kind: input, shape index: {}]   ;;  %s8770_s4 = inlined_call_operand.vmem [shape: f32[1,64], index: 4, kind: input, shape index: {}]   ;;  %s8771_s5 = inlined_call_operand.vmem [shape: bf16[576,128], index: 5, kind: input, shape index: {}]   ;;  %s8772_s6 = inlined_call_operand.vmem [shape: f32[1,128], index: 6, kind: input, shape index: {}]   ;;  %s8773_s7 = inlined_call_operand.vmem [shape: bf16[1152,128], index: 7, kind: input, shape index: {}]   ;;  %s8774_s8 = inlined_call_operand.vmem [shape: f32[1,128], index: 8, kind: input, shape index: {}]   ;;  %s8775_s9 = inlined_call_operand.vmem [shape: bf16[128,256], index: 9, kind: input, shape index: {}]   ;;  %s8776_s10 = inlined_call_operand.vmem [shape: f32[1,256], index: 10, kind: input, shape index: {}]   ;;  %s8777_s11 = inlined_call_operand.vmem [shape: bf16[2,16,256], index: 11, kind: output, shape index: {}]  }
   0x1 LB: > { %s4844_s18 = sadd.s32 4294967295, %s6266_s17   ;;  %p4848_p0 = scmp.ge.s32.totalorder %s6266_s17, 1  ;;  %s6266_s17 = sphi %s6332_s17, %s21_s17  }
   0x2   : > { %p337_p1 = scmp.lt.s32.totalorder %s6266_s17, 3 }
   0x4   : > { %p338_p2 = pnand %p4848_p0, %p337_p1 }
   0x6   : > { %341 = sbr.rel (%p338_p2) target bundleno = 1604 (0x644), region = 64 }
   0xb   : > { %v6044_v0 = vld [vmem:[%s8767_s1 + $0x8] sm:$0x3f]   ;;  %vm571_vm0 = vcmask 1044480   ;;  %vm572_vm1 = vcmask 1045504   ;;  %v6268_v1 = vmov 65535   ;;  %v6045_v3 = vld [vmem:[%s8767_s1] sm:$0xff]  }
   0xc   : > { %v573_v2 = vsel %vm571_vm0, 4294967295, %v6268_v1  ;;  %p377_p3 = scmp.lt.s32.totalorder %s4844_s18, 1  ;;  %vm522_vm2 = vcmask 220160   ;;  %vm771_vm3 = vcmask 523264   ;;  %v8778_v22 = vmov 0.0   ;;  %v6062_v23 = vld [vmem:[%s8769_s3 + $0x78] sm:$0xff]  }
   0xd   : > { %v574_v4 = vsel %vm572_vm1, %v573_v2, 0  ;;  %781 = vst.msk [vmem:[#allocation2 + $0x48] sm:$0xff] %vm771_vm3, %v8778_v22  ;;  %772 = vst.msk [vmem:[#allocation2] sm:$0xff] %vm771_vm3, %v8778_v22  ;;  %v6063_v24 = vld [vmem:[%s8769_s3 + $0x38] sm:$0xff]   ;;  %5097 = vmatprep.subr.bf16.mxu1 %v6062_v23  ;;  %v6064_v25 = vld [vmem:[%s8769_s3 + $0x70] sm:$0xff]   ;;  %vm997_vm4 = vcmask 1040384  }
   0xe   : > { %v576_v5 = vand.u32 %v6044_v0, %v574_v4  ;;  %s8953_s18 = smov (!%p377_p3, %s4844_s18), 1  ;;  %773 = vst.msk [vmem:[#allocation2 + $0x8] sm:$0xff] %vm771_vm3, %v8778_v22  ;;  %774 = vst.msk [vmem:[#allocation2 + $0x10] sm:$0xff] %vm771_vm3, %v8778_v22  ;;  %5098 = vmatpush3.bf16.msra.mxu1 %v6063_v24  ;;  %v6065_v26 = vld [vmem:[%s8769_s3 + $0x30] sm:$0xff]   ;;  %v6066_v27 = vld [vmem:[%s8769_s3 + $0x68] sm:$0xff]   ;;  %s6270_s20 = smov 64  }
   0xf   : > { %s5075_s23 = sshll.u32 %s8953_s18, 7  ;;  %775 = vst.msk [vmem:[#allocation2 + $0x18] sm:$0xff] %vm771_vm3, %v8778_v22  ;;  %776 = vst.msk [vmem:[#allocation2 + $0x20] sm:$0xff] %vm771_vm3, %v8778_v22  ;;  %5099 = vmatprep.subr.bf16.mxu1 %v6064_v25  ;;  %v6067_v28 = vld [vmem:[%s8769_s3 + $0x28] sm:$0xff]   ;;  %v6068_v29 = vld [vmem:[%s8769_s3 + $0x60] sm:$0xff]   ;;  %vm1126_vm5 = vcmask 1046528  }
  0x10   : > { %5601 = vmatprep.subr.bf16.mxu0 %v576_v5  ;;  %s6352_s26 = scalar_lea.vmem %s8766_s0, %s5075_s23  ;;  %777 = vst.msk [vmem:[#allocation2 + $0x28] sm:$0xff] %vm771_vm3, %v8778_v22  ;;  %778 = vst.msk [vmem:[#allocation2 + $0x30] sm:$0xff] %vm771_vm3, %v8778_v22  ;;  %v6069_v30 = vld [vmem:[%s8769_s3 + $0x20] sm:$0xff]   ;;  %v6070_v31 = vld [vmem:[%s8769_s3 + $0x58] sm:$0xff]   ;;  %s5076_s23 = sshll.u32 %s8953_s18, 4 }
  0x11   : > { %5602 = vmatpush3.bf16.msra.mxu0 %v576_v5  ;;  %v6046_v6 = vld [vmem:[%s6352_s26] sm:$0xff]   ;;  %v6047_v7 = vld [vmem:[%s6352_s26 + $0x8] sm:$0xff]   ;;  %v6048_v8 = vld [vmem:[%s6352_s26 + $0x10] sm:$0xff]   ;;  %779 = vst.msk [vmem:[#allocation2 + $0x38] sm:$0xff] %vm771_vm3, %v8778_v22 }
  0x12   : > { %5603 = vmatprep.subr.bf16.mxu0 %v6045_v3  ;;  %5605 = vmatprep.mubr.msk.bf16.mxu0 %vm522_vm2, %v6046_v6  ;;  %v6049_v9 = vld [vmem:[%s6352_s26 + $0x18] sm:$0xff]   ;;  %v6050_v10 = vld [vmem:[%s6352_s26 + $0x20] sm:$0xff]   ;;  %v6051_v11 = vld [vmem:[%s6352_s26 + $0x28] sm:$0xff]   ;;  %780 = vst.msk [vmem:[#allocation2 + $0x40] sm:$0xff] %vm771_vm3, %v8778_v22 }
  0x13   : > { %v6052_v12 = vld [vmem:[%s6352_s26 + $0x30] sm:$0xff]   ;;  %v6053_v13 = vld [vmem:[%s6352_s26 + $0x38] sm:$0xff]   ;;  %v6054_v14 = vld [vmem:[%s6352_s26 + $0x40] sm:$0xff]   ;;  %782 = vst.msk [vmem:[#allocation2 + $0x50] sm:$0xff] %vm771_vm3, %v8778_v22  ;;  %5100 = vmatpush3.bf16.msra.mxu1 %v6065_v26 }
  0x14   : > { %v6055_v15 = vld [vmem:[%s6352_s26 + $0x48] sm:$0xff]   ;;  %v6056_v16 = vld [vmem:[%s6352_s26 + $0x50] sm:$0xff]   ;;  %v6057_v17 = vld [vmem:[%s6352_s26 + $0x58] sm:$0xff]   ;;  %783 = vst.msk [vmem:[#allocation2 + $0x58] sm:$0xff] %vm771_vm3, %v8778_v22  ;;  %5101 = vmatprep.subr.bf16.mxu1 %v6066_v27 }
  0x15   : > { %5604 = vmatpush3.bf16.msra.mxu0 %v6045_v3  ;;  %v6058_v18 = vld [vmem:[%s6352_s26 + $0x60] sm:$0xff]   ;;  %v6059_v19 = vld [vmem:[%s6352_s26 + $0x68] sm:$0xff]   ;;  %v6060_v20 = vld [vmem:[%s6352_s26 + $0x70] sm:$0xff]   ;;  %784 = vst.msk [vmem:[#allocation2 + $0x60] sm:$0xff] %vm771_vm3, %v8778_v22 }
  0x16   : > { %v6061_v21 = vld [vmem:[%s6352_s26 + $0x78] sm:$0xff]   ;;  %785 = vst.msk [vmem:[#allocation2 + $0x68] sm:$0xff] %vm771_vm3, %v8778_v22  ;;  %786 = vst.msk [vmem:[#allocation2 + $0x70] sm:$0xff] %vm771_vm3, %v8778_v22  ;;  %v6620_v32 = vld [vmem:[%s8768_s2] ss:$0 sm:$0xff]  ;;  %s386_s26 = scalar_lea.vmem %s8777_s11, %s5076_s23 }
  0x17   : > { %787 = vst.msk [vmem:[#allocation2 + $0x78] sm:$0xff] %vm771_vm3, %v8778_v22  ;;  %788 = vst.msk [vmem:[#allocation2 + $0x80] sm:$0xff] %vm771_vm3, %v8778_v22  ;;  %5102 = vmatpush3.bf16.msra.mxu1 %v6067_v28  ;;  %v6071_v33 = vld [vmem:[%s8769_s3 + $0x18] sm:$0xff]   ;;  %v6072_v35 = vld [vmem:[%s8769_s3 + $0x50] sm:$0xff]  }
  0x18   : > { %5606 = vmatmul.mubr.msk.bf16.vlgmr.msra.gmra.mxu0 %vm522_vm2, %v6047_v7  ;;  %789 = vst.msk [vmem:[#allocation2 + $0x88] sm:$0xff] %vm771_vm3, %v8778_v22  ;;  %790 = vst.msk [vmem:[#allocation2 + $0x90] sm:$0xff] %vm771_vm3, %v8778_v22  ;;  %5103 = vmatprep.subr.bf16.mxu1 %v6068_v29  ;;  %v6073_v40 = vld [vmem:[%s8769_s3 + $0x10] sm:$0xff]   ;;  %v6074_v54 = vld [vmem:[%s8769_s3 + $0x48] sm:$0xff]  }
  0x19   : > { %5609 = vmatprep.mubr.msk.bf16.mxu0 %vm522_vm2, %v6048_v8  ;;  %791 = vst.msk [vmem:[#allocation2 + $0x98] sm:$0xff] %vm771_vm3, %v8778_v22  ;;  %792 = vst.msk [vmem:[#allocation2 + $0xa0] sm:$0xff] %vm771_vm3, %v8778_v22  ;;  %v885_v53 = vld [vmem:[#allocation2 + $0x40] sm:$0xff]  ;;  %v6075_v55 = vld [vmem:[%s8769_s3 + $0x8] sm:$0xff]  }
  0x1a   : > { %793 = vst.msk [vmem:[#allocation2 + $0xa8] sm:$0xff] %vm771_vm3, %v8778_v22  ;;  %794 = vst.msk [vmem:[#allocation2 + $0xb0] sm:$0xff] %vm771_vm3, %v8778_v22  ;;  %v881_v60 = vld [vmem:[#allocation2 + $0x20] sm:$0xff]  ;;  %v1008_v62 = vrot.slane %v885_v53, 7  ;;  %v6077_v4 = vld [vmem:[%s8769_s3 + $0xf8] sm:$0xff]  }
  0x1b   : > { %795 = vst.msk [vmem:[#allocation2 + $0xb8] sm:$0xff] %vm771_vm3, %v8778_v22  ;;  %796 = vst.msk [vmem:[#allocation2 + $0xc0] sm:$0xff] %vm771_vm3, %v8778_v22  ;;  %5104 = vmatpush3.bf16.msra.mxu1 %v6069_v30  ;;  %v6076_v3 = vld [vmem:[%s8769_s3 + $0x40] sm:$0xff]   ;;  %v1003_v8 = vrot.slane %v881_v60, 7  ;;  %5209 = vmatprep.subr.bf16.mxu0 %v6077_v4  ;;  %v6081_v23 = vld [vmem:[%s8769_s3 + $0xf0] sm:$0xff]  }
  0x1c   : > { %797 = vst.msk [vmem:[#allocation2 + $0xc8] sm:$0xff] %vm771_vm3, %v8778_v22  ;;  %798 = vst.msk [vmem:[#allocation2 + $0xd0] sm:$0xff] %vm771_vm3, %v8778_v22  ;;  %5105 = vmatprep.subr.bf16.mxu1 %v6070_v31  ;;  %v6078_v5 = vld [vmem:[%s8769_s3] sm:$0xff]   ;;  %v6695_v26 = vld [vmem:[#allocation2 + $0x8] sm:$0xff] }
  0x1d   : > { %799 = vst.msk [vmem:[#allocation2 + $0xd8] sm:$0xff] %vm771_vm3, %v8778_v22  ;;  %800 = vst.msk [vmem:[#allocation2 + $0xe0] sm:$0xff] %vm771_vm3, %v8778_v22  ;;  %v6697_v27 = vld [vmem:[#allocation2 + $0x10] sm:$0xff]  ;;  %v889_v28 = vld [vmem:[#allocation2 + $0x60] sm:$0xff] }
  0x1e   : > { %801 = vst.msk [vmem:[#allocation2 + $0xe8] sm:$0xff] %vm771_vm3, %v8778_v22  ;;  %802 = vst.msk [vmem:[#allocation2 + $0xf0] sm:$0xff] %vm771_vm3, %v8778_v22 }
  0x1f   : > { %803 = vst.msk [vmem:[#allocation2 + $0xf8] sm:$0xff] %vm771_vm3, %v8778_v22  ;;  %804 = vst.msk [vmem:[#allocation2 + $0x100] sm:$0xff] %vm771_vm3, %v8778_v22  ;;  %5106 = vmatpush3.bf16.msra.mxu1 %v6071_v33 }
  0x20   : > { %5610 = vmatmul.mubr.msk.bf16.gmra.mxu0 %vm522_vm2, %v6049_v9  ;;  %805 = vst.msk [vmem:[#allocation2 + $0x108] sm:$0xff] %vm771_vm3, %v8778_v22  ;;  %806 = vst.msk [vmem:[#allocation2 + $0x110] sm:$0xff] %vm771_vm3, %v8778_v22  ;;  %5107 = vmatprep.subr.bf16.mxu1 %v6072_v35  ;;  %v6079_v9 = vld [vmem:[%s8769_s3 + $0xb8] sm:$0xff]  }
  0x21   : > { %5613 = vmatprep.mubr.msk.bf16.mxu0 %vm522_vm2, %v6050_v10  ;;  %807 = vst.msk [vmem:[#allocation2 + $0x118] sm:$0xff] %vm771_vm3, %v8778_v22  ;;  %808 = vst.msk [vmem:[#allocation2 + $0x120] sm:$0xff] %vm771_vm3, %v8778_v22  ;;  %5210 = vmatpush3.bf16.msra.mxu0 %v6079_v9 }
  0x22   : > { %809 = vst.msk [vmem:[#allocation2 + $0x128] sm:$0xff] %vm771_vm3, %v8778_v22  ;;  %810 = vst.msk [vmem:[#allocation2 + $0x130] sm:$0xff] %vm771_vm3, %v8778_v22  ;;  %5211 = vmatprep.subr.bf16.mxu0 %v6081_v23  ;;  %v901_v9 = vld [vmem:[#allocation2 + $0xc0] sm:$0xff] }
  0x23   : > { %811 = vst.msk [vmem:[#allocation2 + $0x138] sm:$0xff] %vm771_vm3, %v8778_v22  ;;  %812 = vst.msk [vmem:[#allocation2 + $0x140] sm:$0xff] %vm771_vm3, %v8778_v22  ;;  %5108 = vmatpush3.bf16.msra.mxu1 %v6073_v40 }
  0x24   : > { %813 = vst.msk [vmem:[#allocation2 + $0x148] sm:$0xff] %vm771_vm3, %v8778_v22  ;;  %814 = vst.msk [vmem:[#allocation2 + $0x150] sm:$0xff] %vm771_vm3, %v8778_v22  ;;  %5109 = vmatprep.subr.bf16.mxu1 %v6074_v54  ;;  %v6084_v54 = vld [vmem:[%s8769_s3 + $0xa8] sm:$0xff]  }
  0x25   : > { %815 = vst.msk [vmem:[#allocation2 + $0x158] sm:$0xff] %vm771_vm3, %v8778_v22  ;;  %816 = vst.msk [vmem:[#allocation2 + $0x160] sm:$0xff] %vm771_vm3, %v8778_v22 }
  0x26   : > { %817 = vst.msk [vmem:[#allocation2 + $0x168] sm:$0xff] %vm771_vm3, %v8778_v22  ;;  %818 = vst.msk [vmem:[#allocation2 + $0x170] sm:$0xff] %vm771_vm3, %v8778_v22 }
  0x27   : > { %819 = vst.msk [vmem:[#allocation2 + $0x178] sm:$0xff] %vm771_vm3, %v8778_v22  ;;  %820 = vst.msk [vmem:[#allocation2 + $0x180] sm:$0xff] %vm771_vm3, %v8778_v22  ;;  %5110 = vmatpush3.bf16.msra.mxu1 %v6075_v55 }
  0x28   : > { %5614 = vmatmul.mubr.msk.bf16.gmra.mxu0 %vm522_vm2, %v6051_v11  ;;  %821 = vst.msk [vmem:[#allocation2 + $0x188] sm:$0xff] %vm771_vm3, %v8778_v22  ;;  %822 = vst.msk [vmem:[#allocation2 + $0x190] sm:$0xff] %vm771_vm3, %v8778_v22  ;;  %5111 = vmatprep.subr.bf16.mxu1 %v6076_v3  ;;  %v897_v3 = vld [vmem:[#allocation2 + $0xa0] sm:$0xff] }
  0x29   : > { %5617 = vmatprep.mubr.msk.bf16.mxu0 %vm522_vm2, %v6052_v12  ;;  %823 = vst.msk [vmem:[#allocation2 + $0x198] sm:$0xff] %vm771_vm3, %v8778_v22  ;;  %824 = vst.msk [vmem:[#allocation2 + $0x1a0] sm:$0xff] %vm771_vm3, %v8778_v22  ;;  %v1023_v23 = vrot.slane %v897_v3, 7 }
  0x2a   : > { %825 = vst.msk [vmem:[#allocation2 + $0x1a8] sm:$0xff] %vm771_vm3, %v8778_v22  ;;  %826 = vst.msk [vmem:[#allocation2 + $0x1b0] sm:$0xff] %vm771_vm3, %v8778_v22 }
  0x2b   : > { %827 = vst.msk [vmem:[#allocation2 + $0x1b8] sm:$0xff] %vm771_vm3, %v8778_v22  ;;  %828 = vst.msk [vmem:[#allocation2 + $0x1c0] sm:$0xff] %vm771_vm3, %v8778_v22  ;;  %5112 = vmatpush3.bf16.msra.mxu1 %v6078_v5 }
  0x2c   : > { %829 = vst.msk [vmem:[#allocation2 + $0x1c8] sm:$0xff] %vm771_vm3, %v8778_v22  ;;  %830 = vst.msk [vmem:[#allocation2 + $0x1d0] sm:$0xff] %vm771_vm3, %v8778_v22 }
  0x2d   : > { %831 = vst.msk [vmem:[#allocation2 + $0x1d8] sm:$0xff] %vm771_vm3, %v8778_v22  ;;  %832 = vst.msk [vmem:[#allocation2 + $0x1e0] sm:$0xff] %vm771_vm3, %v8778_v22 }
  0x2e   : > { %833 = vst.msk [vmem:[#allocation2 + $0x1e8] sm:$0xff] %vm771_vm3, %v8778_v22  ;;  %834 = vst.msk [vmem:[#allocation2 + $0x1f0] sm:$0xff] %vm771_vm3, %v8778_v22 }
  0x2f   : > { %835 = vst.msk [vmem:[#allocation2 + $0x1f8] sm:$0xff] %vm771_vm3, %v8778_v22  ;;  %836 = vst.msk [vmem:[#allocation2 + $0x200] sm:$0xff] %vm771_vm3, %v8778_v22 }
  0x30   : > { %5618 = vmatmul.mubr.msk.bf16.gmra.mxu0 %vm522_vm2, %v6053_v13  ;;  %837 = vst.msk [vmem:[#allocation2 + $0x208] sm:$0xff] %vm771_vm3, %v8778_v22  ;;  %838 = vst.msk [vmem:[#allocation2 + $0x210] sm:$0xff] %vm771_vm3, %v8778_v22 }
  0x31   : > { %5621 = vmatprep.mubr.msk.bf16.mxu0 %vm522_vm2, %v6054_v14  ;;  %839 = vst.msk [vmem:[#allocation2 + $0x218] sm:$0xff] %vm771_vm3, %v8778_v22  ;;  %840 = vst.msk [vmem:[#allocation2 + $0x220] sm:$0xff] %vm771_vm3, %v8778_v22 }
  0x32   : > { %841 = vst.msk [vmem:[#allocation2 + $0x228] sm:$0xff] %vm771_vm3, %v8778_v22  ;;  %842 = vst.msk [vmem:[#allocation2 + $0x230] sm:$0xff] %vm771_vm3, %v8778_v22 }
  0x33   : > { %843 = vst.msk [vmem:[#allocation2 + $0x238] sm:$0xff] %vm771_vm3, %v8778_v22  ;;  %2670 = vst.msk [vmem:[#allocation4] sm:$0xff] %vm771_vm3, %v8778_v22 }
  0x34   : > { %2671 = vst.msk [vmem:[#allocation4 + $0x8] sm:$0xff] %vm771_vm3, %v8778_v22  ;;  %2672 = vst.msk [vmem:[#allocation4 + $0x10] sm:$0xff] %vm771_vm3, %v8778_v22 }
  0x35   : > { %2673 = vst.msk [vmem:[#allocation4 + $0x18] sm:$0xff] %vm771_vm3, %v8778_v22  ;;  %2674 = vst.msk [vmem:[#allocation4 + $0x20] sm:$0xff] %vm771_vm3, %v8778_v22 }
  0x36   : > { %2675 = vst.msk [vmem:[#allocation4 + $0x28] sm:$0xff] %vm771_vm3, %v8778_v22  ;;  %2676 = vst.msk [vmem:[#allocation4 + $0x30] sm:$0xff] %vm771_vm3, %v8778_v22 }
  0x37   : > { %2677 = vst.msk [vmem:[#allocation4 + $0x38] sm:$0xff] %vm771_vm3, %v8778_v22  ;;  %2678 = vst.msk [vmem:[#allocation4 + $0x40] sm:$0xff] %vm771_vm3, %v8778_v22 }
  0x38   : > { %5622 = vmatmul.mubr.msk.bf16.gmra.mxu0 %vm522_vm2, %v6055_v15  ;;  %2679 = vst.msk [vmem:[#allocation4 + $0x48] sm:$0xff] %vm771_vm3, %v8778_v22  ;;  %2680 = vst.msk [vmem:[#allocation4 + $0x50] sm:$0xff] %vm771_vm3, %v8778_v22 }
  0x39   : > { %5625 = vmatprep.mubr.msk.bf16.mxu0 %vm522_vm2, %v6056_v16  ;;  %2681 = vst.msk [vmem:[#allocation4 + $0x58] sm:$0xff] %vm771_vm3, %v8778_v22  ;;  %2682 = vst.msk [vmem:[#allocation4 + $0x60] sm:$0xff] %vm771_vm3, %v8778_v22 }
  0x3a   : > { %2683 = vst.msk [vmem:[#allocation4 + $0x68] sm:$0xff] %vm771_vm3, %v8778_v22  ;;  %2684 = vst.msk [vmem:[#allocation4 + $0x70] sm:$0xff] %vm771_vm3, %v8778_v22 }
  0x3b   : > { %2685 = vst.msk [vmem:[#allocation4 + $0x78] sm:$0xff] %vm771_vm3, %v8778_v22  ;;  %2686 = vst.msk [vmem:[#allocation4 + $0x80] sm:$0xff] %vm771_vm3, %v8778_v22 }
  0x3c   : > { %2687 = vst.msk [vmem:[#allocation4 + $0x88] sm:$0xff] %vm771_vm3, %v8778_v22  ;;  %2688 = vst.msk [vmem:[#allocation4 + $0x90] sm:$0xff] %vm771_vm3, %v8778_v22 }
  0x3d   : > { %2689 = vst.msk [vmem:[#allocation4 + $0x98] sm:$0xff] %vm771_vm3, %v8778_v22  ;;  %2690 = vst.msk [vmem:[#allocation4 + $0xa0] sm:$0xff] %vm771_vm3, %v8778_v22 }
  0x3e   : > { %2691 = vst.msk [vmem:[#allocation4 + $0xa8] sm:$0xff] %vm771_vm3, %v8778_v22  ;;  %2692 = vst.msk [vmem:[#allocation4 + $0xb0] sm:$0xff] %vm771_vm3, %v8778_v22 }
  0x3f   : > { %2693 = vst.msk [vmem:[#allocation4 + $0xb8] sm:$0xff] %vm771_vm3, %v8778_v22  ;;  %2694 = vst.msk [vmem:[#allocation4 + $0xc0] sm:$0xff] %vm771_vm3, %v8778_v22 }
  0x40   : > { %5626 = vmatmul.mubr.msk.bf16.gmra.mxu0 %vm522_vm2, %v6057_v17  ;;  %2695 = vst.msk [vmem:[#allocation4 + $0xc8] sm:$0xff] %vm771_vm3, %v8778_v22  ;;  %2696 = vst.msk [vmem:[#allocation4 + $0xd0] sm:$0xff] %vm771_vm3, %v8778_v22 }
  0x41   : > { %5629 = vmatprep.mubr.msk.bf16.mxu0 %vm522_vm2, %v6058_v18  ;;  %2697 = vst.msk [vmem:[#allocation4 + $0xd8] sm:$0xff] %vm771_vm3, %v8778_v22  ;;  %2698 = vst.msk [vmem:[#allocation4 + $0xe0] sm:$0xff] %vm771_vm3, %v8778_v22 }
  0x42   : > { %2699 = vst.msk [vmem:[#allocation4 + $0xe8] sm:$0xff] %vm771_vm3, %v8778_v22 }
  0x48   : > { %5630 = vmatmul.mubr.msk.bf16.gmra.mxu0 %vm522_vm2, %v6059_v19 }
  0x49   : > { %5633 = vmatprep.mubr.msk.bf16.mxu0 %vm522_vm2, %v6060_v20 }
  0x50   : > { %5634 = vmatmul.mubr.msk.bf16.gmra.mxu0 %vm522_vm2, %v6061_v21  ;;  %v6688_v21 = vld [vmem:[%s8769_s3 + $0x118] sm:$0xff]  }
  0x51   : > { %5637 = vmatprep.subr.bf16.mxu1 %v6688_v21 }
  0xd8   : > { %v5607_v34 = vpop.f32.mrf.mxu0 }
  0xd9   : > { %v621_v36 = vadd.f32 %v5607_v34, %v6620_v32  ;;  %v893_v34 = vld [vmem:[#allocation2 + $0x80] sm:$0xff] }
  0xda   : > { %v612_v37 = vpop.f32.mrf.mxu0 }
  0xdb   : > { %v741_v38 = vmax.f32 %v621_v36, 0.0  ;;  %v613_v39 = vadd.f32 %v6620_v32, %v612_v37  ;;  %v6082_v36 = vld [vmem:[%s8769_s3 + $0xb0] sm:$0xff]  }
  0xdc   : > { %v5608_v41 = vpop.f32.mrf.mxu0  ;;  %5212 = vmatpush3.bf16.msra.mxu0 %v6082_v36 }
  0xdd   : > { %847 = vst.msk [vmem:[#allocation2 + $0x48] sm:$0xff] %vm771_vm3, %v741_v38  ;;  %v739_v42 = vmax.f32 %v613_v39, 0.0  ;;  %v624_v43 = vadd.f32 %v5608_v41, %v6620_v32 }
  0xde   : > { %v615_v44 = vpop.f32.mrf.mxu0 }
  0xdf   : > { %845 = vst.msk [vmem:[#allocation2 + $0x28] sm:$0xff] %vm771_vm3, %v739_v42  ;;  %v742_v45 = vmax.f32 %v624_v43, 0.0  ;;  %v616_v46 = vadd.f32 %v6620_v32, %v615_v44  ;;  %v1013_v42 = vrot.slane %v889_v28, 7  ;;  %v6083_v44 = vld [vmem:[%s8769_s3 + $0xe8] sm:$0xff]  }
  0xe0   : > { %v5611_v47 = vpop.f32.mrf.mxu0  ;;  %5213 = vmatprep.subr.bf16.mxu0 %v6083_v44 }
  0xe1   : > { %848 = vst.msk [vmem:[#allocation2 + $0x50] sm:$0xff] %vm771_vm3, %v742_v45  ;;  %v740_v48 = vmax.f32 %v616_v46, 0.0  ;;  %v637_v49 = vadd.f32 %v5611_v47, %v6620_v32  ;;  %v5734_v47 = vpack.i.bf16 %v6697_v27, %v6695_v26  ;;  %5214 = vmatpush3.bf16.msra.mxu0 %v6084_v54 }
  0xe2   : > { %v628_v50 = vpop.f32.mrf.mxu0 }
  0xe3   : > { %846 = vst.msk [vmem:[#allocation2 + $0x30] sm:$0xff] %vm771_vm3, %v740_v48  ;;  %v745_v51 = vmax.f32 %v637_v49, 0.0  ;;  %v629_v52 = vadd.f32 %v6620_v32, %v628_v50  ;;  %v1018_v49 = vrot.slane %v893_v34, 7  ;;  %v1028_v34 = vrot.slane %v901_v9, 7 }
  0xe4   : > { %v5612_v56 = vpop.f32.mrf.mxu0  ;;  %v6647_v57 = vld [vmem:[#allocation2 + $0x48] sm:$0xff] }
  0xe5   : > { %851 = vst.msk [vmem:[#allocation2 + $0x88] sm:$0xff] %vm771_vm3, %v745_v51  ;;  %v743_v58 = vmax.f32 %v629_v52, 0.0  ;;  %v640_v59 = vadd.f32 %v5612_v56, %v6620_v32  ;;  %v1009_v63 = vrot.slane %v6647_v57, 7 }
  0xe6   : > { %v631_v61 = vpop.f32.mrf.mxu0  ;;  %v6652_v0 = vld [vmem:[#allocation2 + $0x28] sm:$0xff] }
  0xe7   : > { %849 = vst.msk [vmem:[#allocation2 + $0x68] sm:$0xff] %vm771_vm3, %v743_v58  ;;  %v746_v1 = vmax.f32 %v640_v59, 0.0  ;;  %v632_v2 = vadd.f32 %v6620_v32, %v631_v61  ;;  %v1004_v13 = vrot.slane %v6652_v0, 7  ;;  %v6675_v15 = vsel %vm997_vm4, %v1008_v62, %v1009_v63  ;;  %v6085_v62 = vld [vmem:[%s8769_s3 + $0xe0] sm:$0xff]  }
  0xe8   : > { %v5615_v6 = vpop.f32.mrf.mxu0  ;;  %v6665_v7 = vld [vmem:[#allocation2 + $0x50] sm:$0xff]  ;;  %5215 = vmatprep.subr.bf16.mxu0 %v6085_v62 }
  0xe9   : > { %852 = vst.msk [vmem:[#allocation2 + $0x90] sm:$0xff] %vm771_vm3, %v746_v1  ;;  %v744_v10 = vmax.f32 %v632_v2, 0.0  ;;  %v653_v11 = vadd.f32 %v5615_v6, %v6620_v32  ;;  %v1011_v12 = vrot.slane %v6665_v7, 7  ;;  %v6702_v31 = vsel %vm997_vm4, %v1003_v8, %v1004_v13 }
  0xea   : > { %v644_v14 = vpop.f32.mrf.mxu0  ;;  %v6677_v16 = vld [vmem:[#allocation2 + $0x30] sm:$0xff]  ;;  %v5754_v1 = vpack.i.bf16 %v6665_v7, %v6647_v57 }
  0xeb   : > { %850 = vst.msk [vmem:[#allocation2 + $0x70] sm:$0xff] %vm771_vm3, %v744_v10  ;;  %v749_v17 = vmax.f32 %v653_v11, 0.0  ;;  %v645_v18 = vadd.f32 %v6620_v32, %v644_v14  ;;  %v6682_v19 = vsel %vm997_vm4, %v1009_v63, %v1011_v12  ;;  %v1006_v20 = vrot.slane %v6677_v16, 7  ;;  %v6086_v11 = vld [vmem:[%s8769_s3 + $0xa0] sm:$0xff]  }
  0xec   : > { %v5616_v24 = vpop.f32.mrf.mxu0  ;;  %v5739_v25 = vpack.i.bf16 %v6682_v19, %v6675_v15  ;;  %v6707_v35 = vld [vmem:[#allocation2 + $0x88] sm:$0xff]  ;;  %v5744_v46 = vpack.i.bf16 %v6677_v16, %v6652_v0  ;;  %5216 = vmatpush3.bf16.msra.mxu0 %v6086_v11 }
  0xed   : > { %855 = vst.msk [vmem:[#allocation2 + $0xc8] sm:$0xff] %vm771_vm3, %v749_v17  ;;  %v747_v29 = vmax.f32 %v645_v18, 0.0  ;;  %v656_v30 = vadd.f32 %v5616_v24, %v6620_v32  ;;  %v6705_v33 = vsel %vm997_vm4, %v1004_v13, %v1006_v20  ;;  %v1019_v50 = vrot.slane %v6707_v35, 7 }
  0xee   : > { %5740 = vrot.lane.b32.xlu1 %v5739_v25, %s6270_s20  ;;  %v647_v37 = vpop.f32.mrf.mxu0  ;;  %v5729_v38 = vpack.i.bf16 %v6705_v33, %v6702_v31  ;;  %v6716_v39 = vld [vmem:[#allocation2 + $0x68] sm:$0xff]  ;;  %v6087_v25 = vld [vmem:[%s8769_s3 + $0xd8] sm:$0xff]  }
  0xef   : > { %853 = vst.msk [vmem:[#allocation2 + $0xa8] sm:$0xff] %vm771_vm3, %v747_v29  ;;  %v750_v40 = vmax.f32 %v656_v30, 0.0  ;;  %v648_v41 = vadd.f32 %v6620_v32, %v647_v37  ;;  %v1014_v43 = vrot.slane %v6716_v39, 7  ;;  %v6754_v2 = vsel %vm997_vm4, %v1018_v49, %v1019_v50  ;;  %5217 = vmatprep.subr.bf16.mxu0 %v6087_v25  ;;  %v6089_v49 = vld [vmem:[%s8769_s3 + $0xd0] sm:$0xff]  }
  0xf0   : > { %v5619_v45 = vpop.f32.mrf.mxu0  ;;  %5730 = vrot.lane.b32.xlu0 %v5729_v38, %s6270_s20  ;;  %v6729_v48 = vld [vmem:[#allocation2 + $0x90] sm:$0xff] }
  0xf1   : > { %856 = vst.msk [vmem:[#allocation2 + $0xd0] sm:$0xff] %vm771_vm3, %v750_v40  ;;  %v748_v51 = vmax.f32 %v648_v41, 0.0  ;;  %v669_v52 = vadd.f32 %v5619_v45, %v6620_v32  ;;  %v1021_v53 = vrot.slane %v6729_v48, 7  ;;  %v6744_v60 = vsel %vm997_vm4, %v1013_v42, %v1014_v43  ;;  %v6088_v41 = vld [vmem:[%s8769_s3 + $0x98] sm:$0xff]  }
  0xf2   : > { %v660_v55 = vpop.f32.mrf.mxu0  ;;  %5745 = vrot.lane.b32.xlu1 %v5744_v46, %s6270_s20  ;;  %v6739_v56 = vld [vmem:[#allocation2 + $0x70] sm:$0xff]  ;;  %5218 = vmatpush3.bf16.msra.mxu0 %v6088_v41 }
  0xf3   : > { %854 = vst.msk [vmem:[#allocation2 + $0xb0] sm:$0xff] %vm771_vm3, %v748_v51  ;;  %v753_v58 = vmax.f32 %v669_v52, 0.0  ;;  %v661_v59 = vadd.f32 %v6620_v32, %v660_v55  ;;  %v1016_v61 = vrot.slane %v6739_v56, 7  ;;  %v6762_v8 = vsel %vm997_vm4, %v1019_v50, %v1021_v53  ;;  %v905_v53 = vld [vmem:[#allocation2 + $0xe0] sm:$0xff]  ;;  %5219 = vmatprep.subr.bf16.mxu0 %v6089_v49 }
  0xf4   : > { %v5620_v63 = vpop.f32.mrf.mxu0  ;;  %5735 = vrot.lane.b32.xlu0 %v5734_v47, %s6270_s20  ;;  %v6764_v10 = vld [vmem:[#allocation2 + $0xc8] sm:$0xff]  ;;  %v5764_v14 = vpack.i.bf16 %v6739_v56, %v6716_v39  ;;  %v5759_v29 = vpack.i.bf16 %v6762_v8, %v6754_v2  ;;  %v5774_v51 = vpack.i.bf16 %v6729_v48, %v6707_v35 }
  0xf5   : > { %859 = vst.msk [vmem:[#allocation2 + $0x108] sm:$0xff] %vm771_vm3, %v753_v58  ;;  %v751_v4 = vmax.f32 %v661_v59, 0.0  ;;  %v672_v5 = vadd.f32 %v5620_v63, %v6620_v32  ;;  %v6759_v6 = vsel %vm997_vm4, %v1014_v43, %v1016_v61  ;;  %v1029_v36 = vrot.slane %v6764_v10, 7  ;;  %v909_v61 = vld [vmem:[#allocation2 + $0x100] sm:$0xff]  ;;  %v6090_v63 = vld [vmem:[%s8769_s3 + $0x90] sm:$0xff]  }
  0xf6   : > { %v663_v12 = vpop.f32.mrf.mxu0  ;;  %5755 = vrot.lane.b32.xlu1 %v5754_v1, %s6270_s20  ;;  %v5749_v13 = vpack.i.bf16 %v6759_v6, %v6744_v60  ;;  %v6774_v17 = vld [vmem:[#allocation2 + $0xa8] sm:$0xff]  ;;  %5220 = vmatpush3.bf16.msra.mxu0 %v6090_v63  ;;  %v1038_v25 = vrot.slane %v909_v61, 7 }
  0xf7   : > { %857 = vst.msk [vmem:[#allocation2 + $0xe8] sm:$0xff] %vm771_vm3, %v751_v4  ;;  %v754_v18 = vmax.f32 %v672_v5, 0.0  ;;  %v664_v20 = vadd.f32 %v6620_v32, %v663_v12  ;;  %v1024_v24 = vrot.slane %v6774_v17, 7  ;;  %v6810_v52 = vsel %vm997_vm4, %v1028_v34, %v1029_v36 }
  0xf8   : > { %v5623_v28 = vpop.f32.mrf.mxu0  ;;  %5750 = vrot.lane.b32.xlu0 %v5749_v13, %s6270_s20  ;;  %v6785_v30 = vld [vmem:[#allocation2 + $0xd0] sm:$0xff]  ;;  %8810 = vst [vmem:[#allocation7_spill] sm:$0xff] %v6810_v52  ;;  %v1033_v12 = vrot.slane %v905_v53, 7 }
  0xf9   : > { %860 = vst.msk [vmem:[#allocation2 + $0x110] sm:$0xff] %vm771_vm3, %v754_v18  ;;  %v752_v37 = vmax.f32 %v664_v20, 0.0  ;;  %v685_v38 = vadd.f32 %v5623_v28, %v6620_v32  ;;  %v1031_v40 = vrot.slane %v6785_v30, 7  ;;  %v6800_v46 = vsel %vm997_vm4, %v1023_v23, %v1024_v24  ;;  %v6092_v18 = vld [vmem:[%s8769_s3 + $0x88] sm:$0xff]  }
  0xfa   : > { %v676_v42 = vpop.f32.mrf.mxu0  ;;  %5765 = vrot.lane.b32.xlu1 %v5764_v14, %s6270_s20  ;;  %v6795_v43 = vld [vmem:[#allocation2 + $0xb0] sm:$0xff]  ;;  %v6091_v14 = vld [vmem:[%s8769_s3 + $0xc8] sm:$0xff]  }
  0xfb   : > { %858 = vst.msk [vmem:[#allocation2 + $0xf0] sm:$0xff] %vm771_vm3, %v752_v37  ;;  %v757_v44 = vmax.f32 %v685_v38, 0.0  ;;  %v677_v45 = vadd.f32 %v6620_v32, %v676_v42  ;;  %v1026_v47 = vrot.slane %v6795_v43, 7  ;;  %v6818_v59 = vsel %vm997_vm4, %v1029_v36, %v1031_v40  ;;  %5221 = vmatprep.subr.bf16.mxu0 %v6091_v14 }
  0xfc   : > { %v5624_v50 = vpop.f32.mrf.mxu0  ;;  %5760 = vrot.lane.b32.xlu0 %v5759_v29, %s6270_s20  ;;  %8811 = vst [vmem:[#allocation8_spill] sm:$0xff] %v6818_v59  ;;  %v6820_v62 = vld [vmem:[#allocation2 + $0x108] sm:$0xff]  ;;  %v5784_v4 = vpack.i.bf16 %v6795_v43, %v6774_v17  ;;  %v5779_v23 = vpack.i.bf16 %v6818_v59, %v6810_v52  ;;  %v5794_v38 = vpack.i.bf16 %v6785_v30, %v6764_v10 }
  0xfd   : > { %863 = vst.msk [vmem:[#allocation2 + $0x148] sm:$0xff] %vm771_vm3, %v757_v44  ;;  %v755_v54 = vmax.f32 %v677_v45, 0.0  ;;  %v688_v55 = vadd.f32 %v5624_v50, %v6620_v32  ;;  %v6815_v58 = vsel %vm997_vm4, %v1024_v24, %v1026_v47  ;;  %v1039_v28 = vrot.slane %v6820_v62, 7  ;;  %v884_v47 = vld [vmem:[#allocation2 + $0x38] sm:$0xff]  ;;  %5222 = vmatpush3.bf16.msra.mxu0 %v6092_v18 }
  0xfe   : > { %v679_v1 = vpop.f32.mrf.mxu0  ;;  %5775 = vrot.lane.b32.xlu1 %v5774_v51, %s6270_s20  ;;  %v5769_v3 = vpack.i.bf16 %v6815_v58, %v6800_v46  ;;  %v6830_v5 = vld [vmem:[#allocation2 + $0xe8] sm:$0xff]  ;;  %v913_v51 = vld [vmem:[#allocation2 + $0x120] sm:$0xff] }
  0xff   : > { %861 = vst.msk [vmem:[#allocation2 + $0x128] sm:$0xff] %vm771_vm3, %v755_v54  ;;  %v758_v9 = vmax.f32 %v688_v55, 0.0  ;;  %v680_v11 = vadd.f32 %v6620_v32, %v679_v1  ;;  %v1034_v13 = vrot.slane %v6830_v5, 7  ;;  %v6863_v50 = vsel %vm997_vm4, %v1038_v25, %v1039_v28  ;;  %v888_v25 = vld [vmem:[#allocation2 + $0x58] sm:$0xff] }
 0x100   : > { %5770 = vrot.lane.b32.xlu0 %v5769_v3, %s6270_s20  ;;  %v5627_v20 = vpop.f32.mrf.mxu0  ;;  %v6844_v24 = vld [vmem:[#allocation2 + $0x110] sm:$0xff]  ;;  %8813 = vst [vmem:[#allocation10_spill] sm:$0xff] %v6863_v50 }
 0x101   : > { %864 = vst.msk [vmem:[#allocation2 + $0x150] sm:$0xff] %vm771_vm3, %v758_v9  ;;  %v756_v29 = vmax.f32 %v680_v11, 0.0  ;;  %v701_v34 = vadd.f32 %v5627_v20, %v6620_v32  ;;  %v1041_v36 = vrot.slane %v6844_v24, 7  ;;  %v6858_v44 = vsel %vm997_vm4, %v1033_v12, %v1034_v13  ;;  %v6093_v12 = vld [vmem:[%s8769_s3 + $0xc0] sm:$0xff]  }
 0x102   : > { %5785 = vrot.lane.b32.xlu1 %v5784_v4, %s6270_s20  ;;  %v692_v37 = vpop.f32.mrf.mxu0  ;;  %v6853_v40 = vld [vmem:[#allocation2 + $0xf0] sm:$0xff]  ;;  %8812 = vst [vmem:[#allocation9_spill] sm:$0xff] %v6858_v44  ;;  %v1133_v9 = vrot.slane %v6677_v16, 1  ;;  %v1135_v11 = vrot.slane %v884_v47, 1  ;;  %v1043_v20 = vrot.slane %v913_v51, 7  ;;  %5223 = vmatprep.subr.bf16.mxu0 %v6093_v12  ;;  %v1138_v47 = vrot.slane %v6665_v7, 1 }
 0x103   : > { %862 = vst.msk [vmem:[#allocation2 + $0x130] sm:$0xff] %vm771_vm3, %v756_v29  ;;  %v761_v41 = vmax.f32 %v701_v34, 0.0  ;;  %v693_v42 = vadd.f32 %v6620_v32, %v692_v37  ;;  %v1036_v45 = vrot.slane %v6853_v40, 7  ;;  %v6871_v61 = vsel %vm997_vm4, %v1039_v28, %v1041_v36  ;;  %v917_v37 = vld [vmem:[#allocation2 + $0x140] sm:$0xff] }
 0x104   : > { %5780 = vrot.lane.b32.xlu0 %v5779_v23, %s6270_s20  ;;  %v5628_v49 = vpop.f32.mrf.mxu0  ;;  %8815 = vst [vmem:[#allocation12_spill] sm:$0xff] %v6871_v61  ;;  %v5804_v3 = vpack.i.bf16 %v6853_v40, %v6830_v5  ;;  %v5799_v16 = vpack.i.bf16 %v6871_v61, %v6863_v50  ;;  %v1132_v29 = vrot.slane %v6652_v0, 1  ;;  %v6905_v0 = vsel %vm1126_vm5, %v1133_v9, %v1135_v11 }
 0x105   : > { %867 = vst.msk [vmem:[#allocation2 + $0x188] sm:$0xff] %vm771_vm3, %v761_v41  ;;  %v759_v53 = vmax.f32 %v693_v42, 0.0  ;;  %v704_v54 = vadd.f32 %v5628_v49, %v6620_v32  ;;  %v6868_v55 = vsel %vm997_vm4, %v1034_v13, %v1036_v45  ;;  %v6094_v13 = vld [vmem:[%s8769_s3 + $0x80] sm:$0xff]   ;;  %v1140_v49 = vrot.slane %v888_v25, 1 }
 0x106   : > { %8814 = vst [vmem:[#allocation11_spill] sm:$0xff] %v6868_v55  ;;  %5795 = vrot.lane.b32.xlu1 %v5794_v38, %s6270_s20  ;;  %v5789_v63 = vpack.i.bf16 %v6868_v55, %v6858_v44  ;;  %v695_v1 = vpop.f32.mrf.mxu0  ;;  %v6878_v4 = vld [vmem:[#allocation2 + $0x128] sm:$0xff]  ;;  %5224 = vmatpush3.bf16.msra.mxu0 %v6094_v13  ;;  %v6902_v42 = vsel %vm1126_vm5, %v1132_v29, %v1133_v9  ;;  %v1137_v9 = vrot.slane %v6647_v57, 1  ;;  %v1048_v11 = vrot.slane %v917_v37, 7  ;;  %v892_v37 = vld [vmem:[#allocation2 + $0x78] sm:$0xff]  ;;  %v937_v55 = vld [vmem:[#allocation2 + $0x1e0] sm:$0xff] }
 0x107   : > { %865 = vst.msk [vmem:[#allocation2 + $0x168] sm:$0xff] %vm771_vm3, %v759_v53  ;;  %v762_v14 = vmax.f32 %v704_v54, 0.0  ;;  %v696_v18 = vadd.f32 %v6620_v32, %v695_v1  ;;  %v1044_v23 = vrot.slane %v6878_v4, 7  ;;  %v6896_v38 = vld [vmem:[#allocation2 + $0x148] sm:$0xff]  ;;  %v5809_v57 = vpack.i.bf16 %v6905_v0, %v6902_v42 }
 0x108   : > { %5790 = vrot.lane.b32.xlu0 %v5789_v63, %s6270_s20  ;;  %v5631_v28 = vpop.f32.mrf.mxu0  ;;  %v6908_v51 = vld [vmem:[#allocation2 + $0x150] sm:$0xff]  ;;  %v1049_v7 = vrot.slane %v6896_v38, 7 }
 0x109   : > { %868 = vst.msk [vmem:[#allocation2 + $0x190] sm:$0xff] %vm771_vm3, %v762_v14  ;;  %v760_v34 = vmax.f32 %v696_v18, 0.0  ;;  %v717_v36 = vadd.f32 %v5631_v28, %v6620_v32  ;;  %v6912_v54 = vsel %vm997_vm4, %v1043_v20, %v1044_v23  ;;  %v1051_v18 = vrot.slane %v6908_v51, 7  ;;  %v921_v20 = vld [vmem:[#allocation2 + $0x160] sm:$0xff] }
 0x10a   : > { %5805 = vrot.lane.b32.xlu1 %v5804_v3, %s6270_s20  ;;  %v6899_v41 = vld [vmem:[#allocation2 + $0x130] sm:$0xff]  ;;  %v708_v45 = vpop.f32.mrf.mxu0  ;;  %8816 = vst [vmem:[#allocation13_spill] sm:$0xff] %v6912_v54 }
 0x10b   : > { %866 = vst.msk [vmem:[#allocation2 + $0x170] sm:$0xff] %vm771_vm3, %v760_v34  ;;  %v765_v53 = vmax.f32 %v717_v36, 0.0  ;;  %v1046_v63 = vrot.slane %v6899_v41, 7  ;;  %v709_v1 = vadd.f32 %v6620_v32, %v708_v45  ;;  %v6936_v34 = vsel %vm1126_vm5, %v1138_v47, %v1140_v49 }
 0x10c   : > { %5800 = vrot.lane.b32.xlu0 %v5799_v16, %s6270_s20  ;;  %v5632_v3 = vpop.f32.mrf.mxu0  ;;  %v5819_v45 = vpack.i.bf16 %v6844_v24, %v6820_v62 }
 0x10d   : > { %871 = vst.msk [vmem:[#allocation2 + $0x1c8] sm:$0xff] %vm771_vm3, %v765_v53  ;;  %v6921_v12 = vsel %vm997_vm4, %v1044_v23, %v1046_v63  ;;  %v763_v13 = vmax.f32 %v709_v1, 0.0  ;;  %v720_v14 = vadd.f32 %v5632_v3, %v6620_v32  ;;  %v6933_v23 = vsel %vm1126_vm5, %v1137_v9, %v1138_v47 }
 0x10e   : > { %8817 = vst [vmem:[#allocation14_spill] sm:$0xff] %v6921_v12  ;;  %v5814_v25 = vpack.i.bf16 %v6921_v12, %v6912_v54  ;;  %v711_v16 = vpop.f32.mrf.mxu0  ;;  %v6929_v28 = vld [vmem:[#allocation2 + $0x168] sm:$0xff]  ;;  %v6944_v53 = vsel %vm997_vm4, %v1048_v11, %v1049_v7  ;;  %v1053_v1 = vrot.slane %v921_v20, 7  ;;  %v6948_v47 = vsel %vm997_vm4, %v1049_v7, %v1051_v18  ;;  %v925_v12 = vld [vmem:[#allocation2 + $0x180] sm:$0xff] }
 0x10f   : > { %869 = vst.msk [vmem:[#allocation2 + $0x1a8] sm:$0xff] %vm771_vm3, %v763_v13  ;;  %v766_v29 = vmax.f32 %v720_v14, 0.0  ;;  %v712_v36 = vadd.f32 %v6620_v32, %v711_v16  ;;  %8818 = vst [vmem:[#allocation15_spill] sm:$0xff] %v6944_v53  ;;  %v1054_v9 = vrot.slane %v6929_v28, 7  ;;  %v5824_v13 = vpack.i.bf16 %v6936_v34, %v6933_v23 }
 0x110   : > { %5815 = vrot.lane.b32.xlu1 %v5814_v25, %s6270_s20  ;;  %5810 = vrot.lane.b32.xlu0 %v5809_v57, %s6270_s20  ;;  %v5635_v63 = vpop.f32.mrf.mxu0  ;;  %8819 = vst [vmem:[#allocation16_spill] sm:$0xff] %v6948_v47  ;;  %v1142_v11 = vrot.slane %v6716_v39, 1  ;;  %v1145_v25 = vrot.slane %v892_v37, 1  ;;  %v1143_v7 = vrot.slane %v6739_v56, 1  ;;  %v5829_v39 = vpack.i.bf16 %v6948_v47, %v6944_v53  ;;  %v6977_v47 = vld [vmem:[#allocation2 + $0x188] sm:$0xff]  ;;  %v6979_v53 = vld [vmem:[#allocation2 + $0x190] sm:$0xff] }
 0x111   : > { %872 = vst.msk [vmem:[#allocation2 + $0x1d0] sm:$0xff] %vm771_vm3, %v766_v29  ;;  %v764_v3 = vmax.f32 %v712_v36, 0.0  ;;  %v733_v49 = vadd.f32 %v5635_v63, %v6620_v32  ;;  %v896_v29 = vld [vmem:[#allocation2 + $0x98] sm:$0xff]  ;;  %v5834_v36 = vpack.i.bf16 %v6899_v41, %v6878_v4  ;;  %v6969_v63 = vsel %vm997_vm4, %v1053_v1, %v1054_v9 }
 0x112   : > { %v6954_v14 = vld [vmem:[#allocation2 + $0x170] sm:$0xff]  ;;  %v724_v57 = vpop.f32.mrf.mxu0  ;;  %8820 = vst [vmem:[#allocation17_spill] sm:$0xff] %v6969_v63  ;;  %v6982_v1 = vsel %vm1126_vm5, %v1142_v11, %v1143_v7  ;;  %v1058_v11 = vrot.slane %v925_v12, 7  ;;  %v5849_v12 = vpack.i.bf16 %v6908_v51, %v6896_v38 }
 0x113   : > { %870 = vst.msk [vmem:[#allocation2 + $0x1b0] sm:$0xff] %vm771_vm3, %v764_v3  ;;  %v769_v20 = vmax.f32 %v733_v49, 0.0  ;;  %v1056_v16 = vrot.slane %v6954_v14, 7  ;;  %v725_v18 = vadd.f32 %v6620_v32, %v724_v57  ;;  %v1150_v57 = vrot.slane %v896_v29, 1 }
 0x114   : > { %5825 = vrot.lane.b32.xlu1 %v5824_v13, %s6270_s20  ;;  %5820 = vrot.lane.b32.xlu0 %v5819_v45, %s6270_s20  ;;  %v5636_v37 = vpop.f32.mrf.mxu0  ;;  %v1147_v45 = vrot.slane %v6707_v35, 1  ;;  %v1148_v13 = vrot.slane %v6729_v48, 1  ;;  %v7043_v61 = vld [vmem:[#allocation2 + $0x1c8] sm:$0xff] }
 0x115   : > { %875 = vst.msk [vmem:[#allocation2 + $0x208] sm:$0xff] %vm771_vm3, %v769_v20  ;;  %v6972_v56 = vsel %vm997_vm4, %v1054_v9, %v1056_v16  ;;  %v767_v3 = vmax.f32 %v725_v18, 0.0  ;;  %v736_v49 = vadd.f32 %v5636_v37, %v6620_v32  ;;  %v6985_v9 = vsel %vm1126_vm5, %v1143_v7, %v1145_v25  ;;  %v929_v7 = vld [vmem:[#allocation2 + $0x1a0] sm:$0xff] }
 0x116   : > { %8821 = vst [vmem:[#allocation18_spill] sm:$0xff] %v6972_v56  ;;  %v727_v22 = vpop.f32.mrf.mxu0  ;;  %v5844_v48 = vpack.i.bf16 %v6972_v56, %v6969_v63  ;;  %v1059_v18 = vrot.slane %v6977_v47, 7  ;;  %v1061_v25 = vrot.slane %v6979_v53, 7  ;;  %v5839_v29 = vpack.i.bf16 %v6985_v9, %v6982_v1 }
 0x117   : > { %873 = vst.msk [vmem:[#allocation2 + $0x1e8] sm:$0xff] %vm771_vm3, %v767_v3  ;;  %v770_v20 = vmax.f32 %v736_v49, 0.0  ;;  %v728_v35 = vadd.f32 %v6620_v32, %v727_v22  ;;  %v6998_v22 = vld [vmem:[#allocation2 + $0x1a8] sm:$0xff]  ;;  %v1063_v37 = vrot.slane %v929_v7, 7  ;;  %v900_v3 = vld [vmem:[#allocation2 + $0xb8] sm:$0xff]  ;;  %v1069_v50 = vrot.slane %v7043_v61, 7 }
 0x118   : > { %5835 = vrot.lane.b32.xlu1 %v5834_v36, %s6270_s20  ;;  %5830 = vrot.lane.b32.xlu0 %v5829_v39, %s6270_s20  ;;  %v7003_v36 = vsel %vm1126_vm5, %v1147_v45, %v1148_v13  ;;  %v7006_v39 = vsel %vm1126_vm5, %v1148_v13, %v1150_v57  ;;  %v7014_v49 = vsel %vm997_vm4, %v1058_v11, %v1059_v18  ;;  %v1064_v13 = vrot.slane %v6998_v22, 7 }
 0x119   : > { %876 = vst.msk [vmem:[#allocation2 + $0x210] sm:$0xff] %vm771_vm3, %v770_v20  ;;  %v768_v16 = vmax.f32 %v728_v35, 0.0  ;;  %8822 = vst [vmem:[#allocation19_spill] sm:$0xff] %v7014_v49  ;;  %v7017_v45 = vsel %vm997_vm4, %v1059_v18, %v1061_v25  ;;  %v944_v20 = vld [vmem:[#allocation2 + $0x218] sm:$0xff]  ;;  %v5854_v35 = vpack.i.bf16 %v7006_v39, %v7003_v36  ;;  %v1155_v7 = vrot.slane %v900_v3, 1  ;;  %v933_v3 = vld [vmem:[#allocation2 + $0x1c0] sm:$0xff] }
 0x11a   : > { %v7000_v32 = vld [vmem:[#allocation2 + $0x1b0] sm:$0xff]  ;;  %8823 = vst [vmem:[#allocation20_spill] sm:$0xff] %v7017_v45  ;;  %v5864_v11 = vpack.i.bf16 %v6954_v14, %v6929_v28  ;;  %v5859_v18 = vpack.i.bf16 %v7017_v45, %v7014_v49  ;;  %v1251_v63 = vrot.slane %v944_v20, 1 }
 0x11b   : > { %874 = vst.msk [vmem:[#allocation2 + $0x1f0] sm:$0xff] %vm771_vm3, %v768_v16  ;;  %v1066_v57 = vrot.slane %v7000_v32, 7  ;;  %v1153_v16 = vrot.slane %v6795_v43, 1  ;;  %v7045_v45 = vld [vmem:[#allocation2 + $0x1d0] sm:$0xff] }
 0x11c   : > { %5845 = vrot.lane.b32.xlu1 %v5844_v48, %s6270_s20  ;;  %5840 = vrot.lane.b32.xlu0 %v5839_v29, %s6270_s20  ;;  %v1152_v48 = vrot.slane %v6774_v17, 1  ;;  %v904_v29 = vld [vmem:[#allocation2 + $0xd8] sm:$0xff]  ;;  %v7031_v25 = vld [vmem:[#allocation2 + $0x208] sm:$0xff]  ;;  %v7036_v17 = vsel %vm997_vm4, %v1063_v37, %v1064_v13  ;;  %v1157_v37 = vrot.slane %v6764_v10, 1 }
 0x11d   : > { %8824 = vst [vmem:[#allocation21_spill] sm:$0xff] %v7036_v17  ;;  %v7039_v43 = vsel %vm997_vm4, %v1064_v13, %v1066_v57  ;;  %v1160_v54 = vrot.slane %v904_v29, 1  ;;  %v7051_v20 = vsel %vm1126_vm5, %v1153_v16, %v1155_v7  ;;  %v1158_v13 = vrot.slane %v6785_v30, 1 }
 0x11e   : > { %8825 = vst [vmem:[#allocation22_spill] sm:$0xff] %v7039_v43  ;;  %v7048_v49 = vsel %vm1126_vm5, %v1152_v48, %v1153_v16  ;;  %v5874_v57 = vpack.i.bf16 %v7039_v43, %v7036_v17  ;;  %v1068_v29 = vrot.slane %v933_v3, 7  ;;  %v1071_v48 = vrot.slane %v7045_v45, 7  ;;  %v7069_v7 = vld [vmem:[#allocation2 + $0x1e8] sm:$0xff] }
 0x11f   : > { %v5869_v30 = vpack.i.bf16 %v7051_v20, %v7048_v49  ;;  %8828 = vst [vmem:[#allocation25_spill] sm:$0xff] %v7069_v7  ;;  %v7076_v3 = vsel %vm1126_vm5, %v1157_v37, %v1158_v13  ;;  %v7079_v43 = vsel %vm1126_vm5, %v1158_v13, %v1160_v54  ;;  %v1074_v37 = vrot.slane %v7069_v7, 7 }
 0x120   : > { %5855 = vrot.lane.b32.xlu1 %v5854_v35, %s6270_s20  ;;  %5850 = vrot.lane.b32.xlu0 %v5849_v12, %s6270_s20  ;;  %v7033_v56 = vld [vmem:[#allocation2 + $0x210] sm:$0xff]  ;;  %v1248_v12 = vrot.slane %v7031_v25, 1  ;;  %v7086_v17 = vsel %vm997_vm4, %v1068_v29, %v1069_v50  ;;  %v5884_v13 = vpack.i.bf16 %v7079_v43, %v7076_v3 }
 0x121   : > { %v1249_v35 = vrot.slane %v7033_v56, 1  ;;  %8830 = vst [vmem:[#allocation27_spill] sm:$0xff] %v7086_v17 }
 0x123   : > { %v7062_v16 = vsel %vm1126_vm5, %v1248_v12, %v1249_v35  ;;  %v7065_v10 = vsel %vm1126_vm5, %v1249_v35, %v1251_v63  ;;  %v5879_v63 = vpack.i.bf16 %v6979_v53, %v6977_v47  ;;  %v1073_v12 = vrot.slane %v937_v55, 7  ;;  %v908_v35 = vld [vmem:[#allocation2 + $0xf8] sm:$0xff] }
 0x124   : > { %5865 = vrot.lane.b32.xlu1 %v5864_v11, %s6270_s20  ;;  %5860 = vrot.lane.b32.xlu0 %v5859_v18, %s6270_s20  ;;  %8826 = vst [vmem:[#allocation23_spill] sm:$0xff] %v7062_v16  ;;  %8827 = vst [vmem:[#allocation24_spill] sm:$0xff] %v7065_v10  ;;  %v7071_v11 = vld [vmem:[#allocation2 + $0x1f0] sm:$0xff]  ;;  %v7089_v18 = vsel %vm997_vm4, %v1069_v50, %v1071_v48  ;;  %v1165_v44 = vrot.slane %v908_v35, 1  ;;  %v912_v55 = vld [vmem:[#allocation2 + $0x118] sm:$0xff]  ;;  %v5894_v50 = vpack.i.bf16 %v7000_v32, %v6998_v22 }
 0x125   : > { %8829 = vst [vmem:[#allocation26_spill] sm:$0xff] %v7071_v11  ;;  %8831 = vst [vmem:[#allocation28_spill] sm:$0xff] %v7089_v18  ;;  %v1076_v54 = vrot.slane %v7071_v11, 7  ;;  %v5889_v29 = vpack.i.bf16 %v7089_v18, %v7086_v17  ;;  %v7104_v48 = vsel %vm997_vm4, %v1073_v12, %v1074_v37  ;;  %v1170_v35 = vrot.slane %v912_v55, 1  ;;  %v928_v18 = vld [vmem:[#allocation2 + $0x198] sm:$0xff] }
 0x126   : > { %8832 = vst [vmem:[#allocation29_spill] sm:$0xff] %v7104_v48  ;;  %v1187_v17 = vrot.slane %v6977_v47, 1 }
 0x127   : > { %v7107_v59 = vsel %vm997_vm4, %v1074_v37, %v1076_v54  ;;  %v920_v54 = vld [vmem:[#allocation2 + $0x158] sm:$0xff] }
 0x128   : > { %5875 = vrot.lane.b32.xlu1 %v5874_v57, %s6270_s20  ;;  %5870 = vrot.lane.b32.xlu0 %v5869_v30, %s6270_s20  ;;  %v1162_v57 = vrot.slane %v6830_v5, 1  ;;  %v1163_v30 = vrot.slane %v6853_v40, 1  ;;  %8833 = vst [vmem:[#allocation30_spill] sm:$0xff] %v7107_v59  ;;  %v1167_v5 = vrot.slane %v6820_v62, 1  ;;  %v1168_v40 = vrot.slane %v6844_v24, 1 }
 0x129   : > { %v5904_v12 = vpack.i.bf16 %v7107_v59, %v7104_v48  ;;  %v1243_v62 = vrot.slane %v7031_v25, 7  ;;  %v1245_v24 = vrot.slane %v7033_v56, 7  ;;  %v1173_v48 = vrot.slane %v6899_v41, 1 }
 0x12a   : > { %v7115_v52 = vsel %vm1126_vm5, %v1163_v30, %v1165_v44  ;;  %v7126_v55 = vsel %vm1126_vm5, %v1167_v5, %v1168_v40  ;;  %v7129_v44 = vsel %vm1126_vm5, %v1168_v40, %v1170_v35  ;;  %v1177_v35 = vrot.slane %v6896_v38, 1 }
 0x12b   : > { %v7141_v5 = vsel %vm997_vm4, %v1243_v62, %v1245_v24  ;;  %v1190_v24 = vrot.slane %v928_v18, 1  ;;  %v1182_v18 = vrot.slane %v6929_v28, 1 }
 0x12c   : > { %5885 = vrot.lane.b32.xlu1 %v5884_v13, %s6270_s20  ;;  %5880 = vrot.lane.b32.xlu0 %v5879_v63, %s6270_s20  ;;  %v941_v13 = vld [vmem:[#allocation2 + $0x200] sm:$0xff]  ;;  %v7112_v63 = vsel %vm1126_vm5, %v1162_v57, %v1163_v30  ;;  %v916_v30 = vld [vmem:[#allocation2 + $0x138] sm:$0xff]  ;;  %8835 = vst [vmem:[#allocation32_spill] sm:$0xff] %v7141_v5 }
 0x12d   : > { %v1242_v37 = vrot.slane %v941_v13, 7  ;;  %v5899_v57 = vpack.i.bf16 %v7115_v52, %v7112_v63  ;;  %v5914_v13 = vpack.i.bf16 %v7129_v44, %v7126_v55  ;;  %v1175_v40 = vrot.slane %v916_v30, 1  ;;  %v936_v30 = vld [vmem:[#allocation2 + $0x1d8] sm:$0xff] }
 0x12f   : > { %v7138_v59 = vsel %vm997_vm4, %v1242_v37, %v1243_v62  ;;  %v5924_v37 = vpack.i.bf16 %v7071_v11, %v7069_v7 }
 0x130   : > { %5895 = vrot.lane.b32.xlu1 %v5894_v50, %s6270_s20  ;;  %5890 = vrot.lane.b32.xlu0 %v5889_v29, %s6270_s20  ;;  %v5909_v50 = vpack.i.bf16 %v7045_v45, %v7043_v61  ;;  %v1180_v29 = vrot.slane %v920_v54, 1  ;;  %8834 = vst [vmem:[#allocation31_spill] sm:$0xff] %v7138_v59  ;;  %v924_v54 = vld [vmem:[#allocation2 + $0x178] sm:$0xff]  ;;  %v5919_v62 = vpack.i.bf16 %v7141_v5, %v7138_v59  ;;  %v1188_v5 = vrot.slane %v6979_v53, 1 }
 0x131   : > { %v1185_v38 = vrot.slane %v924_v54, 1  ;;  %v1183_v54 = vrot.slane %v6954_v14, 1 }
 0x132   : > { %v7180_v14 = vsel %vm1126_vm5, %v1187_v17, %v1188_v5 }
 0x134   : > { %5905 = vrot.lane.b32.xlu1 %v5904_v12, %s6270_s20  ;;  %5900 = vrot.lane.b32.xlu0 %v5899_v57, %s6270_s20  ;;  %v1178_v12 = vrot.slane %v6908_v51, 1  ;;  %v1172_v57 = vrot.slane %v6878_v4, 1 }
 0x136   : > { %v7154_v51 = vsel %vm1126_vm5, %v1177_v35, %v1178_v12  ;;  %v7157_v4 = vsel %vm1126_vm5, %v1178_v12, %v1180_v29  ;;  %v7160_v41 = vsel %vm1126_vm5, %v1172_v57, %v1173_v48  ;;  %v1197_v29 = vrot.slane %v7043_v61, 1  ;;  %v940_v57 = vld [vmem:[#allocation2 + $0x1f8] sm:$0xff] }
 0x137   : > { %v1198_v35 = vrot.slane %v7045_v45, 1  ;;  %v1200_v12 = vrot.slane %v936_v30, 1  ;;  %v5934_v28 = vpack.i.bf16 %v7157_v4, %v7154_v51  ;;  %v7183_v61 = vsel %vm1126_vm5, %v1188_v5, %v1190_v24 }
 0x138   : > { %5915 = vrot.lane.b32.xlu1 %v5914_v13, %s6270_s20  ;;  %5910 = vrot.lane.b32.xlu0 %v5909_v50, %s6270_s20  ;;  %v7163_v50 = vsel %vm1126_vm5, %v1173_v48, %v1175_v40  ;;  %v932_v13 = vld [vmem:[#allocation2 + $0x1b8] sm:$0xff]  ;;  %v1192_v48 = vrot.slane %v6998_v22, 1  ;;  %v1193_v40 = vrot.slane %v7000_v32, 1  ;;  %v7186_v45 = vsel %vm1126_vm5, %v1182_v18, %v1183_v54 }
 0x139   : > { %v1195_v47 = vrot.slane %v932_v13, 1  ;;  %v5929_v53 = vpack.i.bf16 %v7163_v50, %v7160_v41  ;;  %v7189_v22 = vsel %vm1126_vm5, %v1183_v54, %v1185_v38  ;;  %v7194_v32 = vsel %vm1126_vm5, %v1197_v29, %v1198_v35 }
 0x13a   : > { %v1205_v17 = vrot.slane %v940_v57, 1  ;;  %v7200_v5 = vsel %vm1126_vm5, %v1192_v48, %v1193_v40  ;;  %v1202_v24 = vrot.slane %v7069_v7, 1  ;;  %v1203_v38 = vrot.slane %v7071_v11, 1 }
 0x13b   : > { %v5944_v30 = vpack.i.bf16 %v7183_v61, %v7180_v14  ;;  %v5939_v13 = vpack.i.bf16 %v7189_v22, %v7186_v45  ;;  %v5959_v48 = vpack.i.bf16 %v7033_v56, %v7031_v25  ;;  %v5974_v57 = vpack.i.bf16 %v7065_v10, %v7062_v16 }
 0x13c   : > { %5925 = vrot.lane.b32.xlu1 %v5924_v37, %s6270_s20  ;;  %5920 = vrot.lane.b32.xlu0 %v5919_v62, %s6270_s20  ;;  %v7197_v37 = vsel %vm1126_vm5, %v1198_v35, %v1200_v12  ;;  %v7203_v62 = vsel %vm1126_vm5, %v1193_v40, %v1195_v47  ;;  %v7218_v29 = vsel %vm1126_vm5, %v1202_v24, %v1203_v38  ;;  %v7229_v40 = vld [vmem:[#allocation2 + $0x228] sm:$0xff]  ;;  %v7231_v47 = vld [vmem:[#allocation2 + $0x230] sm:$0xff]  ;;  %v1127_v56 = vrot.slane %v6695_v26, 1  ;;  %v877_v24 = vld [vmem:[#allocation2] sm:$0xff] }
 0x13d   : > { %v5954_v18 = vpack.i.bf16 %v7197_v37, %v7194_v32  ;;  %v5949_v54 = vpack.i.bf16 %v7203_v62, %v7200_v5  ;;  %8836 = vst [vmem:[#allocation33_spill] sm:$0xff] %v7218_v29  ;;  %v7221_v35 = vsel %vm1126_vm5, %v1203_v38, %v1205_v17  ;;  %v1128_v25 = vrot.slane %v6697_v27, 1 }
 0x13e   : > { %8837 = vst [vmem:[#allocation34_spill] sm:$0xff] %v7221_v35  ;;  %v5964_v12 = vpack.i.bf16 %v7221_v35, %v7218_v29 }
 0x140   : > { %5935 = vrot.lane.b32.xlu1 %v5934_v28, %s6270_s20  ;;  %5930 = vrot.lane.b32.xlu0 %v5929_v53, %s6270_s20  ;;  %v5969_v28 = vpack.i.bf16 %v7231_v47, %v7229_v40  ;;  %v880_v53 = vld [vmem:[#allocation2 + $0x18] sm:$0xff] }
 0x141   : > { %v1130_v17 = vrot.slane %v880_v53, 1 }
 0x144   : > { %5945 = vrot.lane.b32.xlu1 %v5944_v30, %s6270_s20  ;;  %5940 = vrot.lane.b32.xlu0 %v5939_v13, %s6270_s20  ;;  %v1001_v30 = vrot.slane %v6697_v27, 7  ;;  %v999_v13 = vrot.slane %v6695_v26, 7 }
 0x146   : > { %v1002_v26 = vsel %vm997_vm4, %v999_v13, %v1001_v30 }
 0x148   : > { %5955 = vrot.lane.b32.xlu1 %v5954_v18, %s6270_s20  ;;  %5950 = vrot.lane.b32.xlu0 %v5949_v54, %s6270_s20  ;;  %v1129_v54 = vsel %vm1126_vm5, %v1127_v56, %v1128_v25 }
 0x14c   : > { %5965 = vrot.lane.b32.xlu1 %v5964_v12, %s6270_s20  ;;  %5960 = vrot.lane.b32.xlu0 %v5959_v48, %s6270_s20  ;;  %v1131_v12 = vsel %vm1126_vm5, %v1128_v25, %v1130_v17  ;;  %v998_v48 = vrot.slane %v877_v24, 7 }
 0x14e   : > { %v1000_v27 = vsel %vm997_vm4, %v998_v48, %v999_v13 }
 0x150   : > { %5975 = vrot.lane.b32.xlu1 %v5974_v57, %s6270_s20  ;;  %5970 = vrot.lane.b32.xlu0 %v5969_v28, %s6270_s20 }
 0x160   : > { %v5741_v38 = vpop.permute.xlu1 %5740 }
 0x161   : > { %v5743_v57 = vunpack.i.h.bf16 %v5741_v38  ;;  %v5742_v28 = vunpack.i.l.bf16 %v5741_v38 }
 0x162   : > { %v5731_v18 = vpop.permute.xlu0 %5730 }
 0x163   : > { %v5733_v16 = vunpack.i.h.bf16 %v5731_v18  ;;  %v5732_v10 = vunpack.i.l.bf16 %v5731_v18  ;;  %v1609_v25 = vsel %vm771_vm3, %v6902_v42, %v5742_v28  ;;  %v1610_v17 = vsel %vm771_vm3, %v6905_v0, %v5743_v57 }
 0x164   : > { %v5746_v11 = vpop.permute.xlu1 %5745 }
 0x165   : > { %v1607_v7 = vsel %vm771_vm3, %v1129_v54, %v5732_v10  ;;  %v1608_v53 = vsel %vm771_vm3, %v1131_v12, %v5733_v16  ;;  %v1681_v12 = vpack.c.bf16 %v1610_v17, %v1609_v25  ;;  %v5748_v30 = vunpack.i.h.bf16 %v5746_v11  ;;  %v6097_v25 = vld [vmem:[%s8769_s3 + $0x100] sm:$0xff]  }
 0x166   : > { %v5736_v59 = vpop.permute.xlu0 %5735  ;;  %v1676_v35 = vpack.c.bf16 %v1608_v53, %v1607_v7  ;;  %v5747_v42 = vunpack.i.l.bf16 %v5746_v11  ;;  %v6096_v11 = vld [vmem:[%s8769_s3 + $0x108] sm:$0xff]  }
 0x167   : > { %v5738_v29 = vunpack.i.h.bf16 %v5736_v59  ;;  %v5737_v56 = vunpack.i.l.bf16 %v5736_v59  ;;  %v6095_v59 = vld [vmem:[%s8769_s3 + $0x110] sm:$0xff]  }
 0x168   : > { %v5756_v24 = vpop.permute.xlu1 %5755  ;;  %2116 = vmatprep.mubr.bf16.mxu1 %v1676_v35 }
 0x169   : > { %v5758_v38 = vunpack.i.h.bf16 %v5756_v24  ;;  %v5757_v10 = vunpack.i.l.bf16 %v5756_v24  ;;  %v1575_v16 = vsel %vm771_vm3, %v1000_v27, %v5737_v56  ;;  %v1576_v7 = vsel %vm771_vm3, %v1002_v26, %v5738_v29 }
 0x16a   : > { %v5751_v18 = vpop.permute.xlu0 %5750  ;;  %v1675_v54 = vpack.c.bf16 %v1576_v7, %v1575_v16 }
 0x16b   : > { %v1579_v0 = vsel %vm771_vm3, %v6675_v15, %v5757_v10  ;;  %v1580_v35 = vsel %vm771_vm3, %v6682_v19, %v5758_v38  ;;  %v5753_v13 = vunpack.i.h.bf16 %v5751_v18  ;;  %v5752_v48 = vunpack.i.l.bf16 %v5751_v18 }
 0x16c   : > { %v5766_v57 = vpop.permute.xlu1 %5765  ;;  %2117 = vmatmul.mubr.bf16.vlgmr.msra.gmra.mxu1 %v1675_v54  ;;  %v1678_v29 = vpack.c.bf16 %v1580_v35, %v1579_v0  ;;  %v1577_v15 = vsel %vm771_vm3, %v6702_v31, %v5747_v42  ;;  %v1578_v19 = vsel %vm771_vm3, %v6705_v33, %v5748_v30 }
 0x16d   : > { %5638 = vmatpush3.bf16.msra.mxu1 %v6688_v21  ;;  %2124 = vmatprep.mubr.bf16.mxu1 %v1681_v12  ;;  %v1611_v27 = vsel %vm771_vm3, %v6933_v23, %v5752_v48  ;;  %v1612_v21 = vsel %vm771_vm3, %v6936_v34, %v5753_v13  ;;  %v1680_v56 = vpack.c.bf16 %v1578_v19, %v1577_v15  ;;  %v5768_v18 = vunpack.i.h.bf16 %v5766_v57 }
 0x16e   : > { %2277 = vmatprep.mubr.bf16.mxu0 %v1678_v29  ;;  %v5761_v28 = vpop.permute.xlu0 %5760  ;;  %5639 = vmatprep.subr.bf16.mxu1 %v6095_v59  ;;  %v1685_v17 = vpack.c.bf16 %v1612_v21, %v1611_v27  ;;  %v1259_v12 = vrot.slane %v7231_v47, 7  ;;  %v5767_v30 = vunpack.i.l.bf16 %v5766_v57 }
 0x16f   : > { %v5763_v31 = vunpack.i.h.bf16 %v5761_v28  ;;  %v5762_v24 = vunpack.i.l.bf16 %v5761_v28  ;;  %v1582_v57 = vsel %vm771_vm3, %v6759_v6, %v5768_v18 }
 0x170   : > { %v5776_v53 = vpop.permute.xlu1 %5775 }
 0x171   : > { %5640 = vmatpush3.bf16.msra.mxu1 %v6095_v59  ;;  %v1613_v16 = vsel %vm771_vm3, %v6982_v1, %v5762_v24  ;;  %v1614_v7 = vsel %vm771_vm3, %v6985_v9, %v5763_v31  ;;  %v1257_v59 = vrot.slane %v7229_v40, 7  ;;  %v5778_v19 = vunpack.i.h.bf16 %v5776_v53 }
 0x172   : > { %v5771_v26 = vpop.permute.xlu0 %5770  ;;  %5641 = vmatprep.subr.bf16.mxu1 %v6096_v11  ;;  %v1689_v35 = vpack.c.bf16 %v1614_v7, %v1613_v16  ;;  %v5777_v27 = vunpack.i.l.bf16 %v5776_v53  ;;  %v6230_v16 = vld [vmem:[#allocation2 + $0x30] sm:$0xff]  ;;  %v6231_v7 = vld [vmem:[#allocation2 + $0x28] sm:$0xff] }
 0x173   : > { %v5773_v42 = vunpack.i.h.bf16 %v5771_v26  ;;  %v5772_v0 = vunpack.i.l.bf16 %v5771_v26  ;;  %v7298_v28 = vsel %vm997_vm4, %v1257_v59, %v1259_v12 }
 0x174   : > { %v7279_v38 = vpop.permute.xlu1 %5785  ;;  %2125 = vmatmul.mubr.bf16.gmra.mxu1 %v1680_v56 }
 0x175   : > { %2132 = vmatprep.mubr.bf16.mxu1 %v1685_v17  ;;  %5642 = vmatpush3.bf16.msra.mxu1 %v6096_v11  ;;  %v1581_v11 = vsel %vm771_vm3, %v6744_v60, %v5767_v30  ;;  %v1615_v15 = vsel %vm771_vm3, %v7003_v36, %v5772_v0 }
 0x176   : > { %v5781_v33 = vpop.permute.xlu0 %5780  ;;  %5643 = vmatprep.subr.bf16.mxu1 %v6097_v25  ;;  %v1683_v56 = vpack.c.bf16 %v1582_v57, %v1581_v11 }
 0x177   : > { %v5783_v17 = vunpack.i.h.bf16 %v5781_v33  ;;  %v5782_v31 = vunpack.i.l.bf16 %v5781_v33  ;;  %v1584_v33 = vsel %vm771_vm3, %v6762_v8, %v5778_v19 }
 0x178   : > { %v7281_v10 = vpop.permute.xlu1 %5795 }
 0x179   : > { %5644 = vmatpush3.bf16.msra.mxu1 %v6097_v25  ;;  %v1617_v11 = vsel %vm771_vm3, %v7048_v49, %v5782_v31  ;;  %v1618_v57 = vsel %vm771_vm3, %v7051_v20, %v5783_v17  ;;  %v6232_v31 = vld [vmem:[#allocation2 + $0x48] sm:$0xff]  ;;  %v6233_v17 = vld [vmem:[#allocation2 + $0x50] sm:$0xff] }
 0x17a   : > { %v7287_v54 = vpop.permute.xlu0 %5790  ;;  %v1697_v8 = vpack.c.bf16 %v1618_v57, %v1617_v11 }
 0x17b   : > { %v5793_v19 = vunpack.i.h.bf16 %v7287_v54 }
 0x17c   : > { %2133 = vmatmul.mubr.bf16.gmra.mxu1 %v1678_v29  ;;  %v7291_v13 = vpop.permute.xlu1 %5805  ;;  %v1616_v29 = vsel %vm771_vm3, %v7006_v39, %v5773_v42  ;;  %v1583_v42 = vsel %vm771_vm3, %v6754_v2, %v5777_v27 }
 0x17d   : > { %2140 = vmatprep.mubr.bf16.mxu1 %v1689_v35  ;;  %v1693_v25 = vpack.c.bf16 %v1616_v29, %v1615_v15  ;;  %v5788_v15 = vunpack.i.h.bf16 %v7279_v38  ;;  %v5787_v29 = vunpack.i.l.bf16 %v7279_v38  ;;  %v1687_v27 = vpack.c.bf16 %v1584_v33, %v1583_v42 }
 0x17e   : > { %v7293_v48 = vpop.permute.xlu0 %5800  ;;  %v5798_v42 = vunpack.i.h.bf16 %v7281_v10  ;;  %v5797_v33 = vunpack.i.l.bf16 %v7281_v10 }
 0x17f   : > { %v5802_v57 = vunpack.i.l.bf16 %v7293_v48 }
 0x182   : > { %v7308_v21 = vpop.permute.xlu1 %5815  ;;  %v5811_v26 = vpop.permute.xlu0 %5810 }
 0x183   : > { %v5813_v24 = vunpack.i.h.bf16 %v5811_v26  ;;  %v5812_v60 = vunpack.i.l.bf16 %v5811_v26 }
 0x184   : > { %2141 = vmatmul.mubr.bf16.gmra.mxu1 %v1683_v56 }
 0x185   : > { %v1640_v6 = vsel %vm771_vm3, %v6230_v16, %v5813_v24  ;;  %v1639_v18 = vsel %vm771_vm3, %v6231_v7, %v5812_v60  ;;  %2148 = vmatprep.mubr.bf16.mxu1 %v1693_v25  ;;  %v5792_v25 = vunpack.i.l.bf16 %v7287_v54  ;;  %v1586_v7 = vsel %vm771_vm3, %v6815_v58, %v5788_v15  ;;  %v6234_v15 = vld [vmem:[#allocation2 + $0x68] sm:$0xff] }
 0x186   : > { %v1677_v12 = vpack.c.bf16 %v1640_v6, %v1639_v18  ;;  %v5826_v30 = vpop.permute.xlu1 %5825  ;;  %v7312_v53 = vpop.permute.xlu0 %5820  ;;  %v1585_v6 = vsel %vm771_vm3, %v6800_v46, %v5787_v29  ;;  %v5803_v58 = vunpack.i.h.bf16 %v7293_v48 }
 0x187   : > { %v5828_v0 = vunpack.i.h.bf16 %v5826_v30  ;;  %v5827_v35 = vunpack.i.l.bf16 %v5826_v30  ;;  %v1620_v30 = vsel %vm771_vm3, %v7079_v43, %v5793_v19  ;;  %v1691_v46 = vpack.c.bf16 %v1586_v7, %v1585_v6 }
 0x188   : > { %2278 = vmatmul.mubr.bf16.vlgmr.msra.gmra.mxu0 %v1677_v12  ;;  %v1619_v12 = vsel %vm771_vm3, %v7076_v3, %v5792_v25  ;;  %v1622_v6 = vsel %vm771_vm3, %v7115_v52, %v5803_v58  ;;  %v5807_v7 = vunpack.i.l.bf16 %v7291_v13 }
 0x189   : > { %2285 = vmatprep.mubr.bf16.mxu0 %v1683_v56  ;;  %v1641_v24 = vsel %vm771_vm3, %v6232_v31, %v5827_v35  ;;  %v1642_v56 = vsel %vm771_vm3, %v6233_v17, %v5828_v0  ;;  %v1701_v11 = vpack.c.bf16 %v1620_v30, %v1619_v12  ;;  %v8838_v31 = vld [vmem:[#allocation7_spill] sm:$0xff]  ;;  %v8839_v17 = vld [vmem:[#allocation8_spill] sm:$0xff]  ;;  %v1266_v12 = vrot.slane %v7229_v40, 1 }
 0x18a   : > { %v7324_v26 = vpop.permute.xlu1 %5835  ;;  %v7326_v2 = vpop.permute.xlu0 %5830  ;;  %v1682_v16 = vpack.c.bf16 %v1642_v56, %v1641_v24  ;;  %v1587_v24 = vsel %vm771_vm3, %v8838_v31, %v5797_v33  ;;  %v1588_v56 = vsel %vm771_vm3, %v8839_v17, %v5798_v42  ;;  %v8841_v31 = vld [vmem:[#allocation11_spill] sm:$0xff] }
 0x18b   : > { %v1695_v42 = vpack.c.bf16 %v1588_v56, %v1587_v24 }
 0x18c   : > { %2149 = vmatmul.mubr.bf16.gmra.mxu1 %v1687_v27 }
 0x18d   : > { %2156 = vmatprep.mubr.bf16.mxu1 %v1697_v8  ;;  %v6235_v8 = vld [vmem:[#allocation2 + $0x70] sm:$0xff] }
 0x18e   : > { %v7332_v60 = vpop.permute.xlu1 %5845  ;;  %v5841_v38 = vpop.permute.xlu0 %5840 }
 0x18f   : > { %v5843_v18 = vunpack.i.h.bf16 %v5841_v38  ;;  %v5842_v54 = vunpack.i.l.bf16 %v5841_v38 }
 0x190   : > { %2286 = vmatmul.mubr.bf16.gmra.mxu0 %v1682_v16  ;;  %v1621_v16 = vsel %vm771_vm3, %v7112_v63, %v5802_v57  ;;  %v6236_v57 = vld [vmem:[#allocation2 + $0x88] sm:$0xff] }
 0x191   : > { %2293 = vmatprep.mubr.bf16.mxu0 %v1687_v27  ;;  %v1643_v29 = vsel %vm771_vm3, %v6234_v15, %v5842_v54  ;;  %v1644_v19 = vsel %vm771_vm3, %v6235_v8, %v5843_v18  ;;  %v1267_v18 = vrot.slane %v7231_v47, 1  ;;  %v5808_v54 = vunpack.i.h.bf16 %v7291_v13  ;;  %v6237_v15 = vld [vmem:[#allocation2 + $0x90] sm:$0xff]  ;;  %v8840_v47 = vld [vmem:[#allocation9_spill] sm:$0xff] }
 0x192   : > { %v5856_v0 = vpop.permute.xlu1 %5855  ;;  %v7344_v35 = vpop.permute.xlu0 %5850  ;;  %v1686_v25 = vpack.c.bf16 %v1644_v19, %v1643_v29  ;;  %v1705_v33 = vpack.c.bf16 %v1622_v6, %v1621_v16  ;;  %v1589_v13 = vsel %vm771_vm3, %v8840_v47, %v5807_v7 }
 0x193   : > { %v5858_v48 = vunpack.i.h.bf16 %v5856_v0  ;;  %v5857_v38 = vunpack.i.l.bf16 %v5856_v0  ;;  %v5818_v0 = vunpack.i.h.bf16 %v7308_v21  ;;  %v7379_v24 = vsel %vm1126_vm5, %v1266_v12, %v1267_v18 }
 0x194   : > { %2157 = vmatmul.mubr.bf16.gmra.mxu1 %v1691_v46  ;;  %v5822_v12 = vunpack.i.l.bf16 %v7312_v53 }
 0x195   : > { %2164 = vmatprep.mubr.bf16.mxu1 %v1701_v11  ;;  %v5817_v11 = vunpack.i.l.bf16 %v7308_v21  ;;  %v1645_v58 = vsel %vm771_vm3, %v6236_v57, %v5857_v38  ;;  %v1646_v29 = vsel %vm771_vm3, %v6237_v15, %v5858_v48  ;;  %v1590_v21 = vsel %vm771_vm3, %v8841_v31, %v5808_v54  ;;  %v6238_v15 = vld [vmem:[#allocation2 + $0xa8] sm:$0xff] }
 0x196   : > { %v7350_v27 = vpop.permute.xlu1 %5865  ;;  %v7352_v10 = vpop.permute.xlu0 %5860  ;;  %v1624_v16 = vsel %vm771_vm3, %v7129_v44, %v5818_v0  ;;  %v1699_v7 = vpack.c.bf16 %v1590_v21, %v1589_v13  ;;  %v5823_v54 = vunpack.i.h.bf16 %v7312_v53  ;;  %v5832_v0 = vunpack.i.l.bf16 %v7326_v2  ;;  %v8842_v13 = vld [vmem:[#allocation10_spill] sm:$0xff] }
 0x197   : > { %v1623_v38 = vsel %vm771_vm3, %v7126_v55, %v5817_v11 }
 0x198   : > { %2294 = vmatmul.mubr.bf16.gmra.mxu0 %v1686_v25  ;;  %v1690_v25 = vpack.c.bf16 %v1646_v29, %v1645_v58  ;;  %v5833_v58 = vunpack.i.h.bf16 %v7326_v2  ;;  %v1625_v2 = vsel %vm771_vm3, %v7160_v41, %v5832_v0  ;;  %v6240_v0 = vld [vmem:[#allocation2 + $0xc8] sm:$0xff] }
 0x199   : > { %2301 = vmatprep.mubr.bf16.mxu0 %v1691_v46  ;;  %v948_v46 = vld [vmem:[#allocation2 + $0x238] sm:$0xff] }
 0x19a   : > { %v5871_v30 = vpop.permute.xlu0 %5870  ;;  %v7370_v8 = vpop.permute.xlu1 %5875  ;;  %v1269_v17 = vrot.slane %v948_v46, 1  ;;  %v1591_v46 = vsel %vm771_vm3, %v8842_v13, %v5822_v12 }
 0x19b   : > { %v5873_v56 = vunpack.i.h.bf16 %v5871_v30  ;;  %v5872_v48 = vunpack.i.l.bf16 %v5871_v30  ;;  %v1709_v30 = vpack.c.bf16 %v1624_v16, %v1623_v38  ;;  %v5837_v16 = vunpack.i.l.bf16 %v7324_v26 }
 0x19c   : > { %2165 = vmatmul.mubr.bf16.gmra.mxu1 %v1695_v42  ;;  %v7386_v6 = vsel %vm1126_vm5, %v1267_v18, %v1269_v17 }
 0x19d   : > { %2172 = vmatprep.mubr.bf16.mxu1 %v1705_v33  ;;  %v1740_v11 = vpack.c.bf16 %v7386_v6, %v7379_v24  ;;  %v1647_v18 = vsel %vm771_vm3, %v6238_v15, %v5872_v48  ;;  %v1626_v48 = vsel %vm771_vm3, %v7163_v50, %v5833_v58  ;;  %v5847_v15 = vunpack.i.l.bf16 %v7332_v60  ;;  %v6241_v58 = vld [vmem:[#allocation2 + $0xd0] sm:$0xff] }
 0x19e   : > { %v7374_v19 = vpop.permute.xlu0 %5880  ;;  %v5886_v33 = vpop.permute.xlu1 %5885 }
 0x19f   : > { %v5888_v21 = vunpack.i.h.bf16 %v5886_v33  ;;  %v5887_v17 = vunpack.i.l.bf16 %v5886_v33  ;;  %v5848_v33 = vunpack.i.h.bf16 %v7332_v60 }
 0x1a0   : > { %2302 = vmatmul.mubr.bf16.gmra.mxu0 %v1690_v25  ;;  %v8843_v25 = vld [vmem:[#allocation12_spill] sm:$0xff] }
 0x1a1   : > { %2309 = vmatprep.mubr.bf16.mxu0 %v1695_v42  ;;  %v6239_v42 = vld [vmem:[#allocation2 + $0xb0] sm:$0xff]  ;;  %v1592_v31 = vsel %vm771_vm3, %v8843_v25, %v5823_v54  ;;  %v1713_v54 = vpack.c.bf16 %v1626_v48, %v1625_v2 }
 0x1a2   : > { %v7390_v57 = vpop.permute.xlu0 %5890  ;;  %v1648_v29 = vsel %vm771_vm3, %v6239_v42, %v5873_v56  ;;  %v7406_v38 = vpop.permute.xlu1 %5895  ;;  %v5838_v56 = vunpack.i.h.bf16 %v7324_v26  ;;  %v1650_v42 = vsel %vm771_vm3, %v6241_v58, %v5888_v21  ;;  %v1628_v21 = vsel %vm771_vm3, %v7157_v4, %v5848_v33 }
 0x1a3   : > { %v1694_v47 = vpack.c.bf16 %v1648_v29, %v1647_v18  ;;  %v1649_v18 = vsel %vm771_vm3, %v6240_v0, %v5887_v17  ;;  %v1627_v17 = vsel %vm771_vm3, %v7154_v51, %v5847_v15  ;;  %v5853_v0 = vunpack.i.h.bf16 %v7344_v35 }
 0x1a4   : > { %2173 = vmatmul.mubr.bf16.gmra.mxu1 %v1699_v7  ;;  %v1698_v26 = vpack.c.bf16 %v1650_v42, %v1649_v18  ;;  %v6242_v18 = vld [vmem:[#allocation2 + $0xe8] sm:$0xff]  ;;  %v5863_v15 = vunpack.i.h.bf16 %v7352_v10  ;;  %v5862_v33 = vunpack.i.l.bf16 %v7352_v10 }
 0x1a5   : > { %2180 = vmatprep.mubr.bf16.mxu1 %v1709_v30  ;;  %v1703_v30 = vpack.c.bf16 %v1592_v31, %v1591_v46  ;;  %v8845_v46 = vld [vmem:[#allocation14_spill] sm:$0xff] }
 0x1a6   : > { %v5901_v53 = vpop.permute.xlu0 %5900  ;;  %v1594_v25 = vsel %vm771_vm3, %v8845_v46, %v5838_v56  ;;  %v8846_v46 = vld [vmem:[#allocation15_spill] sm:$0xff]  ;;  %v1630_v10 = vsel %vm771_vm3, %v7189_v22, %v5863_v15 }
 0x1a7   : > { %v5903_v60 = vunpack.i.h.bf16 %v5901_v53  ;;  %v5902_v31 = vunpack.i.l.bf16 %v5901_v53  ;;  %v6243_v53 = vld [vmem:[#allocation2 + $0xf0] sm:$0xff] }
 0x1a8   : > { %2310 = vmatmul.mubr.bf16.gmra.mxu0 %v1694_v47  ;;  %v8844_v47 = vld [vmem:[#allocation13_spill] sm:$0xff] }
 0x1a9   : > { %2317 = vmatprep.mubr.bf16.mxu0 %v1699_v7  ;;  %v7416_v7 = vpop.permute.xlu1 %5905  ;;  %v1593_v13 = vsel %vm771_vm3, %v8844_v47, %v5837_v16  ;;  %v5852_v16 = vunpack.i.l.bf16 %v7344_v35  ;;  %v1651_v56 = vsel %vm771_vm3, %v6242_v18, %v5902_v31  ;;  %v1652_v58 = vsel %vm771_vm3, %v6243_v53, %v5903_v60 }
 0x1aa   : > { %v7410_v12 = vpop.permute.xlu0 %5910  ;;  %v1707_v48 = vpack.c.bf16 %v1594_v25, %v1593_v13  ;;  %v8847_v25 = vld [vmem:[#allocation16_spill] sm:$0xff]  ;;  %v1629_v60 = vsel %vm771_vm3, %v7186_v45, %v5862_v33  ;;  %v5877_v18 = vunpack.i.l.bf16 %v7370_v8 }
 0x1ab   : > { %v1595_v35 = vsel %vm771_vm3, %v8846_v46, %v5852_v16  ;;  %v1596_v31 = vsel %vm771_vm3, %v8847_v25, %v5853_v0  ;;  %v945_v0 = vld [vmem:[#allocation2 + $0x220] sm:$0xff]  ;;  %v1721_v53 = vpack.c.bf16 %v1630_v10, %v1629_v60 }
 0x1ac   : > { %2181 = vmatmul.mubr.bf16.gmra.mxu1 %v1703_v30 }
 0x1ad   : > { %2188 = vmatprep.mubr.bf16.mxu1 %v1713_v54  ;;  %v1717_v54 = vpack.c.bf16 %v1628_v21, %v1627_v17  ;;  %v5916_v42 = vpop.permute.xlu1 %5915  ;;  %v5867_v17 = vunpack.i.l.bf16 %v7350_v27  ;;  %v5868_v21 = vunpack.i.h.bf16 %v7350_v27 }
 0x1ae   : > { %v7418_v29 = vpop.permute.xlu0 %5920  ;;  %v5918_v47 = vunpack.i.h.bf16 %v5916_v42  ;;  %v5917_v13 = vunpack.i.l.bf16 %v5916_v42  ;;  %v6245_v42 = vld [vmem:[#allocation2 + $0x110] sm:$0xff] }
 0x1b0   : > { %2318 = vmatmul.mubr.bf16.gmra.mxu0 %v1698_v26  ;;  %v1702_v26 = vpack.c.bf16 %v1652_v58, %v1651_v56  ;;  %v1711_v56 = vpack.c.bf16 %v1596_v31, %v1595_v35  ;;  %v6244_v58 = vld [vmem:[#allocation2 + $0x108] sm:$0xff]  ;;  %v1654_v15 = vsel %vm771_vm3, %v6245_v42, %v5918_v47 }
 0x1b1   : > { %2325 = vmatprep.mubr.bf16.mxu0 %v1703_v30  ;;  %v1653_v33 = vsel %vm771_vm3, %v6244_v58, %v5917_v13  ;;  %v7456_v46 = vpop.permute.xlu1 %5925  ;;  %v8849_v35 = vld [vmem:[#allocation18_spill] sm:$0xff]  ;;  %v1631_v13 = vsel %vm771_vm3, %v7180_v14, %v5877_v18  ;;  %v5882_v58 = vunpack.i.l.bf16 %v7374_v19  ;;  %v5893_v18 = vunpack.i.h.bf16 %v7390_v57 }
 0x1b2   : > { %v7428_v2 = vpop.permute.xlu0 %5930  ;;  %v1706_v25 = vpack.c.bf16 %v1654_v15, %v1653_v33  ;;  %v1598_v31 = vsel %vm771_vm3, %v8849_v35, %v5868_v21  ;;  %v5883_v21 = vunpack.i.h.bf16 %v7374_v19  ;;  %v6246_v42 = vld [vmem:[#allocation2 + $0x128] sm:$0xff]  ;;  %v6247_v15 = vld [vmem:[#allocation2 + $0x130] sm:$0xff]  ;;  %v8851_v35 = vld [vmem:[#allocation20_spill] sm:$0xff] }
 0x1b3   : > { %v5933_v60 = vunpack.i.h.bf16 %v7428_v2  ;;  %v5932_v10 = vunpack.i.l.bf16 %v7428_v2 }
 0x1b4   : > { %2189 = vmatmul.mubr.bf16.gmra.mxu1 %v1707_v48 }
 0x1b5   : > { %2196 = vmatprep.mubr.bf16.mxu1 %v1717_v54  ;;  %v5878_v54 = vunpack.i.h.bf16 %v7370_v8  ;;  %v1655_v2 = vsel %vm771_vm3, %v6246_v42, %v5932_v10  ;;  %v5936_v40 = vpop.permute.xlu1 %5935  ;;  %v5907_v42 = vunpack.i.l.bf16 %v7416_v7 }
 0x1b6   : > { %v7436_v30 = vpop.permute.xlu0 %5940 }
 0x1b7   : > { %v1632_v47 = vsel %vm771_vm3, %v7183_v61, %v5878_v54  ;;  %v5892_v54 = vunpack.i.l.bf16 %v7390_v57 }
 0x1b8   : > { %2326 = vmatmul.mubr.bf16.gmra.mxu0 %v1702_v26  ;;  %v1256_v26 = vrot.slane %v945_v0, 7  ;;  %v1725_v0 = vpack.c.bf16 %v1632_v47, %v1631_v13  ;;  %v5938_v47 = vunpack.i.h.bf16 %v5936_v40 }
 0x1b9   : > { %2333 = vmatprep.mubr.bf16.mxu0 %v1707_v48  ;;  %v8848_v48 = vld [vmem:[#allocation17_spill] sm:$0xff]  ;;  %v1633_v10 = vsel %vm771_vm3, %v7200_v5, %v5892_v54 }
 0x1ba   : > { %v7450_v16 = vpop.permute.xlu0 %5950  ;;  %v1597_v27 = vsel %vm771_vm3, %v8848_v48, %v5867_v17 }
 0x1bb   : > { %v1715_v17 = vpack.c.bf16 %v1598_v31, %v1597_v27  ;;  %v1600_v31 = vsel %vm771_vm3, %v8851_v35, %v5883_v21  ;;  %v5908_v21 = vunpack.i.h.bf16 %v7416_v7  ;;  %v1635_v7 = vsel %vm771_vm3, %v7194_v32, %v5907_v42 }
 0x1bc   : > { %2197 = vmatmul.mubr.bf16.gmra.mxu1 %v1711_v56 }
 0x1bd   : > { %2204 = vmatprep.mubr.bf16.mxu1 %v1721_v53  ;;  %v1258_v53 = vsel %vm997_vm4, %v1256_v26, %v1257_v59  ;;  %v8850_v26 = vld [vmem:[#allocation19_spill] sm:$0xff] }
 0x1be   : > { %v7458_v8 = vpop.permute.xlu0 %5960 }
 0x1c0   : > { %2334 = vmatmul.mubr.bf16.gmra.mxu0 %v1706_v25  ;;  %v1599_v25 = vsel %vm771_vm3, %v8850_v26, %v5882_v58  ;;  %v1636_v26 = vsel %vm771_vm3, %v7197_v37, %v5908_v21 }
 0x1c1   : > { %2341 = vmatprep.mubr.bf16.mxu0 %v1711_v56  ;;  %v1656_v56 = vsel %vm771_vm3, %v6247_v15, %v5933_v60  ;;  %v5937_v60 = vunpack.i.l.bf16 %v5936_v40  ;;  %v1719_v58 = vpack.c.bf16 %v1600_v31, %v1599_v25  ;;  %v5943_v40 = vunpack.i.h.bf16 %v7436_v30 }
 0x1c2   : > { %v5971_v33 = vpop.permute.xlu0 %5970  ;;  %v1710_v57 = vpack.c.bf16 %v1656_v56, %v1655_v2  ;;  %v6248_v2 = vld [vmem:[#allocation2 + $0x148] sm:$0xff]  ;;  %v6249_v56 = vld [vmem:[#allocation2 + $0x150] sm:$0xff]  ;;  %v1733_v35 = vpack.c.bf16 %v1636_v26, %v1635_v7  ;;  %v5913_v31 = vunpack.i.h.bf16 %v7410_v12 }
 0x1c3   : > { %v5973_v48 = vunpack.i.h.bf16 %v5971_v33  ;;  %v5972_v27 = vunpack.i.l.bf16 %v5971_v33  ;;  %v1657_v15 = vsel %vm771_vm3, %v6248_v2, %v5937_v60  ;;  %v1658_v54 = vsel %vm771_vm3, %v6249_v56, %v5938_v47  ;;  %v6250_v60 = vld [vmem:[#allocation2 + $0x168] sm:$0xff]  ;;  %v8854_v2 = vld [vmem:[#allocation27_spill] sm:$0xff] }
 0x1c4   : > { %2205 = vmatmul.mubr.bf16.gmra.mxu1 %v1715_v17  ;;  %v5912_v47 = vunpack.i.l.bf16 %v7410_v12  ;;  %v8855_v12 = vld [vmem:[#allocation28_spill] sm:$0xff]  ;;  %v6253_v26 = vld [vmem:[#allocation2 + $0x190] sm:$0xff] }
 0x1c5   : > { %2212 = vmatprep.mubr.bf16.mxu1 %v1725_v0  ;;  %v7478_v59 = vsel %vm771_vm3, %v1258_v53, %v5972_v27  ;;  %v7482_v19 = vsel %vm771_vm3, %v7298_v28, %v5973_v48  ;;  %v1634_v0 = vsel %vm771_vm3, %v7203_v62, %v5893_v18  ;;  %v5898_v28 = vunpack.i.h.bf16 %v7406_v38  ;;  %v8853_v27 = vld [vmem:[#allocation22_spill] sm:$0xff] }
 0x1c6   : > { %v1739_v13 = vpack.c.bf16 %v7482_v19, %v7478_v59  ;;  %v5897_v53 = vunpack.i.l.bf16 %v7406_v38  ;;  %v1729_v33 = vpack.c.bf16 %v1634_v0, %v1633_v10  ;;  %v1714_v18 = vpack.c.bf16 %v1658_v54, %v1657_v15  ;;  %v6251_v0 = vld [vmem:[#allocation2 + $0x170] sm:$0xff]  ;;  %v8856_v54 = vld [vmem:[#allocation33_spill] sm:$0xff] }
 0x1c7   : > { %v1602_v38 = vsel %vm771_vm3, %v8853_v27, %v5898_v28  ;;  %v5923_v28 = vunpack.i.h.bf16 %v7418_v29  ;;  %v1603_v15 = vsel %vm771_vm3, %v8854_v2, %v5912_v47  ;;  %v1604_v56 = vsel %vm771_vm3, %v8855_v12, %v5913_v31 }
 0x1c8   : > { %2342 = vmatmul.mubr.bf16.gmra.mxu0 %v1710_v57  ;;  %v5942_v57 = vunpack.i.l.bf16 %v7436_v30  ;;  %v1660_v30 = vsel %vm771_vm3, %v6251_v0, %v5943_v40  ;;  %v1727_v27 = vpack.c.bf16 %v1604_v56, %v1603_v15  ;;  %v5953_v47 = vunpack.i.h.bf16 %v7450_v16  ;;  %v8859_v0 = vld [vmem:[#allocation30_spill] sm:$0xff] }
 0x1c9   : > { %2349 = vmatprep.mubr.bf16.mxu0 %v1715_v17  ;;  %v8852_v17 = vld [vmem:[#allocation21_spill] sm:$0xff]  ;;  %v5963_v12 = vunpack.i.h.bf16 %v7458_v8  ;;  %v5962_v56 = vunpack.i.l.bf16 %v7458_v8  ;;  %v1708_v59 = vpack.c.bf16 %v7163_v50, %v7160_v41  ;;  %v8864_v41 = vld [vmem:[#allocation24_spill] sm:$0xff]  ;;  %v8865_v50 = vld [vmem:[#allocation23_spill] sm:$0xff] }
 0x1ca   : > { %v1601_v48 = vsel %vm771_vm3, %v8852_v17, %v5897_v53  ;;  %v1659_v10 = vsel %vm771_vm3, %v6250_v60, %v5942_v57  ;;  %v5922_v53 = vunpack.i.l.bf16 %v7418_v29  ;;  %v8857_v17 = vld [vmem:[#allocation34_spill] sm:$0xff]  ;;  %v5928_v29 = vunpack.i.h.bf16 %v7456_v46 }
 0x1cb   : > { %v1723_v25 = vpack.c.bf16 %v1602_v38, %v1601_v48  ;;  %v1638_v48 = vsel %vm771_vm3, %v8857_v17, %v5923_v28  ;;  %v5927_v38 = vunpack.i.l.bf16 %v7456_v46  ;;  %v6252_v57 = vld [vmem:[#allocation2 + $0x188] sm:$0xff]  ;;  %v5952_v60 = vunpack.i.l.bf16 %v7450_v16 }
 0x1cc   : > { %2213 = vmatmul.mubr.bf16.gmra.mxu1 %v1719_v58  ;;  %v1606_v46 = vsel %vm771_vm3, %v8859_v0, %v5928_v29  ;;  %v1679_v28 = vpack.c.bf16 %v6936_v34, %v6933_v23  ;;  %v1684_v23 = vpack.c.bf16 %v6985_v9, %v6982_v1  ;;  %v1688_v34 = vpack.c.bf16 %v7006_v39, %v7003_v36  ;;  %v6257_v29 = vld [vmem:[#allocation2 + $0x1d0] sm:$0xff] }
 0x1cd   : > { %2220 = vmatprep.mubr.bf16.mxu1 %v1729_v33  ;;  %v5946_v33 = vpop.permute.xlu1 %5945 }
 0x1ce   : > { %v5948_v21 = vunpack.i.h.bf16 %v5946_v33  ;;  %v5947_v42 = vunpack.i.l.bf16 %v5946_v33 }
 0x1d0   : > { %2350 = vmatmul.mubr.bf16.gmra.mxu0 %v1714_v18  ;;  %v1637_v18 = vsel %vm771_vm3, %v8856_v54, %v5922_v53  ;;  %v1661_v7 = vsel %vm771_vm3, %v6252_v57, %v5947_v42  ;;  %v6254_v53 = vld [vmem:[#allocation2 + $0x1a8] sm:$0xff]  ;;  %v8861_v57 = vld [vmem:[#allocation32_spill] sm:$0xff] }
 0x1d1   : > { %2357 = vmatprep.mubr.bf16.mxu0 %v1719_v58  ;;  %v1718_v58 = vpack.c.bf16 %v1660_v30, %v1659_v10  ;;  %v1737_v40 = vpack.c.bf16 %v1638_v48, %v1637_v18  ;;  %v1663_v33 = vsel %vm771_vm3, %v6254_v53, %v5952_v60  ;;  %v5956_v42 = vpop.permute.xlu1 %5955  ;;  %v6256_v18 = vld [vmem:[#allocation2 + $0x1c8] sm:$0xff] }
 0x1d2   : > { %v5958_v2 = vunpack.i.h.bf16 %v5956_v42  ;;  %v5957_v15 = vunpack.i.l.bf16 %v5956_v42  ;;  %v8863_v60 = vld [vmem:[#allocation26_spill] sm:$0xff] }
 0x1d4   : > { %2221 = vmatmul.mubr.bf16.gmra.mxu1 %v1723_v25  ;;  %v1665_v48 = vsel %vm771_vm3, %v6256_v18, %v5957_v15 }
 0x1d5   : > { %2228 = vmatprep.mubr.bf16.mxu1 %v1733_v35  ;;  %v1662_v35 = vsel %vm771_vm3, %v6253_v26, %v5948_v21  ;;  %v1692_v26 = vpack.c.bf16 %v7051_v20, %v7048_v49  ;;  %v1700_v49 = vpack.c.bf16 %v7115_v52, %v7112_v63  ;;  %v6258_v20 = vld [vmem:[#allocation2 + $0x208] sm:$0xff]  ;;  %v1712_v52 = vpack.c.bf16 %v7157_v4, %v7154_v51 }
 0x1d6   : > { %v1722_v31 = vpack.c.bf16 %v1662_v35, %v1661_v7  ;;  %v1672_v7 = vsel %vm771_vm3, %v8861_v57, %v5963_v12  ;;  %v1696_v35 = vpack.c.bf16 %v7079_v43, %v7076_v3  ;;  %v1704_v43 = vpack.c.bf16 %v7129_v44, %v7126_v55 }
 0x1d7   : > { %v1716_v63 = vpack.c.bf16 %v7189_v22, %v7186_v45  ;;  %v1720_v55 = vpack.c.bf16 %v7183_v61, %v7180_v14  ;;  %v1724_v44 = vpack.c.bf16 %v7203_v62, %v7200_v5  ;;  %v1728_v51 = vpack.c.bf16 %v7197_v37, %v7194_v32 }
 0x1d8   : > { %2358 = vmatmul.mubr.bf16.gmra.mxu0 %v1718_v58  ;;  %v6255_v58 = vld [vmem:[#allocation2 + $0x1b0] sm:$0xff]  ;;  %v1732_v4 = vpack.c.bf16 %v8857_v17, %v8856_v54  ;;  %v8866_v14 = vpack.c.bf16 %v8864_v41, %v8865_v50 }
 0x1d9   : > { %2365 = vmatprep.mubr.bf16.mxu0 %v1723_v25  ;;  %v8858_v25 = vld [vmem:[#allocation29_spill] sm:$0xff]  ;;  %v1664_v21 = vsel %vm771_vm3, %v6255_v58, %v5953_v47 }
 0x1da   : > { %v1605_v10 = vsel %vm771_vm3, %v8858_v25, %v5927_v38  ;;  %v1726_v16 = vpack.c.bf16 %v1664_v21, %v1663_v33  ;;  %v5966_v38 = vpop.permute.xlu1 %5965 }
 0x1db   : > { %v1731_v30 = vpack.c.bf16 %v1606_v46, %v1605_v10  ;;  %v5968_v9 = vunpack.i.h.bf16 %v5966_v38  ;;  %v5967_v36 = vunpack.i.l.bf16 %v5966_v38 }
 0x1dc   : > { %2229 = vmatmul.mubr.bf16.gmra.mxu1 %v1727_v27 }
 0x1dd   : > { %2236 = vmatprep.mubr.bf16.mxu1 %v1737_v40  ;;  %v8860_v40 = vld [vmem:[#allocation31_spill] sm:$0xff]  ;;  %v1668_v25 = vsel %vm771_vm3, %v8863_v60, %v5968_v9 }
 0x1de   : > { %v1671_v8 = vsel %vm771_vm3, %v8860_v40, %v5962_v56  ;;  %v5976_v10 = vpop.permute.xlu1 %5975 }
 0x1df   : > { %v1735_v39 = vpack.c.bf16 %v1672_v7, %v1671_v8  ;;  %v5978_v46 = vunpack.i.h.bf16 %v5976_v10 }
 0x1e0   : > { %2366 = vmatmul.mubr.bf16.gmra.mxu0 %v1722_v31  ;;  %v8862_v31 = vld [vmem:[#allocation25_spill] sm:$0xff] }
 0x1e1   : > { %2373 = vmatprep.mubr.bf16.mxu0 %v1727_v27  ;;  %v1666_v27 = vsel %vm771_vm3, %v6257_v29, %v5958_v2  ;;  %v1667_v47 = vsel %vm771_vm3, %v8862_v31, %v5967_v36  ;;  %v7620_v2 = vld [vmem:[%s8770_s4] ss:$0 sm:$0xff] }
 0x1e2   : > { %v1730_v1 = vpack.c.bf16 %v1666_v27, %v1665_v48  ;;  %v1734_v0 = vpack.c.bf16 %v1668_v25, %v1667_v47 }
 0x1e4   : > { %2237 = vmatmul.mubr.bf16.gmra.mxu1 %v1731_v30 }
 0x1e5   : > { %5645 = vmatprep.mubr.msk.bf16.mxu1 %vm771_vm3, %v1679_v28  ;;  %v6259_v28 = vld [vmem:[#allocation2 + $0x210] sm:$0xff] }
 0x1e6   : > { %v1670_v53 = vsel %vm771_vm3, %v6259_v28, %v5978_v46 }
 0x1e8   : > { %2374 = vmatmul.mubr.bf16.gmra.mxu0 %v1726_v16 }
 0x1e9   : > { %2381 = vmatprep.mubr.bf16.mxu0 %v1731_v30  ;;  %v5977_v30 = vunpack.i.l.bf16 %v5976_v10 }
 0x1eb   : > { %v1669_v3 = vsel %vm771_vm3, %v6258_v20, %v5977_v30 }
 0x1ec   : > { %5646 = vmatmul.mubr.msk.bf16.vlgmr.msra.gmra.mxu1 %vm771_vm3, %v1684_v23  ;;  %v1738_v33 = vpack.c.bf16 %v1670_v53, %v1669_v3 }
 0x1ed   : > { %5649 = vmatprep.mubr.msk.bf16.mxu1 %vm771_vm3, %v1688_v34 }
 0x1f0   : > { %2382 = vmatmul.mubr.bf16.gmra.mxu0 %v1730_v1 }
 0x1f1   : > { %2389 = vmatprep.mubr.bf16.mxu0 %v1735_v39 }
 0x1f4   : > { %5650 = vmatmul.mubr.msk.bf16.gmra.mxu1 %vm771_vm3, %v1692_v26 }
 0x1f5   : > { %5653 = vmatprep.mubr.msk.bf16.mxu1 %vm771_vm3, %v1696_v35 }
 0x1f8   : > { %2390 = vmatmul.mubr.bf16.gmra.mxu0 %v1734_v0 }
 0x1f9   : > { %2397 = vmatprep.mubr.bf16.mxu0 %v1739_v13 }
 0x1fc   : > { %5654 = vmatmul.mubr.msk.bf16.gmra.mxu1 %vm771_vm3, %v1700_v49 }
 0x1fd   : > { %5657 = vmatprep.mubr.msk.bf16.mxu1 %vm771_vm3, %v1704_v43 }
 0x200   : > { %2398 = vmatmul.mubr.bf16.gmra.mxu0 %v1738_v33 }
 0x204   : > { %5658 = vmatmul.mubr.msk.bf16.gmra.mxu1 %vm771_vm3, %v1708_v59 }
 0x205   : > { %5661 = vmatprep.mubr.msk.bf16.mxu1 %vm771_vm3, %v1712_v52 }
 0x20c   : > { %5662 = vmatmul.mubr.msk.bf16.gmra.mxu1 %vm771_vm3, %v1716_v63 }
 0x20d   : > { %5665 = vmatprep.mubr.msk.bf16.mxu1 %vm771_vm3, %v1720_v55 }
 0x214   : > { %5666 = vmatmul.mubr.msk.bf16.gmra.mxu1 %vm771_vm3, %v1724_v44 }
 0x215   : > { %5669 = vmatprep.mubr.msk.bf16.mxu1 %vm771_vm3, %v1728_v51 }
 0x21c   : > { %5670 = vmatmul.mubr.msk.bf16.gmra.mxu1 %vm771_vm3, %v1732_v4 }
 0x21d   : > { %5673 = vmatprep.mubr.msk.bf16.mxu1 %vm771_vm3, %v8866_v14 }
 0x224   : > { %5674 = vmatmul.mubr.msk.bf16.gmra.mxu1 %vm771_vm3, %v1740_v11 }
 0x22c   : > { %v5113_v61 = vpop.f32.mrf.mxu1 }
 0x22e   : > { %v5114_v45 = vpop.f32.mrf.mxu1 }
 0x22f   : > { %v5115_v22 = vadd.f32 %v5114_v45, %v5113_v61 }
 0x230   : > { %v5116_v32 = vpop.f32.mrf.mxu1 }
 0x231   : > { %v2119_v34 = vadd.f32 %v5115_v22, %v7620_v2 }
 0x232   : > { %v5117_v37 = vpop.f32.mrf.mxu1 }
 0x233   : > { %v5118_v18 = vadd.f32 %v5117_v37, %v5116_v32 }
 0x234   : > { %v5119_v5 = vpop.f32.mrf.mxu1 }
 0x235   : > { %v2122_v57 = vadd.f32 %v5118_v18, %v7620_v2 }
 0x236   : > { %v5120_v62 = vpop.f32.mrf.mxu1 }
 0x237   : > { %v7603_v19 = vadd.f32 %v5120_v62, %v5119_v5 }
 0x238   : > { %v7605_v13 = vpop.f32.mrf.mxu1 }
 0x23a   : > { %v7607_v54 = vpop.f32.mrf.mxu1 }
 0x23c   : > { %v5125_v17 = vpop.f32.mrf.mxu1 }
 0x23e   : > { %v5126_v58 = vpop.f32.mrf.mxu1 }
 0x23f   : > { %v7609_v21 = vadd.f32 %v5126_v58, %v5125_v17 }
 0x240   : > { %v7611_v24 = vpop.f32.mrf.mxu1 }
 0x242   : > { %v7613_v6 = vpop.f32.mrf.mxu1 }
 0x244   : > { %v5131_v11 = vpop.f32.mrf.mxu1 }
 0x246   : > { %v5132_v42 = vpop.f32.mrf.mxu1 }
 0x247   : > { %v7615_v16 = vadd.f32 %v5132_v42, %v5131_v11 }
 0x248   : > { %v7622_v15 = vpop.f32.mrf.mxu1  ;;  %v5225_v12 = vpop.f32.mrf.mxu0 }
 0x24a   : > { %v7624_v56 = vpop.f32.mrf.mxu1  ;;  %v5226_v23 = vpop.f32.mrf.mxu0 }
 0x24b   : > { %v5227_v48 = vadd.f32 %v5226_v23, %v5225_v12  ;;  %v6098_v12 = vld [vmem:[%s8771_s5 + $0x78] sm:$0xff]  }
 0x24c   : > { %v5137_v29 = vpop.f32.mrf.mxu1  ;;  %v5228_v27 = vpop.f32.mrf.mxu0  ;;  %v6099_v23 = vld [vmem:[%s8771_s5 + $0x38] sm:$0xff]   ;;  %5341 = vmatprep.subr.bf16.mxu0 %v6098_v12 }
 0x24d   : > { %v7627_v38 = vadd.f32 %v5227_v48, %v2119_v34  ;;  %5342 = vmatpush3.bf16.msra.mxu0 %v6099_v23 }
 0x24e   : > { %v5138_v40 = vpop.f32.mrf.mxu1  ;;  %v5229_v8 = vpop.f32.mrf.mxu0 }
 0x24f   : > { %v7630_v7 = vadd.f32 %v5138_v40, %v5137_v29  ;;  %v5230_v1 = vadd.f32 %v5229_v8, %v5228_v27 }
 0x250   : > { %v7632_v9 = vpop.f32.mrf.mxu1  ;;  %v7634_v36 = vpop.f32.mrf.mxu0 }
 0x251   : > { %v7636_v39 = vadd.f32 %v5230_v1, %v2122_v57 }
 0x252   : > { %v7638_v26 = vpop.f32.mrf.mxu1  ;;  %v7640_v35 = vpop.f32.mrf.mxu0 }
 0x254   : > { %v5143_v31 = vpop.f32.mrf.mxu1  ;;  %v7642_v47 = vpop.f32.mrf.mxu0 }
 0x256   : > { %v5144_v60 = vpop.f32.mrf.mxu1  ;;  %v7644_v25 = vpop.f32.mrf.mxu0 }
 0x257   : > { %v7646_v10 = vadd.f32 %v5144_v60, %v5143_v31  ;;  %v6100_v31 = vld [vmem:[%s8771_s5 + $0x70] sm:$0xff]  }
 0x258   : > { %v7648_v0 = vpop.f32.mrf.mxu1  ;;  %v7650_v46 = vpop.f32.mrf.mxu0  ;;  %v6101_v60 = vld [vmem:[%s8771_s5 + $0x30] sm:$0xff]   ;;  %5343 = vmatprep.subr.bf16.mxu0 %v6100_v31  ;;  %v6102_v31 = vld [vmem:[%s8771_s5 + $0x68] sm:$0xff]  }
 0x259   : > { %5344 = vmatpush3.bf16.msra.mxu0 %v6101_v60 }
 0x25a   : > { %v7652_v30 = vpop.f32.mrf.mxu1  ;;  %v7654_v49 = vpop.f32.mrf.mxu0  ;;  %5345 = vmatprep.subr.bf16.mxu0 %v6102_v31 }
 0x25c   : > { %v5149_v43 = vpop.f32.mrf.mxu1  ;;  %v7656_v20 = vpop.f32.mrf.mxu0 }
 0x25e   : > { %v5150_v3 = vpop.f32.mrf.mxu1  ;;  %v7658_v28 = vpop.f32.mrf.mxu0 }
 0x25f   : > { %v7660_v53 = vadd.f32 %v5150_v3, %v5149_v43 }
 0x260   : > { %v7662_v33 = vpop.f32.mrf.mxu1  ;;  %v7664_v59 = vpop.f32.mrf.mxu0 }
 0x262   : > { %v7666_v52 = vpop.f32.mrf.mxu1  ;;  %v7668_v63 = vpop.f32.mrf.mxu0 }
 0x264   : > { %v5155_v55 = vpop.f32.mrf.mxu1  ;;  %v7670_v44 = vpop.f32.mrf.mxu0 }
 0x266   : > { %v5156_v51 = vpop.f32.mrf.mxu1  ;;  %v7672_v4 = vpop.f32.mrf.mxu0 }
 0x267   : > { %v7674_v41 = vadd.f32 %v5156_v51, %v5155_v55 }
 0x268   : > { %v7676_v50 = vpop.f32.mrf.mxu1  ;;  %v7678_v14 = vpop.f32.mrf.mxu0 }
 0x26a   : > { %v7680_v61 = vpop.f32.mrf.mxu1  ;;  %v7682_v45 = vpop.f32.mrf.mxu0 }
 0x26c   : > { %v5161_v22 = vpop.f32.mrf.mxu1  ;;  %v7684_v32 = vpop.f32.mrf.mxu0 }
 0x26e   : > { %v5162_v37 = vpop.f32.mrf.mxu1  ;;  %v7686_v5 = vpop.f32.mrf.mxu0 }
 0x26f   : > { %v7688_v62 = vadd.f32 %v5162_v37, %v5161_v22 }
 0x270   : > { %v7690_v17 = vpop.f32.mrf.mxu1  ;;  %v7692_v58 = vpop.f32.mrf.mxu0 }
 0x271   : > { %8867 = vst [vmem:[#allocation7_spill] sm:$0xff] %v7688_v62  ;;  %8868 = vst [vmem:[#allocation8_spill] sm:$0xff] %v7690_v17 }
 0x272   : > { %v7694_v11 = vpop.f32.mrf.mxu1  ;;  %v7696_v42 = vpop.f32.mrf.mxu0 }
 0x273   : > { %8869 = vst [vmem:[#allocation9_spill] sm:$0xff] %v7694_v11 }
 0x274   : > { %v5167_v34 = vpop.f32.mrf.mxu1  ;;  %v7704_v18 = vpop.f32.mrf.mxu0 }
 0x276   : > { %v5168_v48 = vpop.f32.mrf.mxu1  ;;  %v7706_v29 = vpop.f32.mrf.mxu0 }
 0x277   : > { %v7708_v27 = vadd.f32 %v5168_v48, %v5167_v34 }
 0x278   : > { %v7710_v40 = vpop.f32.mrf.mxu1  ;;  %v7712_v8 = vpop.f32.mrf.mxu0 }
 0x279   : > { %8870 = vst [vmem:[#allocation11_spill] sm:$0xff] %v7708_v27  ;;  %8871 = vst [vmem:[#allocation10_spill] sm:$0xff] %v7710_v40 }
 0x27a   : > { %v7714_v57 = vpop.f32.mrf.mxu1  ;;  %v7716_v1 = vpop.f32.mrf.mxu0 }
 0x27b   : > { %8872 = vst [vmem:[#allocation12_spill] sm:$0xff] %v7714_v57 }
 0x27c   : > { %v5173_v43 = vpop.f32.mrf.mxu1  ;;  %v7724_v3 = vpop.f32.mrf.mxu0 }
 0x27d   : > { %8873 = vst [vmem:[#allocation13_spill] sm:$0xff] %v7724_v3 }
 0x27e   : > { %v5174_v55 = vpop.f32.mrf.mxu1  ;;  %v7726_v51 = vpop.f32.mrf.mxu0 }
 0x27f   : > { %8874 = vst [vmem:[#allocation14_spill] sm:$0xff] %v7726_v51  ;;  %v7728_v22 = vadd.f32 %v5174_v55, %v5173_v43 }
 0x280   : > { %v5176_v37 = vpop.f32.mrf.mxu1  ;;  %v7730_v12 = vpop.f32.mrf.mxu0 }
 0x281   : > { %8875 = vst [vmem:[#allocation15_spill] sm:$0xff] %v7728_v22 }
 0x282   : > { %v5177_v23 = vpop.f32.mrf.mxu1  ;;  %v7732_v34 = vpop.f32.mrf.mxu0 }
 0x283   : > { %v7734_v48 = vadd.f32 %v5177_v23, %v5176_v37  ;;  %v6103_v37 = vld [vmem:[%s8771_s5 + $0x28] sm:$0xff]  }
 0x284   : > { %v5179_v11 = vpop.f32.mrf.mxu1  ;;  %v7736_v17 = vpop.f32.mrf.mxu0  ;;  %5346 = vmatpush3.bf16.msra.mxu0 %v6103_v37 }
 0x285   : > { %8876 = vst [vmem:[#allocation16_spill] sm:$0xff] %v7734_v48 }
 0x286   : > { %v5180_v62 = vpop.f32.mrf.mxu1  ;;  %v7741_v57 = vpop.f32.mrf.mxu0 }
 0x287   : > { %8877 = vst [vmem:[#allocation17_spill] sm:$0xff] %v7741_v57  ;;  %v7743_v60 = vadd.f32 %v5180_v62, %v5179_v11 }
 0x288   : > { %v5182_v43 = vpop.f32.mrf.mxu1  ;;  %v7745_v55 = vpop.f32.mrf.mxu0 }
 0x289   : > { %8878 = vst [vmem:[#allocation18_spill] sm:$0xff] %v7743_v60  ;;  %8879 = vst [vmem:[#allocation19_spill] sm:$0xff] %v7745_v55 }
 0x28a   : > { %v5183_v23 = vpop.f32.mrf.mxu1  ;;  %v7750_v48 = vpop.f32.mrf.mxu0 }
 0x28b   : > { %8880 = vst [vmem:[#allocation20_spill] sm:$0xff] %v7750_v48  ;;  %v7752_v22 = vadd.f32 %v5183_v23, %v5182_v43  ;;  %v6104_v43 = vld [vmem:[%s8771_s5 + $0x60] sm:$0xff]  }
 0x28c   : > { %v5185_v40 = vpop.f32.mrf.mxu1  ;;  %v7754_v27 = vpop.f32.mrf.mxu0  ;;  %5347 = vmatprep.subr.bf16.mxu0 %v6104_v43 }
 0x28d   : > { %8881 = vst [vmem:[#allocation21_spill] sm:$0xff] %v7752_v22  ;;  %8882 = vst [vmem:[#allocation22_spill] sm:$0xff] %v7754_v27 }
 0x28e   : > { %v5186_v51 = vpop.f32.mrf.mxu1  ;;  %v7756_v62 = vpop.f32.mrf.mxu0 }
 0x28f   : > { %8883 = vst [vmem:[#allocation27_spill] sm:$0xff] %v7756_v62  ;;  %v7758_v11 = vadd.f32 %v5186_v51, %v5185_v40  ;;  %v6105_v40 = vld [vmem:[%s8771_s5 + $0x20] sm:$0xff]   ;;  %v6106_v51 = vld [vmem:[%s8771_s5 + $0x58] sm:$0xff]   ;;  %v6108_v62 = vld [vmem:[%s8771_s5 + $0x50] sm:$0xff]  }
 0x290   : > { %v5188_v31 = vpop.f32.mrf.mxu1  ;;  %v7760_v60 = vpop.f32.mrf.mxu0  ;;  %5348 = vmatpush3.bf16.msra.mxu0 %v6105_v40 }
 0x291   : > { %8884 = vst [vmem:[#allocation28_spill] sm:$0xff] %v7758_v11  ;;  %5349 = vmatprep.subr.bf16.mxu0 %v6106_v51 }
 0x292   : > { %v5189_v55 = vpop.f32.mrf.mxu1  ;;  %v7762_v3 = vpop.f32.mrf.mxu0 }
 0x293   : > { %8885 = vst [vmem:[#allocation33_spill] sm:$0xff] %v7762_v3  ;;  %v7764_v57 = vadd.f32 %v5189_v55, %v5188_v31  ;;  %v6107_v31 = vld [vmem:[%s8771_s5 + $0x18] sm:$0xff]  }
 0x294   : > { %v5191_v48 = vpop.f32.mrf.mxu1  ;;  %v7766_v37 = vpop.f32.mrf.mxu0  ;;  %5350 = vmatpush3.bf16.msra.mxu0 %v6107_v31 }
 0x295   : > { %8886 = vst [vmem:[#allocation34_spill] sm:$0xff] %v7764_v57  ;;  %8887 = vst [vmem:[#allocation29_spill] sm:$0xff] %v7766_v37  ;;  %5351 = vmatprep.subr.bf16.mxu0 %v6108_v62 }
 0x296   : > { %v5192_v23 = vpop.f32.mrf.mxu1  ;;  %v7777_v11 = vpop.f32.mrf.mxu0 }
 0x297   : > { %8888 = vst [vmem:[#allocation30_spill] sm:$0xff] %v7777_v11  ;;  %v7779_v55 = vadd.f32 %v5192_v23, %v5191_v48  ;;  %v6109_v48 = vld [vmem:[%s8771_s5 + $0x10] sm:$0xff]  }
 0x298   : > { %v5194_v57 = vpop.f32.mrf.mxu1  ;;  %v7784_v22 = vpop.f32.mrf.mxu0  ;;  %5352 = vmatpush3.bf16.msra.mxu0 %v6109_v48 }
 0x299   : > { %8889 = vst [vmem:[#allocation31_spill] sm:$0xff] %v7779_v55  ;;  %8890 = vst [vmem:[#allocation32_spill] sm:$0xff] %v7784_v22 }
 0x29a   : > { %v5195_v27 = vpop.f32.mrf.mxu1  ;;  %v7789_v37 = vpop.f32.mrf.mxu0 }
 0x29b   : > { %8891 = vst [vmem:[#allocation25_spill] sm:$0xff] %v7789_v37  ;;  %v7791_v11 = vadd.f32 %v5195_v27, %v5194_v57 }
 0x29c   : > { %v5197_v43 = vpop.f32.mrf.mxu1  ;;  %v7796_v40 = vpop.f32.mrf.mxu0 }
 0x29d   : > { %8892 = vst [vmem:[#allocation26_spill] sm:$0xff] %v7791_v11  ;;  %8893 = vst [vmem:[#allocation24_spill] sm:$0xff] %v7796_v40 }
 0x29e   : > { %v5198_v23 = vpop.f32.mrf.mxu1  ;;  %v7798_v51 = vpop.f32.mrf.mxu0 }
 0x29f   : > { %8894 = vst [vmem:[#allocation23_spill] sm:$0xff] %v7798_v51  ;;  %v7800_v55 = vadd.f32 %v5198_v23, %v5197_v43  ;;  %v5233_v43 = vadd.f32 %v7640_v35, %v7634_v36 }
 0x2a0   : > { %v5200_v22 = vpop.f32.mrf.mxu1  ;;  %v7802_v3 = vpop.f32.mrf.mxu0 }
 0x2a1   : > { %8895 = vst [vmem:[#allocation35_spill] sm:$0xff] %v7800_v55  ;;  %v2127_v55 = vadd.f32 %v7603_v19, %v7620_v2  ;;  %v5245_v19 = vadd.f32 %v7668_v63, %v7664_v59  ;;  %v2135_v59 = vadd.f32 %v7609_v21, %v7620_v2 }
 0x2a2   : > { %v5201_v27 = vpop.f32.mrf.mxu1  ;;  %v7804_v57 = vpop.f32.mrf.mxu0 }
 0x2a3   : > { %v7806_v31 = vadd.f32 %v5201_v27, %v5200_v22  ;;  %v5124_v22 = vadd.f32 %v7607_v54, %v7605_v13 }
 0x2a4   : > { %v7808_v11 = vpop.f32.mrf.mxu1  ;;  %v7810_v37 = vpop.f32.mrf.mxu0 }
 0x2a5   : > { %8896 = vst [vmem:[#allocation36_spill] sm:$0xff] %v7806_v31  ;;  %8897 = vst [vmem:[#allocation37_spill] sm:$0xff] %v7808_v11  ;;  %v2288_v11 = vadd.f32 %v5233_v43, %v2127_v55  ;;  %v2130_v35 = vadd.f32 %v5124_v22, %v7620_v2  ;;  %v5239_v43 = vadd.f32 %v7654_v49, %v7650_v46 }
 0x2a6   : > { %v7812_v40 = vpop.f32.mrf.mxu1  ;;  %v7814_v62 = vpop.f32.mrf.mxu0  ;;  %v5242_v46 = vadd.f32 %v7658_v28, %v7656_v20  ;;  %v2159_v20 = vadd.f32 %v7646_v10, %v7620_v2  ;;  %v5148_v28 = vadd.f32 %v7652_v30, %v7648_v0  ;;  %v5142_v10 = vadd.f32 %v7638_v26, %v7632_v9 }
 0x2a7   : > { %8898 = vst [vmem:[#allocation38_spill] sm:$0xff] %v7812_v40  ;;  %v5236_v40 = vadd.f32 %v7644_v25, %v7642_v47  ;;  %v5136_v47 = vadd.f32 %v7624_v56, %v7622_v15  ;;  %v5260_v0 = vadd.f32 %v7706_v29, %v7704_v18  ;;  %v5269_v29 = vadd.f32 %v7732_v34, %v7730_v12 }
 0x2a8   : > { %v7818_v48 = vpop.f32.mrf.mxu1  ;;  %v7820_v23 = vpop.f32.mrf.mxu0 }
 0x2a9   : > { %8899 = vst [vmem:[#allocation39_spill] sm:$0xff] %v7818_v48  ;;  %8900 = vst [vmem:[#allocation40_spill] sm:$0xff] %v7820_v23  ;;  %v2291_v54 = vadd.f32 %v5236_v40, %v2130_v35  ;;  %v2296_v35 = vadd.f32 %v5239_v43, %v2135_v59  ;;  %v5251_v43 = vadd.f32 %v7682_v45, %v7678_v14 }
 0x2aa   : > { %v7826_v27 = vpop.f32.mrf.mxu1  ;;  %v7828_v31 = vpop.f32.mrf.mxu0  ;;  %v2162_v14 = vadd.f32 %v5148_v28, %v7620_v2  ;;  %v5254_v45 = vadd.f32 %v7686_v5, %v7684_v32  ;;  %v2175_v32 = vadd.f32 %v7674_v41, %v7620_v2  ;;  %v5160_v5 = vadd.f32 %v7680_v61, %v7676_v50  ;;  %v8904_v28 = vld [vmem:[#allocation14_spill] sm:$0xff] }
 0x2ab   : > { %8901 = vst [vmem:[#allocation41_spill] sm:$0xff] %v7826_v27  ;;  %v2143_v27 = vadd.f32 %v7615_v16, %v7620_v2  ;;  %v5248_v16 = vadd.f32 %v7672_v4, %v7670_v44  ;;  %v2167_v41 = vadd.f32 %v7660_v53, %v7620_v2  ;;  %v5154_v50 = vadd.f32 %v7666_v52, %v7662_v33  ;;  %v6111_v53 = vld [vmem:[%s8771_s5 + $0xb8] sm:$0xff]   ;;  %v6112_v33 = vld [vmem:[%s8771_s5 + $0x48] sm:$0xff]  }
 0x2ac   : > { %v7832_v51 = vpop.f32.mrf.mxu0  ;;  %v5647_v36 = vpop.f32.mrf.mxu1  ;;  %v2178_v52 = vadd.f32 %v5160_v5, %v7620_v2  ;;  %5353 = vmatprep.subr.bf16.mxu0 %v6112_v33  ;;  %v7931_v5 = vld [vmem:[#allocation4 + $0x8] sm:$0xff]  ;;  %v6114_v33 = vld [vmem:[%s8771_s5 + $0xf0] sm:$0xff]  }
 0x2ad   : > { %v2449_v48 = vadd.f32 %v5647_v36, %v2288_v11  ;;  %v2304_v40 = vadd.f32 %v5245_v19, %v2143_v27 }
 0x2ae   : > { %v2440_v23 = vpop.f32.mrf.mxu1  ;;  %v7842_v25 = vpop.f32.mrf.mxu0 }
 0x2af   : > { %v2441_v13 = vadd.f32 %v2440_v23, %v7627_v38  ;;  %v2569_v11 = vmax.f32 %v2449_v48, 0.0  ;;  %v5130_v38 = vadd.f32 %v7613_v6, %v7611_v24  ;;  %v2146_v23 = vadd.f32 %v5136_v47, %v7620_v2 }
 0x2b0   : > { %v5648_v55 = vpop.f32.mrf.mxu1  ;;  %v7856_v49 = vpop.f32.mrf.mxu0 }
 0x2b1   : > { %v2567_v22 = vmax.f32 %v2441_v13, 0.0  ;;  %v2452_v36 = vadd.f32 %v5648_v55, %v2291_v54  ;;  %v2138_v44 = vadd.f32 %v5130_v38, %v7620_v2  ;;  %v2307_v13 = vadd.f32 %v5248_v16, %v2146_v23 }
 0x2b2   : > { %v2443_v63 = vpop.f32.mrf.mxu1  ;;  %v7866_v54 = vpop.f32.mrf.mxu0 }
 0x2b3   : > { %v2599_v15 = vmax.f32 %v2567_v22, %v2569_v11  ;;  %v2444_v56 = vadd.f32 %v2443_v63, %v7636_v39  ;;  %v2570_v21 = vmax.f32 %v2452_v36, 0.0  ;;  %v5257_v39 = vadd.f32 %v7696_v42, %v7692_v58 }
 0x2b4   : > { %v5651_v48 = vpop.f32.mrf.mxu1  ;;  %v2299_v55 = vadd.f32 %v5242_v46, %v2138_v44  ;;  %v2151_v22 = vadd.f32 %v7630_v7, %v7620_v2  ;;  %v7880_v63 = vpop.f32.mrf.mxu0  ;;  %v2323_v46 = vadd.f32 %v5260_v0, %v2162_v14  ;;  %v8905_v0 = vld [vmem:[#allocation33_spill] sm:$0xff] }
 0x2b5   : > { %2615 = vst.msk [vmem:[#allocation3] sm:$0xff] %vm771_vm3, %v2599_v15  ;;  %v2568_v24 = vmax.f32 %v2444_v56, 0.0  ;;  %v2465_v6 = vadd.f32 %v5651_v48, %v2304_v40  ;;  %v2320_v38 = vadd.f32 %v5257_v39, %v2159_v20  ;;  %v2154_v56 = vadd.f32 %v5142_v10, %v7620_v2  ;;  %v6110_v20 = vld [vmem:[%s8771_s5 + $0xf8] sm:$0xff]  }
 0x2b6   : > { %v2456_v4 = vpop.f32.mrf.mxu1  ;;  %v2312_v26 = vadd.f32 %v5251_v43, %v2151_v22  ;;  %v5263_v48 = vadd.f32 %v7716_v1, %v7712_v8  ;;  %v8902_v8 = vld [vmem:[#allocation17_spill] sm:$0xff]  ;;  %5381 = vmatprep.subr.bf16.mxu1 %v6110_v20 }
 0x2b7   : > { %v2600_v27 = vmax.f32 %v2568_v24, %v2570_v21  ;;  %v2457_v19 = vadd.f32 %v2456_v4, %v2296_v35  ;;  %v2573_v11 = vmax.f32 %v2465_v6, 0.0  ;;  %v7892_v6 = vpop.f32.mrf.mxu0  ;;  %v2315_v44 = vadd.f32 %v5254_v45, %v2154_v56  ;;  %5382 = vmatpush3.bf16.msra.mxu1 %v6111_v53  ;;  %v8909_v56 = vld [vmem:[#allocation19_spill] sm:$0xff] }
 0x2b8   : > { %v5652_v47 = vpop.f32.mrf.mxu1  ;;  %v5272_v1 = vadd.f32 %v8902_v8, %v7736_v17  ;;  %v8903_v17 = vld [vmem:[#allocation13_spill] sm:$0xff]  ;;  %v2328_v10 = vadd.f32 %v5263_v48, %v2167_v41  ;;  %v7940_v8 = vld [vmem:[#allocation4 + $0x18] sm:$0xff]  ;;  %5383 = vmatprep.subr.bf16.mxu1 %v6114_v33 }
 0x2b9   : > { %2616 = vst.msk [vmem:[#allocation3 + $0x8] sm:$0xff] %vm771_vm3, %v2600_v27  ;;  %v2571_v58 = vmax.f32 %v2457_v19, 0.0  ;;  %v2468_v42 = vadd.f32 %v5652_v47, %v2307_v13  ;;  %v2336_v13 = vadd.f32 %v5269_v29, %v2175_v32  ;;  %v5266_v47 = vadd.f32 %v8904_v28, %v8903_v17  ;;  %v6116_v17 = vld [vmem:[%s8771_s5 + $0xb0] sm:$0xff]  }
 0x2ba   : > { %v2459_v36 = vpop.f32.mrf.mxu1  ;;  %v2339_v45 = vadd.f32 %v5272_v1, %v2178_v52  ;;  %v8914_v1 = vld [vmem:[#allocation29_spill] sm:$0xff] }
 0x2bb   : > { %v2601_v30 = vmax.f32 %v2571_v58, %v2573_v11  ;;  %v2460_v59 = vadd.f32 %v2459_v36, %v2299_v55  ;;  %v2574_v7 = vmax.f32 %v2468_v42, 0.0  ;;  %v7914_v55 = vpop.f32.mrf.mxu0  ;;  %v6113_v11 = vld [vmem:[%s8771_s5 + $0x8] sm:$0xff]   ;;  %v2170_v36 = vadd.f32 %v5154_v50, %v7620_v2  ;;  %v6115_v52 = vld [vmem:[%s8771_s5 + $0x40] sm:$0xff]   ;;  %5384 = vmatpush3.bf16.msra.mxu1 %v6116_v17  ;;  %v8924_v17 = vld [vmem:[#allocation23_spill] sm:$0xff] }
 0x2bc   : > { %v5655_v16 = vpop.f32.mrf.mxu1  ;;  %5354 = vmatpush3.bf16.msra.mxu0 %v6113_v11 }
 0x2bd   : > { %2617 = vst.msk [vmem:[#allocation3 + $0x10] sm:$0xff] %vm771_vm3, %v2601_v30  ;;  %v2572_v15 = vmax.f32 %v2460_v59, 0.0  ;;  %v2481_v9 = vadd.f32 %v5655_v16, %v2320_v38  ;;  %v5281_v30 = vadd.f32 %v8905_v0, %v7760_v60  ;;  %v8906_v16 = vld [vmem:[#allocation11_spill] sm:$0xff]  ;;  %v2331_v32 = vadd.f32 %v5266_v47, %v2170_v36  ;;  %v8916_v47 = vld [vmem:[#allocation22_spill] sm:$0xff]  ;;  %5355 = vmatprep.subr.bf16.mxu0 %v6115_v52  ;;  %v8923_v52 = vld [vmem:[#allocation24_spill] sm:$0xff] }
 0x2be   : > { %v2472_v18 = vpop.f32.mrf.mxu1 }
 0x2bf   : > { %v2602_v40 = vmax.f32 %v2572_v15, %v2574_v7  ;;  %v2473_v23 = vadd.f32 %v2472_v18, %v2312_v26  ;;  %v2577_v12 = vmax.f32 %v2481_v9, 0.0  ;;  %v2191_v7 = vadd.f32 %v8906_v16, %v7620_v2  ;;  %v8907_v15 = vld [vmem:[#allocation10_spill] sm:$0xff]  ;;  %v8908_v9 = vld [vmem:[#allocation12_spill] sm:$0xff] }
 0x2c0   : > { %v2631_v21 = vld [vmem:[#allocation3] ss:$2 sm:$0xff]  ;;  %v2647_v24 = vld [vmem:[#allocation3 + $0x1] ss:$2 sm:$0xff]  ;;  %v5656_v35 = vpop.f32.mrf.mxu1  ;;  %v5172_v26 = vadd.f32 %v8908_v9, %v8907_v15  ;;  %v8910_v18 = vld [vmem:[#allocation20_spill] sm:$0xff]  ;;  %v2758_v16 = vrot.slane %v7940_v8, 7 }
 0x2c1   : > { %v2662_v4 = vmax.f32 %v2631_v21, %v2647_v24  ;;  %2618 = vst.msk [vmem:[#allocation3 + $0x18] sm:$0xff] %vm771_vm3, %v2602_v40  ;;  %v2575_v34 = vmax.f32 %v2473_v23, 0.0  ;;  %v2484_v39 = vadd.f32 %v5656_v35, %v2323_v46  ;;  %v5275_v29 = vadd.f32 %v8910_v18, %v8909_v56  ;;  %v7929_v40 = vpop.f32.mrf.mxu0  ;;  %v8918_v56 = vld [vmem:[#allocation18_spill] sm:$0xff] }
 0x2c2   : > { %v2475_v61 = vpop.f32.mrf.mxu1  ;;  %v2352_v50 = vadd.f32 %v5281_v30, %v2191_v7  ;;  %v2194_v28 = vadd.f32 %v5172_v26, %v7620_v2  ;;  %v2207_v18 = vadd.f32 %v8918_v56, %v7620_v2 }
 0x2c3   : > { %2701 = vst.msk [vmem:[#allocation4 + $0x20] sm:$0xff] %vm771_vm3, %v2662_v4  ;;  %v2603_v27 = vmax.f32 %v2575_v34, %v2577_v12  ;;  %v2476_v19 = vadd.f32 %v2475_v61, %v2315_v44  ;;  %v2578_v58 = vmax.f32 %v2484_v39, 0.0  ;;  %v8911_v44 = vld [vmem:[#allocation7_spill] sm:$0xff]  ;;  %v8912_v12 = vld [vmem:[#allocation8_spill] sm:$0xff]  ;;  %v8913_v34 = vld [vmem:[#allocation9_spill] sm:$0xff] }
 0x2c4   : > { %v5659_v43 = vpop.f32.mrf.mxu1  ;;  %v2183_v4 = vadd.f32 %v8911_v44, %v7620_v2  ;;  %v5166_v39 = vadd.f32 %v8913_v34, %v8912_v12  ;;  %v6118_v12 = vld [vmem:[%s8771_s5 + $0xe8] sm:$0xff]  }
 0x2c5   : > { %2619 = vst.msk [vmem:[#allocation3 + $0x20] sm:$0xff] %vm771_vm3, %v2603_v27  ;;  %v2576_v42 = vmax.f32 %v2476_v19, 0.0  ;;  %v2497_v22 = vadd.f32 %v5659_v43, %v2336_v13  ;;  %v8915_v27 = vld [vmem:[#allocation30_spill] sm:$0xff]  ;;  %v8917_v43 = vld [vmem:[#allocation27_spill] sm:$0xff]  ;;  %5385 = vmatprep.subr.bf16.mxu1 %v6118_v12 }
 0x2c6   : > { %v2488_v59 = vpop.f32.mrf.mxu1  ;;  %v5284_v19 = vadd.f32 %v8915_v27, %v8914_v1  ;;  %v5278_v11 = vadd.f32 %v8917_v43, %v8916_v47  ;;  %v6119_v34 = vld [vmem:[%s8771_s5 + $0xa8] sm:$0xff]   ;;  %v5296_v27 = vadd.f32 %v7814_v62, %v7810_v37 }
 0x2c7   : > { %v2604_v38 = vmax.f32 %v2576_v42, %v2578_v58  ;;  %v2489_v14 = vadd.f32 %v2488_v59, %v2328_v10  ;;  %v2581_v21 = vmax.f32 %v2497_v22, 0.0  ;;  %v7959_v58 = vpop.f32.mrf.mxu0  ;;  %v2715_v22 = vld [vmem:[#allocation4 + $0x30] sm:$0xff]  ;;  %v6117_v10 = vld [vmem:[%s8771_s5] sm:$0xff]   ;;  %v2344_v59 = vadd.f32 %v5275_v29, %v2183_v4  ;;  %v8919_v29 = vld [vmem:[#allocation32_spill] sm:$0xff]  ;;  %5386 = vmatpush3.bf16.msra.mxu1 %v6119_v34 }
 0x2c8   : > { %v2633_v23 = vld [vmem:[#allocation3 + $0x10] ss:$2 sm:$0xff]  ;;  %v2649_v46 = vld [vmem:[#allocation3 + $0x11] ss:$2 sm:$0xff]  ;;  %v5660_v60 = vpop.f32.mrf.mxu1  ;;  %v2355_v9 = vadd.f32 %v5284_v19, %v2194_v28  ;;  %v2761_v26 = vrot.slane %v2715_v22, 7  ;;  %5356 = vmatpush3.bf16.msra.mxu0 %v6117_v10  ;;  %v5290_v28 = vadd.f32 %v8924_v17, %v8923_v52  ;;  %v8021_v12 = vld [vmem:[#allocation4 + $0x48] sm:$0xff]  ;;  %v5308_v34 = vadd.f32 %v7892_v6, %v7880_v63 }
 0x2c9   : > { %v2663_v48 = vmax.f32 %v2633_v23, %v2649_v46  ;;  %2620 = vst.msk [vmem:[#allocation3 + $0x28] sm:$0xff] %vm771_vm3, %v2604_v38  ;;  %v2579_v24 = vmax.f32 %v2489_v14, 0.0  ;;  %v2500_v35 = vadd.f32 %v5660_v60, %v2339_v45  ;;  %v2186_v38 = vadd.f32 %v5166_v39, %v7620_v2  ;;  %v8920_v23 = vld [vmem:[#allocation25_spill] sm:$0xff]  ;;  %v7974_v60 = vpop.f32.mrf.mxu0  ;;  %v8921_v39 = vld [vmem:[#allocation15_spill] sm:$0xff] }
 0x2ca   : > { %v2491_v41 = vpop.f32.mrf.mxu1  ;;  %v7938_v61 = vld [vmem:[#allocation4 + $0x20] sm:$0xff]  ;;  %v5293_v14 = vadd.f32 %v7804_v57, %v7802_v3  ;;  %v5287_v46 = vadd.f32 %v8920_v23, %v8919_v29  ;;  %v5302_v6 = vadd.f32 %v7842_v25, %v7832_v51 }
 0x2cb   : > { %2702 = vst.msk [vmem:[#allocation4 + $0x38] sm:$0xff] %vm771_vm3, %v2663_v48  ;;  %v2605_v13 = vmax.f32 %v2579_v24, %v2581_v21  ;;  %v2492_v20 = vadd.f32 %v2491_v41, %v2331_v32  ;;  %v5984_v53 = vpack.i.bf16 %v7938_v61, %v7931_v5  ;;  %v2582_v36 = vmax.f32 %v2500_v35, 0.0  ;;  %v5315_v47 = vpop.f32.mrf.mxu0 }
 0x2cc   : > { %v5663_v42 = vpop.f32.mrf.mxu1  ;;  %v2347_v48 = vadd.f32 %v5278_v11, %v2186_v38  ;;  %v2759_v21 = vrot.slane %v7938_v61, 7  ;;  %v2199_v41 = vadd.f32 %v8921_v39, %v7620_v2  ;;  %v2368_v8 = vadd.f32 %v5293_v14, %v2207_v18 }
 0x2cd   : > { %2621 = vst.msk [vmem:[#allocation3 + $0x30] sm:$0xff] %vm771_vm3, %v2605_v13  ;;  %v2580_v0 = vmax.f32 %v2492_v20, 0.0  ;;  %v2513_v30 = vadd.f32 %v5663_v42, %v2352_v50  ;;  %5985 = vrot.lane.b32.xlu1 %v5984_v53, %s6270_s20  ;;  %v8922_v53 = vld [vmem:[#allocation21_spill] sm:$0xff]  ;;  %v5316_v56 = vpop.f32.mrf.mxu0 }
 0x2ce   : > { %v2504_v45 = vpop.f32.mrf.mxu1  ;;  %v2210_v33 = vadd.f32 %v8922_v53, %v7620_v2  ;;  %v2360_v11 = vadd.f32 %v5287_v46, %v2199_v41  ;;  %v7997_v42 = vsel %vm997_vm4, %v2758_v16, %v2759_v21  ;;  %v8929_v21 = vld [vmem:[#allocation37_spill] sm:$0xff] }
 0x2cf   : > { %v2606_v7 = vmax.f32 %v2580_v0, %v2582_v36  ;;  %v2505_v15 = vadd.f32 %v2504_v45, %v2344_v59  ;;  %v2585_v35 = vmax.f32 %v2513_v30, 0.0  ;;  %v8925_v36 = vld [vmem:[#allocation16_spill] sm:$0xff]  ;;  %v5305_v30 = vadd.f32 %v7866_v54, %v7856_v49 }
 0x2d0   : > { %v2635_v32 = vld [vmem:[#allocation3 + $0x20] ss:$2 sm:$0xff]  ;;  %v2651_v3 = vld [vmem:[#allocation3 + $0x21] ss:$2 sm:$0xff]  ;;  %v5664_v57 = vpop.f32.mrf.mxu1  ;;  %v2202_v0 = vadd.f32 %v8925_v36, %v7620_v2  ;;  %v2371_v16 = vadd.f32 %v5296_v27, %v2210_v33 }
 0x2d1   : > { %v2664_v24 = vmax.f32 %v2635_v32, %v2651_v3  ;;  %2622 = vst.msk [vmem:[#allocation3 + $0x38] sm:$0xff] %vm771_vm3, %v2606_v7  ;;  %v2583_v44 = vmax.f32 %v2505_v15, 0.0  ;;  %v2516_v4 = vadd.f32 %v5664_v57, %v2355_v9  ;;  %v8926_v7 = vld [vmem:[#allocation31_spill] sm:$0xff]  ;;  %v8927_v9 = vld [vmem:[#allocation40_spill] sm:$0xff]  ;;  %v6120_v27 = vld [vmem:[%s8771_s5 + $0xe0] sm:$0xff]  }
 0x2d2   : > { %v2507_v50 = vpop.f32.mrf.mxu1  ;;  %v7986_v1 = vld [vmem:[#allocation4 + $0x38] sm:$0xff]  ;;  %v2223_v15 = vadd.f32 %v8926_v7, %v7620_v2  ;;  %v2363_v49 = vadd.f32 %v5290_v28, %v2202_v0  ;;  %5387 = vmatprep.subr.bf16.mxu1 %v6120_v27 }
 0x2d3   : > { %2703 = vst.msk [vmem:[#allocation4 + $0x50] sm:$0xff] %vm771_vm3, %v2664_v24  ;;  %v2607_v19 = vmax.f32 %v2583_v44, %v2585_v35  ;;  %v2508_v13 = vadd.f32 %v2507_v50, %v2347_v48  ;;  %v2762_v20 = vrot.slane %v7986_v1, 7  ;;  %v2586_v37 = vmax.f32 %v2516_v4, 0.0  ;;  %v8928_v57 = vld [vmem:[#allocation28_spill] sm:$0xff]  ;;  %v8930_v24 = vld [vmem:[#allocation38_spill] sm:$0xff] }
 0x2d4   : > { %v5667_v43 = vpop.f32.mrf.mxu1  ;;  %v2215_v48 = vadd.f32 %v8928_v57, %v7620_v2  ;;  %v5205_v35 = vadd.f32 %v8930_v24, %v8929_v21  ;;  %v2384_v44 = vadd.f32 %v5305_v30, %v2223_v15 }
 0x2d5   : > { %2623 = vst.msk [vmem:[#allocation3 + $0x40] sm:$0xff] %vm771_vm3, %v2607_v19  ;;  %v2584_v62 = vmax.f32 %v2508_v13, 0.0  ;;  %v2529_v22 = vadd.f32 %v5667_v43, %v2368_v8  ;;  %v8001_v10 = vsel %vm997_vm4, %v2761_v26, %v2762_v20  ;;  %v5299_v26 = vadd.f32 %v7828_v31, %v8927_v9  ;;  %v8028_v8 = vld [vmem:[#allocation4 + $0x60] sm:$0xff]  ;;  %v8931_v13 = vld [vmem:[#allocation26_spill] sm:$0xff]  ;;  %v5318_v20 = vpop.f32.mrf.mxu0 }
 0x2d6   : > { %v2520_v59 = vpop.f32.mrf.mxu1  ;;  %v5979_v38 = vpack.i.bf16 %v8001_v10, %v7997_v42  ;;  %v6121_v19 = vld [vmem:[%s8771_s5 + $0xa0] sm:$0xff]   ;;  %v2226_v63 = vadd.f32 %v8931_v13, %v7620_v2  ;;  %v8932_v43 = vld [vmem:[#allocation34_spill] sm:$0xff]  ;;  %v2767_v51 = vrot.slane %v8028_v8, 7  ;;  %v2239_v25 = vadd.f32 %v5205_v35, %v7620_v2 }
 0x2d7   : > { %v2608_v14 = vmax.f32 %v2584_v62, %v2586_v37  ;;  %v2521_v45 = vadd.f32 %v2520_v59, %v2360_v11  ;;  %v2589_v46 = vmax.f32 %v2529_v22, 0.0  ;;  %v2376_v28 = vadd.f32 %v5299_v26, %v2215_v48  ;;  %5388 = vmatpush3.bf16.msra.mxu1 %v6121_v19  ;;  %v8933_v59 = vld [vmem:[#allocation39_spill] sm:$0xff]  ;;  %v8936_v19 = vld [vmem:[#allocation36_spill] sm:$0xff] }
 0x2d8   : > { %v2637_v18 = vld [vmem:[#allocation3 + $0x30] ss:$2 sm:$0xff]  ;;  %v2653_v29 = vld [vmem:[#allocation3 + $0x31] ss:$2 sm:$0xff]  ;;  %v5668_v23 = vpop.f32.mrf.mxu1  ;;  %5980 = vrot.lane.b32.xlu0 %v5979_v38, %s6270_s20  ;;  %v2218_v11 = vadd.f32 %v8932_v43, %v7620_v2  ;;  %v5317_v37 = vadd.f32 %v5316_v56, %v5315_v47  ;;  %v2764_v22 = vrot.slane %v8021_v12, 7  ;;  %v2387_v30 = vadd.f32 %v5308_v34, %v2226_v63  ;;  %v8934_v38 = vld [vmem:[#allocation41_spill] sm:$0xff] }
 0x2d9   : > { %v2665_v54 = vmax.f32 %v2637_v18, %v2653_v29  ;;  %2624 = vst.msk [vmem:[#allocation3 + $0x48] sm:$0xff] %vm771_vm3, %v2608_v14  ;;  %v2587_v32 = vmax.f32 %v2521_v45, 0.0  ;;  %v2532_v3 = vadd.f32 %v5668_v23, %v2371_v16  ;;  %v5208_v14 = vadd.f32 %v8934_v38, %v8933_v59  ;;  %v5319_v16 = vpop.f32.mrf.mxu0  ;;  %v2724_v38 = vld [vmem:[#allocation4 + $0x78] sm:$0xff] }
 0x2da   : > { %v2523_v31 = vpop.f32.mrf.mxu1  ;;  %v8019_v4 = vld [vmem:[#allocation4 + $0x50] sm:$0xff]  ;;  %v5311_v45 = vadd.f32 %v7929_v40, %v7914_v55  ;;  %v2379_v9 = vadd.f32 %v5302_v6, %v2218_v11  ;;  %v6123_v55 = vld [vmem:[%s8771_s5 + $0x98] sm:$0xff]   ;;  %v5320_v48 = vadd.f32 %v5319_v16, %v5318_v20  ;;  %v2234_v13 = vadd.f32 %v8936_v19, %v7620_v2 }
 0x2db   : > { %2704 = vst.msk [vmem:[#allocation4 + $0x68] sm:$0xff] %vm771_vm3, %v2665_v54  ;;  %v2609_v39 = vmax.f32 %v2587_v32, %v2589_v46  ;;  %v2524_v41 = vadd.f32 %v2523_v31, %v2363_v49  ;;  %v5994_v50 = vpack.i.bf16 %v8019_v4, %v7986_v1  ;;  %v2590_v33 = vmax.f32 %v2532_v3, 0.0  ;;  %v6122_v49 = vld [vmem:[%s8771_s5 + $0xd8] sm:$0xff]   ;;  %v8935_v54 = vld [vmem:[#allocation35_spill] sm:$0xff] }
 0x2dc   : > { %v5671_v53 = vpop.f32.mrf.mxu1  ;;  %v2765_v26 = vrot.slane %v8019_v4, 7  ;;  %v8062_v40 = vld [vmem:[%s8771_s5 + $0x118] sm:$0xff]   ;;  %v2231_v46 = vadd.f32 %v8935_v54, %v7620_v2  ;;  %v2400_v3 = vadd.f32 %v5317_v37, %v2239_v25  ;;  %5389 = vmatprep.subr.bf16.mxu1 %v6122_v49  ;;  %v2242_v31 = vadd.f32 %v5208_v14, %v7620_v2  ;;  %v2727_v14 = vld [vmem:[#allocation4 + $0x90] sm:$0xff] }
 0x2dd   : > { %2625 = vst.msk [vmem:[#allocation3 + $0x50] sm:$0xff] %vm771_vm3, %v2609_v39  ;;  %v2588_v52 = vmax.f32 %v2524_v41, 0.0  ;;  %v2545_v17 = vadd.f32 %v5671_v53, %v2384_v44  ;;  %5995 = vrot.lane.b32.xlu1 %v5994_v50, %s6270_s20  ;;  %5677 = vmatprep.subr.bf16.mxu0 %v8062_v40  ;;  %v5314_v44 = vadd.f32 %v7974_v60, %v7959_v58  ;;  %v2723_v54 = vld [vmem:[#allocation4 + $0x70] sm:$0xff] }
 0x2de   : > { %v2536_v62 = vpop.f32.mrf.mxu1  ;;  %v2392_v34 = vadd.f32 %v5311_v45, %v2231_v46  ;;  %v8075_v39 = vsel %vm997_vm4, %v2764_v22, %v2765_v26  ;;  %5390 = vmatpush3.bf16.msra.mxu1 %v6123_v55  ;;  %v2403_v20 = vadd.f32 %v5320_v48, %v2242_v31  ;;  %v2773_v26 = vrot.slane %v2727_v14, 7 }
 0x2df   : > { %v2610_v36 = vmax.f32 %v2588_v52, %v2590_v33  ;;  %v2537_v0 = vadd.f32 %v2536_v62, %v2376_v28  ;;  %v2593_v18 = vmax.f32 %v2545_v17, 0.0  ;;  %v2395_v17 = vadd.f32 %v5314_v44, %v2234_v13  ;;  %v2730_v13 = vld [vmem:[#allocation4 + $0xa8] sm:$0xff] }
 0x2e0   : > { %v2639_v7 = vld [vmem:[#allocation3 + $0x40] ss:$2 sm:$0xff]  ;;  %v2655_v47 = vld [vmem:[#allocation3 + $0x41] ss:$2 sm:$0xff]  ;;  %v5672_v15 = vpop.f32.mrf.mxu1  ;;  %v2804_v44 = vrot.slane %v8019_v4, 1 }
 0x2e1   : > { %v2666_v56 = vmax.f32 %v2639_v7, %v2655_v47  ;;  %2626 = vst.msk [vmem:[#allocation3 + $0x58] sm:$0xff] %vm771_vm3, %v2610_v36  ;;  %v2591_v29 = vmax.f32 %v2537_v0, 0.0  ;;  %v2548_v23 = vadd.f32 %v5672_v15, %v2387_v30  ;;  %v6125_v36 = vld [vmem:[%s8771_s5 + $0xd0] sm:$0xff]   ;;  %v2770_v15 = vrot.slane %v2724_v38, 7 }
 0x2e2   : > { %v2539_v32 = vpop.f32.mrf.mxu1  ;;  %v8066_v57 = vld [vmem:[#allocation4 + $0x68] sm:$0xff]  ;;  %v6126_v0 = vld [vmem:[%s8771_s5 + $0x90] sm:$0xff]   ;;  %5391 = vmatprep.subr.bf16.mxu1 %v6125_v36 }
 0x2e3   : > { %2705 = vst.msk [vmem:[#allocation4 + $0x80] sm:$0xff] %vm771_vm3, %v2666_v56  ;;  %v2611_v21 = vmax.f32 %v2591_v29, %v2593_v18  ;;  %v2540_v24 = vadd.f32 %v2539_v32, %v2379_v9  ;;  %v2768_v35 = vrot.slane %v8066_v57, 7  ;;  %v2594_v41 = vmax.f32 %v2548_v23, 0.0  ;;  %5392 = vmatpush3.bf16.msra.mxu1 %v6126_v0  ;;  %v6128_v29 = vld [vmem:[%s8771_s5 + $0xc8] sm:$0xff]   ;;  %v2720_v32 = vld [vmem:[#allocation4 + $0x58] sm:$0xff] }
 0x2e4   : > { %v5675_v12 = vpop.f32.mrf.mxu1  ;;  %v6129_v23 = vld [vmem:[%s8771_s5 + $0x88] sm:$0xff]   ;;  %5393 = vmatprep.subr.bf16.mxu1 %v6128_v29 }
 0x2e5   : > { %2627 = vst.msk [vmem:[#allocation3 + $0x60] sm:$0xff] %vm771_vm3, %v2611_v21  ;;  %v2592_v50 = vmax.f32 %v2540_v24, 0.0  ;;  %v2561_v8 = vadd.f32 %v5675_v12, %v2400_v3  ;;  %v8079_v27 = vsel %vm997_vm4, %v2767_v51, %v2768_v35  ;;  %v2807_v21 = vrot.slane %v8066_v57, 1 }
 0x2e6   : > { %v2552_v63 = vpop.f32.mrf.mxu1  ;;  %v5989_v58 = vpack.i.bf16 %v8079_v27, %v8075_v39  ;;  %v2808_v24 = vrot.slane %v2723_v54, 1  ;;  %v2805_v12 = vrot.slane %v2720_v32, 1 }
 0x2e7   : > { %v2612_v60 = vmax.f32 %v2592_v50, %v2594_v41  ;;  %v2553_v6 = vadd.f32 %v2552_v63, %v2392_v34  ;;  %v2597_v43 = vmax.f32 %v2561_v8, 0.0  ;;  %5394 = vmatpush3.bf16.msra.mxu1 %v6129_v23  ;;  %v6131_v41 = vld [vmem:[%s8771_s5 + $0xc0] sm:$0xff]  }
 0x2e8   : > { %v2641_v53 = vld [vmem:[#allocation3 + $0x50] ss:$2 sm:$0xff]  ;;  %v2657_v33 = vld [vmem:[#allocation3 + $0x51] ss:$2 sm:$0xff]  ;;  %v5676_v52 = vpop.f32.mrf.mxu1  ;;  %5990 = vrot.lane.b32.xlu0 %v5989_v58, %s6270_s20  ;;  %v6132_v50 = vld [vmem:[%s8771_s5 + $0x80] sm:$0xff]   ;;  %v8135_v8 = vsel %vm1126_vm5, %v2807_v21, %v2808_v24  ;;  %5395 = vmatprep.subr.bf16.mxu1 %v6131_v41  ;;  %v8139_v19 = vsel %vm1126_vm5, %v2804_v44, %v2805_v12  ;;  %v2756_v44 = vrot.slane %v7931_v5, 7 }
 0x2e9   : > { %v2667_v28 = vmax.f32 %v2641_v53, %v2657_v33  ;;  %2628 = vst.msk [vmem:[#allocation3 + $0x68] sm:$0xff] %vm771_vm3, %v2612_v60  ;;  %v2595_v11 = vmax.f32 %v2553_v6, 0.0  ;;  %v2564_v37 = vadd.f32 %v5676_v52, %v2403_v20  ;;  %v2733_v63 = vld [vmem:[#allocation4 + $0xc0] sm:$0xff]  ;;  %v6024_v58 = vpack.i.bf16 %v8135_v8, %v8139_v19 }
 0x2ea   : > { %v2555_v2 = vpop.f32.mrf.mxu1  ;;  %v8087_v62 = vld [vmem:[#allocation4 + $0x80] sm:$0xff]  ;;  %v2776_v20 = vrot.slane %v2730_v13, 7  ;;  %v2829_v33 = vrot.slane %v2733_v63, 7  ;;  %v2795_v41 = vrot.slane %v7931_v5, 1 }
 0x2eb   : > { %2706 = vst.msk [vmem:[#allocation4 + $0x98] sm:$0xff] %vm771_vm3, %v2667_v28  ;;  %v2613_v22 = vmax.f32 %v2595_v11, %v2597_v43  ;;  %v2556_v51 = vadd.f32 %v2555_v2, %v2395_v17  ;;  %v6004_v25 = vpack.i.bf16 %v8087_v62, %v8066_v57  ;;  %v2598_v30 = vmax.f32 %v2564_v37, 0.0  ;;  %5396 = vmatpush3.bf16.msra.mxu1 %v6132_v50  ;;  %v8143_v60 = vld [vmem:[#allocation4 + $0xe0] sm:$0xff]  ;;  %v2714_v17 = vld [vmem:[#allocation4 + $0x28] sm:$0xff] }
 0x2ec   : > { %v2771_v9 = vrot.slane %v8087_v62, 7  ;;  %v2717_v6 = vld [vmem:[#allocation4 + $0x40] sm:$0xff]  ;;  %v2801_v11 = vrot.slane %v7986_v1, 1  ;;  %v2799_v36 = vrot.slane %v2714_v17, 1 }
 0x2ed   : > { %2629 = vst.msk [vmem:[#allocation3 + $0x70] sm:$0xff] %vm771_vm3, %v2613_v22  ;;  %v2596_v59 = vmax.f32 %v2556_v51, 0.0  ;;  %6005 = vrot.lane.b32.xlu1 %v6004_v25, %s6270_s20  ;;  %v2802_v37 = vrot.slane %v2717_v6, 1  ;;  %v2729_v2 = vld [vmem:[#allocation4 + $0xa0] sm:$0xff]  ;;  %v2798_v25 = vrot.slane %v7938_v61, 1 }
 0x2ee   : > { %v8113_v49 = vsel %vm997_vm4, %v2770_v15, %v2771_v9  ;;  %v2814_v14 = vrot.slane %v2729_v2, 1  ;;  %v2732_v9 = vld [vmem:[#allocation4 + $0xb8] sm:$0xff]  ;;  %v2709_v24 = vld [vmem:[#allocation4] sm:$0xff] }
 0x2ef   : > { %v2614_v45 = vmax.f32 %v2596_v59, %v2598_v30  ;;  %v2726_v30 = vld [vmem:[#allocation4 + $0x88] sm:$0xff]  ;;  %v8164_v59 = vsel %vm1126_vm5, %v2801_v11, %v2802_v37  ;;  %v2755_v12 = vrot.slane %v2709_v24, 7 }
 0x2f0   : > { %v2643_v16 = vld [vmem:[#allocation3 + $0x60] ss:$2 sm:$0xff]  ;;  %v2659_v7 = vld [vmem:[#allocation3 + $0x61] ss:$2 sm:$0xff] }
 0x2f1   : > { %v2668_v47 = vmax.f32 %v2643_v16, %v2659_v7  ;;  %2630 = vst.msk [vmem:[#allocation3 + $0x78] sm:$0xff] %vm771_vm3, %v2614_v45  ;;  %v2735_v45 = vld [vmem:[#allocation4 + $0xd0] sm:$0xff]  ;;  %v2800_v16 = vsel %vm1126_vm5, %v2798_v25, %v2799_v36  ;;  %v2810_v7 = vrot.slane %v8087_v62, 1 }
 0x2f2   : > { %v8102_v56 = vld [vmem:[#allocation4 + $0x98] sm:$0xff]  ;;  %v6019_v15 = vpack.i.bf16 %v8164_v59, %v2800_v16  ;;  %v2834_v29 = vrot.slane %v2735_v45, 1  ;;  %v6127_v25 = vld [vmem:[%s8771_s5 + $0x110] sm:$0xff]   ;;  %v6133_v45 = vld [vmem:[%s8771_s5 + $0x100] sm:$0xff]  }
 0x2f3   : > { %2707 = vst.msk [vmem:[#allocation4 + $0xb0] sm:$0xff] %vm771_vm3, %v2668_v47  ;;  %v2774_v18 = vrot.slane %v8102_v56, 7  ;;  %v2813_v38 = vrot.slane %v8102_v56, 1  ;;  %v2811_v47 = vrot.slane %v2726_v30, 1 }
 0x2f5   : > { %v8116_v55 = vsel %vm997_vm4, %v2773_v26, %v2774_v18  ;;  %v8172_v26 = vsel %vm1126_vm5, %v2813_v38, %v2814_v14  ;;  %v8177_v23 = vsel %vm1126_vm5, %v2810_v7, %v2811_v47  ;;  %v6130_v14 = vld [vmem:[%s8771_s5 + $0x108] sm:$0xff]  }
 0x2f6   : > { %v5999_v46 = vpack.i.bf16 %v8116_v55, %v8113_v49  ;;  %v6029_v32 = vpack.i.bf16 %v8172_v26, %v8177_v23 }
 0x2f8   : > { %v2645_v3 = vld [vmem:[#allocation3 + $0x70] ss:$2 sm:$0xff]  ;;  %v2661_v48 = vld [vmem:[#allocation3 + $0x71] ss:$2 sm:$0xff]  ;;  %6000 = vrot.lane.b32.xlu0 %v5999_v46, %s6270_s20  ;;  %v2817_v46 = vrot.slane %v2732_v9, 1 }
 0x2f9   : > { %v2669_v35 = vmax.f32 %v2645_v3, %v2661_v48 }
 0x2fa   : > { %v8122_v31 = vld [vmem:[#allocation4 + $0xb0] sm:$0xff] }
 0x2fb   : > { %2708 = vst.msk [vmem:[#allocation4 + $0xc8] sm:$0xff] %vm771_vm3, %v2669_v35  ;;  %v6014_v34 = vpack.i.bf16 %v8122_v31, %v8102_v56  ;;  %v2777_v53 = vrot.slane %v8122_v31, 7  ;;  %v2816_v54 = vrot.slane %v8122_v31, 1  ;;  %v2711_v35 = vld [vmem:[#allocation4 + $0x10] sm:$0xff] }
 0x2fc   : > { %v2796_v50 = vrot.slane %v2711_v35, 1 }
 0x2fd   : > { %6015 = vrot.lane.b32.xlu1 %v6014_v34, %s6270_s20  ;;  %v8155_v22 = vsel %vm997_vm4, %v2776_v20, %v2777_v53  ;;  %v8187_v48 = vsel %vm1126_vm5, %v2816_v54, %v2817_v46 }
 0x2fe   : > { %v2797_v20 = vsel %vm1126_vm5, %v2795_v41, %v2796_v50 }
 0x301   : > { %6025 = vrot.lane.b32.xlu1 %v6024_v58, %s6270_s20  ;;  %v2757_v58 = vsel %vm997_vm4, %v2755_v12, %v2756_v44 }
 0x302   : > { %v8147_v52 = vld [vmem:[#allocation4 + $0xc8] sm:$0xff] }
 0x303   : > { %v6034_v28 = vpack.i.bf16 %v8143_v60, %v8147_v52  ;;  %v2830_v43 = vrot.slane %v8147_v52, 7  ;;  %v2833_v18 = vrot.slane %v8147_v52, 1 }
 0x305   : > { %6035 = vrot.lane.b32.xlu1 %v6034_v28, %s6270_s20  ;;  %v8158_v51 = vsel %vm997_vm4, %v2829_v33, %v2830_v43  ;;  %v8183_v3 = vsel %vm1126_vm5, %v2833_v18, %v2834_v29 }
 0x306   : > { %v6009_v0 = vpack.i.bf16 %v8158_v51, %v8155_v22  ;;  %v6039_v21 = vpack.i.bf16 %v8183_v3, %v8187_v48 }
 0x308   : > { %6010 = vrot.lane.b32.xlu0 %v6009_v0, %s6270_s20 }
 0x30c   : > { %6020 = vrot.lane.b32.xlu0 %v6019_v15, %s6270_s20 }
 0x310   : > { %6030 = vrot.lane.b32.xlu0 %v6029_v32, %s6270_s20 }
 0x314   : > { %6040 = vrot.lane.b32.xlu0 %v6039_v21, %s6270_s20 }
 0x33f   : > { %v5986_v34 = vpop.permute.xlu1 %5985 }
 0x340   : > { %v5988_v13 = vunpack.i.h.bf16 %v5986_v34  ;;  %v5987_v63 = vunpack.i.l.bf16 %v5986_v34 }
 0x342   : > { %v2927_v17 = vsel %vm771_vm3, %v2757_v58, %v5987_v63  ;;  %v2928_v28 = vsel %vm771_vm3, %v7997_v42, %v5988_v13 }
 0x343   : > { %v2953_v37 = vpack.c.bf16 %v2928_v28, %v2927_v17 }
 0x34a   : > { %v5981_v6 = vpop.permute.xlu0 %5980 }
 0x34b   : > { %v5983_v53 = vunpack.i.h.bf16 %v5981_v6  ;;  %v5982_v33 = vunpack.i.l.bf16 %v5981_v6 }
 0x34d   : > { %v2935_v43 = vsel %vm771_vm3, %v2797_v20, %v5982_v33  ;;  %v2936_v11 = vsel %vm771_vm3, %v2800_v16, %v5983_v53 }
 0x34e   : > { %v2954_v5 = vpack.c.bf16 %v2936_v11, %v2935_v43 }
 0x34f   : > { %v5996_v2 = vpop.permute.xlu1 %5995 }
 0x350   : > { %v5998_v36 = vunpack.i.h.bf16 %v5996_v2  ;;  %v5997_v0 = vunpack.i.l.bf16 %v5996_v2  ;;  %3309 = vmatprep.mubr.bf16.mxu0 %v2954_v5  ;;  %v2957_v5 = vpack.c.bf16 %v8139_v19, %v8164_v59 }
 0x351   : > { %3310 = vmatmul.mubr.bf16.vlgmr.msra.gmra.mxu0 %v2953_v37 }
 0x352   : > { %v2929_v30 = vsel %vm771_vm3, %v8001_v10, %v5997_v0  ;;  %v2930_v42 = vsel %vm771_vm3, %v8075_v39, %v5998_v36  ;;  %5678 = vmatpush3.bf16.msra.mxu0 %v8062_v40  ;;  %v2738_v36 = vld [vmem:[#allocation4 + $0xe8] sm:$0xff]  ;;  %v2736_v0 = vld [vmem:[#allocation4 + $0xd8] sm:$0xff] }
 0x353   : > { %v2956_v38 = vpack.c.bf16 %v2930_v42, %v2929_v30  ;;  %5679 = vmatprep.subr.bf16.mxu0 %v6127_v25  ;;  %v2961_v30 = vpack.c.bf16 %v8177_v23, %v8135_v8 }
 0x355   : > { %3374 = vmatprep.mubr.bf16.mxu1 %v2956_v38 }
 0x356   : > { %5680 = vmatpush3.bf16.msra.mxu0 %v6127_v25 }
 0x357   : > { %5681 = vmatprep.subr.bf16.mxu0 %v6130_v14 }
 0x35a   : > { %v5991_v16 = vpop.permute.xlu0 %5990  ;;  %5682 = vmatpush3.bf16.msra.mxu0 %v6130_v14  ;;  %v2839_v14 = vrot.slane %v8143_v60, 7 }
 0x35b   : > { %v5993_v10 = vunpack.i.h.bf16 %v5991_v16  ;;  %v5992_v7 = vunpack.i.l.bf16 %v5991_v16  ;;  %5683 = vmatprep.subr.bf16.mxu0 %v6133_v45  ;;  %v2838_v16 = vrot.slane %v2736_v0, 7  ;;  %v6170_v0 = vld [vmem:[%s8773_s7 + $0x1f8] sm:$0xff]  }
 0x35d   : > { %v2937_v40 = vsel %vm771_vm3, %v8164_v59, %v5992_v7  ;;  %v2938_v39 = vsel %vm771_vm3, %v8139_v19, %v5993_v10  ;;  %v2845_v59 = vrot.slane %v2738_v36, 1  ;;  %v6167_v36 = vld [vmem:[%s8773_s7 + $0x80] sm:$0xff]  }
 0x35e   : > { %v2958_v47 = vpack.c.bf16 %v2938_v39, %v2937_v40  ;;  %5684 = vmatpush3.bf16.msra.mxu0 %v6133_v45  ;;  %v2840_v40 = vsel %vm997_vm4, %v2838_v16, %v2839_v14 }
 0x35f   : > { %v6006_v15 = vpop.permute.xlu1 %6005 }
 0x360   : > { %3317 = vmatprep.mubr.bf16.mxu0 %v2958_v47  ;;  %v6008_v9 = vunpack.i.h.bf16 %v6006_v15  ;;  %v6007_v18 = vunpack.i.l.bf16 %v6006_v15 }
 0x361   : > { %3318 = vmatmul.mubr.bf16.gmra.mxu0 %v2956_v38  ;;  %v2965_v38 = vpack.c.bf16 %v8187_v48, %v8172_v26 }
 0x362   : > { %v2931_v32 = vsel %vm771_vm3, %v8079_v27, %v6007_v18  ;;  %v2932_v21 = vsel %vm771_vm3, %v8113_v49, %v6008_v9 }
 0x363   : > { %v2960_v12 = vpack.c.bf16 %v2932_v21, %v2931_v32  ;;  %v6136_v32 = vld [vmem:[%s8773_s7 + $0x70] sm:$0xff]   ;;  %v6139_v21 = vld [vmem:[%s8773_s7 + $0xb8] sm:$0xff]  }
 0x36a   : > { %v6001_v29 = vpop.permute.xlu0 %6000 }
 0x36b   : > { %v6003_v54 = vunpack.i.h.bf16 %v6001_v29  ;;  %v6002_v46 = vunpack.i.l.bf16 %v6001_v29 }
 0x36d   : > { %v2939_v24 = vsel %vm771_vm3, %v8135_v8, %v6002_v46  ;;  %v2940_v35 = vsel %vm771_vm3, %v8177_v23, %v6003_v54  ;;  %v6135_v46 = vld [vmem:[%s8773_s7 + $0x38] sm:$0xff]  }
 0x36e   : > { %v2962_v44 = vpack.c.bf16 %v2940_v35, %v2939_v24  ;;  %v6140_v24 = vld [vmem:[%s8773_s7 + $0x68] sm:$0xff]   ;;  %v6142_v35 = vld [vmem:[%s8773_s7 + $0xf0] sm:$0xff]  }
 0x36f   : > { %v6016_v34 = vpop.permute.xlu1 %6015 }
 0x370   : > { %3325 = vmatprep.mubr.bf16.mxu0 %v2962_v44  ;;  %v6018_v41 = vunpack.i.h.bf16 %v6016_v34  ;;  %v6017_v50 = vunpack.i.l.bf16 %v6016_v34  ;;  %v6141_v44 = vld [vmem:[%s8773_s7 + $0x28] sm:$0xff]   ;;  %v6144_v34 = vld [vmem:[%s8773_s7 + $0x60] sm:$0xff]  }
 0x371   : > { %3326 = vmatmul.mubr.bf16.gmra.mxu0 %v2960_v12 }
 0x372   : > { %v2933_v27 = vsel %vm771_vm3, %v8116_v55, %v6017_v50  ;;  %v2934_v49 = vsel %vm771_vm3, %v8155_v22, %v6018_v41  ;;  %v6145_v41 = vld [vmem:[%s8773_s7 + $0x20] sm:$0xff]   ;;  %v6146_v50 = vld [vmem:[%s8773_s7 + $0xe8] sm:$0xff]  }
 0x373   : > { %v2964_v43 = vpack.c.bf16 %v2934_v49, %v2933_v27  ;;  %v6026_v11 = vpop.permute.xlu1 %6025  ;;  %v6150_v27 = vld [vmem:[%s8773_s7 + $0xe0] sm:$0xff]  }
 0x374   : > { %v6028_v2 = vunpack.i.h.bf16 %v6026_v11  ;;  %v6027_v25 = vunpack.i.l.bf16 %v6026_v11  ;;  %v6151_v49 = vld [vmem:[%s8773_s7 + $0xa0] sm:$0xff]   ;;  %v6159_v11 = vld [vmem:[%s8773_s7 + $0x90] sm:$0xff]  }
 0x376   : > { %v2945_v19 = vsel %vm771_vm3, %v8019_v4, %v6027_v25  ;;  %v6166_v25 = vld [vmem:[%s8773_s7 + $0xc0] sm:$0xff]  }
 0x377   : > { %v6036_v45 = vpop.permute.xlu1 %6035 }
 0x378   : > { %v6038_v10 = vunpack.i.h.bf16 %v6036_v45  ;;  %v6037_v7 = vunpack.i.l.bf16 %v6036_v45 }
 0x37a   : > { %v6011_v13 = vpop.permute.xlu0 %6010  ;;  %v2951_v47 = vsel %vm771_vm3, %v8158_v51, %v6037_v7  ;;  %v2952_v15 = vsel %vm771_vm3, %v2840_v40, %v6038_v10  ;;  %v6134_v51 = vld [vmem:[%s8773_s7 + $0x78] sm:$0xff]   ;;  %v8378_v7 = vld [vmem:[%s8772_s6] ss:$0 sm:$0xff] }
 0x37b   : > { %v6013_v63 = vunpack.i.h.bf16 %v6011_v13  ;;  %v6012_v58 = vunpack.i.l.bf16 %v6011_v13  ;;  %v2968_v54 = vpack.c.bf16 %v2952_v15, %v2951_v47  ;;  %5429 = vmatprep.subr.bf16.mxu1 %v6134_v51  ;;  %v6147_v13 = vld [vmem:[%s8773_s7 + $0xa8] sm:$0xff]  }
 0x37d   : > { %v2941_v6 = vsel %vm771_vm3, %v8172_v26, %v6012_v58  ;;  %v2942_v20 = vsel %vm771_vm3, %v8187_v48, %v6013_v63  ;;  %v6148_v63 = vld [vmem:[%s8773_s7 + $0x58] sm:$0xff]  }
 0x37e   : > { %v6021_v53 = vpop.permute.xlu0 %6020  ;;  %v2966_v33 = vpack.c.bf16 %v2942_v20, %v2941_v6  ;;  %v6149_v58 = vld [vmem:[%s8773_s7 + $0x18] sm:$0xff]   ;;  %v6152_v6 = vld [vmem:[%s8773_s7 + $0x50] sm:$0xff]  }
 0x37f   : > { %v6023_v17 = vunpack.i.h.bf16 %v6021_v53  ;;  %v6022_v28 = vunpack.i.l.bf16 %v6021_v53  ;;  %v6153_v20 = vld [vmem:[%s8773_s7 + $0x10] sm:$0xff]   ;;  %v6154_v53 = vld [vmem:[%s8773_s7 + $0xd8] sm:$0xff]  }
 0x380   : > { %3333 = vmatprep.mubr.bf16.mxu0 %v2966_v33  ;;  %v6155_v33 = vld [vmem:[%s8773_s7 + $0x98] sm:$0xff]  }
 0x381   : > { %v2944_v55 = vsel %vm771_vm3, %v7986_v1, %v6023_v17  ;;  %v2943_v22 = vsel %vm771_vm3, %v7938_v61, %v6022_v28  ;;  %3334 = vmatmul.mubr.bf16.gmra.mxu0 %v2964_v43  ;;  %v2946_v1 = vsel %vm771_vm3, %v8066_v57, %v6028_v2  ;;  %v2844_v61 = vrot.slane %v8143_v60, 1  ;;  %v6156_v17 = vld [vmem:[%s8773_s7 + $0x48] sm:$0xff]   ;;  %v6164_v2 = vld [vmem:[%s8773_s7 + $0x178] sm:$0xff]  }
 0x382   : > { %v2955_v37 = vpack.c.bf16 %v2944_v55, %v2943_v22  ;;  %5685 = vmatprep.mubr.msk.bf16.mxu0 %vm771_vm3, %v2957_v5  ;;  %v6031_v42 = vpop.permute.xlu0 %6030  ;;  %v2959_v8 = vpack.c.bf16 %v2946_v1, %v2945_v19  ;;  %v6157_v28 = vld [vmem:[%s8773_s7 + $0x8] sm:$0xff]   ;;  %v6160_v5 = vld [vmem:[%s8773_s7 + $0x40] sm:$0xff]  }
 0x383   : > { %v6033_v4 = vunpack.i.h.bf16 %v6031_v42  ;;  %v6032_v23 = vunpack.i.l.bf16 %v6031_v42  ;;  %v2846_v57 = vsel %vm1126_vm5, %v2844_v61, %v2845_v59  ;;  %v6161_v55 = vld [vmem:[%s8773_s7] sm:$0xff]   ;;  %v6162_v22 = vld [vmem:[%s8773_s7 + $0xc8] sm:$0xff]  }
 0x384   : > { %3375 = vmatmul.mubr.bf16.vlgmr.msra.gmra.mxu1 %v2955_v37  ;;  %v2969_v26 = vpack.c.bf16 %v2846_v57, %v8183_v3  ;;  %v6163_v37 = vld [vmem:[%s8773_s7 + $0x88] sm:$0xff]  }
 0x385   : > { %3382 = vmatprep.mubr.bf16.mxu1 %v2960_v12  ;;  %v2947_v60 = vsel %vm771_vm3, %v8087_v62, %v6032_v23  ;;  %v2948_v48 = vsel %vm771_vm3, %v8102_v56, %v6033_v4  ;;  %5430 = vmatpush3.bf16.msra.mxu1 %v6135_v46  ;;  %v6143_v12 = vld [vmem:[%s8773_s7 + $0xb0] sm:$0xff]  }
 0x386   : > { %v6041_v39 = vpop.permute.xlu0 %6040  ;;  %v2963_v9 = vpack.c.bf16 %v2948_v48, %v2947_v60  ;;  %5431 = vmatprep.subr.bf16.mxu1 %v6136_v32 }
 0x387   : > { %v6043_v18 = vunpack.i.h.bf16 %v6041_v39  ;;  %v6042_v29 = vunpack.i.l.bf16 %v6041_v39 }
 0x389   : > { %5686 = vmatmul.mubr.msk.bf16.vlgmr.msra.gmra.mxu0 %vm771_vm3, %v2961_v30  ;;  %v2949_v62 = vsel %vm771_vm3, %v8122_v31, %v6042_v29  ;;  %v2950_v56 = vsel %vm771_vm3, %v8147_v52, %v6043_v18  ;;  %v6137_v31 = vld [vmem:[%s8773_s7 + $0x30] sm:$0xff]   ;;  %v6138_v52 = vld [vmem:[%s8773_s7 + $0xf8] sm:$0xff]  }
 0x38a   : > { %5689 = vmatprep.mubr.msk.bf16.mxu0 %vm771_vm3, %v2965_v38  ;;  %v2967_v3 = vpack.c.bf16 %v2950_v56, %v2949_v62  ;;  %5469 = vmatprep.subr.bf16.mxu0 %v6138_v52 }
 0x38b   : > { %5432 = vmatpush3.bf16.msra.mxu1 %v6137_v31  ;;  %5470 = vmatpush3.bf16.msra.mxu0 %v6139_v21 }
 0x38c   : > { %3383 = vmatmul.mubr.bf16.gmra.mxu1 %v2959_v8  ;;  %5433 = vmatprep.subr.bf16.mxu1 %v6140_v24  ;;  %v8937_v24 = vmov 0.0  }
 0x38d   : > { %3390 = vmatprep.mubr.bf16.mxu1 %v2964_v43  ;;  %5471 = vmatprep.subr.bf16.mxu0 %v6142_v35  ;;  %v6158_v43 = vld [vmem:[%s8773_s7 + $0xd0] sm:$0xff]   ;;  %v8389_v35 = vrot.slane %v8937_v24, 7 }
 0x38f   : > { %5434 = vmatpush3.bf16.msra.mxu1 %v6141_v44  ;;  %5472 = vmatpush3.bf16.msra.mxu0 %v6143_v12 }
 0x390   : > { %5435 = vmatprep.subr.bf16.mxu1 %v6144_v34  ;;  %5473 = vmatprep.subr.bf16.mxu0 %v6146_v50 }
 0x391   : > { %5690 = vmatmul.mubr.msk.bf16.gmra.mxu0 %vm771_vm3, %v2969_v26 }
 0x393   : > { %5436 = vmatpush3.bf16.msra.mxu1 %v6145_v41  ;;  %5474 = vmatpush3.bf16.msra.mxu0 %v6147_v13 }
 0x394   : > { %3391 = vmatmul.mubr.bf16.gmra.mxu1 %v2963_v9  ;;  %5437 = vmatprep.subr.bf16.mxu1 %v6148_v63 }
 0x395   : > { %3398 = vmatprep.mubr.bf16.mxu1 %v2968_v54  ;;  %5475 = vmatprep.subr.bf16.mxu0 %v6150_v27 }
 0x397   : > { %5438 = vmatpush3.bf16.msra.mxu1 %v6149_v58  ;;  %5476 = vmatpush3.bf16.msra.mxu0 %v6151_v49  ;;  %v8396_v49 = vrot.slane %v8937_v24, 1 }
 0x398   : > { %5439 = vmatprep.subr.bf16.mxu1 %v6152_v6  ;;  %5477 = vmatprep.subr.bf16.mxu0 %v6154_v53 }
 0x39b   : > { %5440 = vmatpush3.bf16.msra.mxu1 %v6153_v20  ;;  %5478 = vmatpush3.bf16.msra.mxu0 %v6155_v33 }
 0x39c   : > { %3399 = vmatmul.mubr.bf16.gmra.mxu1 %v2967_v3  ;;  %5441 = vmatprep.subr.bf16.mxu1 %v6156_v17 }
 0x39d   : > { %5479 = vmatprep.subr.bf16.mxu0 %v6158_v43 }
 0x39f   : > { %5442 = vmatpush3.bf16.msra.mxu1 %v6157_v28  ;;  %5480 = vmatpush3.bf16.msra.mxu0 %v6159_v11  ;;  %v6165_v11 = vld [vmem:[%s8773_s7 + $0x138] sm:$0xff]  }
 0x3a0   : > { %5443 = vmatprep.subr.bf16.mxu1 %v6160_v5  ;;  %5481 = vmatprep.subr.bf16.mxu0 %v6162_v22 }
 0x3a3   : > { %5444 = vmatpush3.bf16.msra.mxu1 %v6161_v55  ;;  %5482 = vmatpush3.bf16.msra.mxu0 %v6163_v37 }
 0x3a4   : > { %5509 = vmatprep.subr.bf16.mxu1 %v6164_v2  ;;  %5483 = vmatprep.subr.bf16.mxu0 %v6166_v25  ;;  %v6168_v2 = vld [vmem:[%s8773_s7 + $0x170] sm:$0xff]  }
 0x3a7   : > { %5484 = vmatpush3.bf16.msra.mxu0 %v6167_v36 }
 0x3a8   : > { %5549 = vmatprep.subr.bf16.mxu0 %v6170_v0 }
 0x411   : > { %v5357_v30 = vpop.f32.mrf.mxu0 }
 0x413   : > { %v5358_v19 = vpop.f32.mrf.mxu0 }
 0x414   : > { %v5359_v57 = vadd.f32 %v5358_v19, %v5357_v30 }
 0x415   : > { %v5360_v1 = vpop.f32.mrf.mxu0 }
 0x416   : > { %v3312_v48 = vadd.f32 %v5359_v57, %v8378_v7  ;;  %v6172_v57 = vld [vmem:[%s8773_s7 + $0x168] sm:$0xff]  }
 0x417   : > { %v5361_v61 = vpop.f32.mrf.mxu0 }
 0x418   : > { %v5362_v39 = vadd.f32 %v5361_v61, %v5360_v1 }
 0x41a   : > { %v3315_v62 = vadd.f32 %v5362_v39, %v8378_v7 }
 0x421   : > { %v5363_v59 = vpop.f32.mrf.mxu0 }
 0x423   : > { %v5364_v42 = vpop.f32.mrf.mxu0 }
 0x424   : > { %v5365_v56 = vadd.f32 %v5364_v42, %v5363_v59 }
 0x425   : > { %v5366_v38 = vpop.f32.mrf.mxu0 }
 0x426   : > { %v3320_v12 = vadd.f32 %v5365_v56, %v8378_v7 }
 0x427   : > { %v5367_v14 = vpop.f32.mrf.mxu0 }
 0x428   : > { %v5368_v34 = vadd.f32 %v5367_v14, %v5366_v38  ;;  %v6169_v14 = vld [vmem:[%s8773_s7 + $0x130] sm:$0xff]  }
 0x42a   : > { %v3323_v5 = vadd.f32 %v5368_v34, %v8378_v7  ;;  %v6175_v34 = vld [vmem:[%s8773_s7 + $0x1b0] sm:$0xff]  }
 0x431   : > { %v5369_v45 = vpop.f32.mrf.mxu0 }
 0x433   : > { %v5370_v16 = vpop.f32.mrf.mxu0 }
 0x434   : > { %v5371_v20 = vadd.f32 %v5370_v16, %v5369_v45 }
 0x435   : > { %v5372_v8 = vpop.f32.mrf.mxu0 }
 0x436   : > { %v3328_v19 = vadd.f32 %v5371_v20, %v8378_v7 }
 0x437   : > { %v5373_v4 = vpop.f32.mrf.mxu0 }
 0x438   : > { %v5374_v1 = vadd.f32 %v5373_v4, %v5372_v8 }
 0x441   : > { %v8371_v23 = vpop.f32.mrf.mxu0 }
 0x443   : > { %v8373_v10 = vpop.f32.mrf.mxu0 }
 0x444   : > { %v5397_v40 = vpop.f32.mrf.mxu1 }
 0x445   : > { %v8380_v26 = vpop.f32.mrf.mxu0 }
 0x446   : > { %v5398_v60 = vpop.f32.mrf.mxu1 }
 0x447   : > { %v5399_v47 = vadd.f32 %v5398_v60, %v5397_v40  ;;  %v8383_v15 = vpop.f32.mrf.mxu0 }
 0x448   : > { %v5400_v9 = vpop.f32.mrf.mxu1 }
 0x449   : > { %v5687_v18 = vpop.f32.mrf.mxu0  ;;  %v3377_v29 = vadd.f32 %v5399_v47, %v3312_v48  ;;  %v6171_v48 = vld [vmem:[%s8773_s7 + $0x1b8] sm:$0xff]  }
 0x44a   : > { %v5401_v54 = vpop.f32.mrf.mxu1 }
 0x44b   : > { %v5402_v3 = vadd.f32 %v5401_v54, %v5400_v9  ;;  %v3441_v51 = vpop.f32.mrf.mxu0  ;;  %v5377_v54 = vadd.f32 %v8373_v10, %v8371_v23  ;;  %v6176_v10 = vld [vmem:[%s8773_s7 + $0x160] sm:$0xff]  }
 0x44c   : > { %v3442_v46 = vadd.f32 %v3441_v51, %v3377_v29  ;;  %v5403_v32 = vpop.f32.mrf.mxu1  ;;  %v6174_v29 = vld [vmem:[%s8773_s7 + $0x1f0] sm:$0xff]   ;;  %v6173_v51 = vld [vmem:[%s8773_s7 + $0x128] sm:$0xff]  }
 0x44d   : > { %v5688_v31 = vpop.f32.mrf.mxu0  ;;  %v3380_v52 = vadd.f32 %v5402_v3, %v3315_v62 }
 0x44e   : > { %v8386_v21 = vmax.f32 %v3442_v46, 0.0  ;;  %v5404_v44 = vpop.f32.mrf.mxu1 }
 0x44f   : > { %v5405_v41 = vadd.f32 %v5404_v44, %v5403_v32  ;;  %v3444_v50 = vpop.f32.mrf.mxu0  ;;  %v3331_v32 = vadd.f32 %v5374_v1, %v8378_v7  ;;  %v6182_v1 = vld [vmem:[%s8773_s7 + $0x1e0] sm:$0xff]  }
 0x450   : > { %v3569_v13 = vrot.slane %v8386_v21, 7  ;;  %v3445_v63 = vadd.f32 %v3444_v50, %v3380_v52  ;;  %v5406_v58 = vpop.f32.mrf.mxu1  ;;  %v3660_v27 = vpack.c.bf16 %v8386_v21, %v8937_v24  ;;  %v3608_v33 = vrot.slane %v8386_v21, 1 }
 0x451   : > { %v3385_v6 = vadd.f32 %v5405_v41, %v3320_v12  ;;  %v8403_v28 = vpop.f32.mrf.mxu0 }
 0x452   : > { %v3570_v53 = vsel %vm997_vm4, %v8389_v35, %v3569_v13  ;;  %v8401_v17 = vmax.f32 %v3445_v63, 0.0  ;;  %v5407_v43 = vpop.f32.mrf.mxu1  ;;  %4301 = vmatprep.mubr.bf16.mxu1 %v3660_v27  ;;  %v8419_v61 = vsel %vm1126_vm5, %v3608_v33, %v8396_v49  ;;  %v6178_v63 = vld [vmem:[%s8773_s7 + $0x1e8] sm:$0xff]   ;;  %v5380_v27 = vadd.f32 %v8383_v15, %v8380_v26  ;;  %v6177_v33 = vld [vmem:[%s8773_s7 + $0x120] sm:$0xff]   ;;  %v6180_v15 = vld [vmem:[%s8773_s7 + $0x158] sm:$0xff]  }
 0x453   : > { %v3659_v55 = vpack.c.bf16 %v3570_v53, %v8389_v35  ;;  %v3450_v22 = vadd.f32 %v5687_v18, %v3385_v6  ;;  %v5408_v37 = vadd.f32 %v5407_v43, %v5406_v58  ;;  %v3457_v59 = vpop.f32.mrf.mxu0  ;;  %v3661_v39 = vpack.c.bf16 %v8419_v61, %v8396_v49 }
 0x454   : > { %v3572_v25 = vrot.slane %v8401_v17, 7  ;;  %v5409_v36 = vpop.f32.mrf.mxu1  ;;  %v3611_v44 = vrot.slane %v8401_v17, 1  ;;  %v3336_v58 = vadd.f32 %v5377_v54, %v8378_v7 }
 0x455   : > { %v8414_v0 = vmax.f32 %v3450_v22, 0.0  ;;  %v3388_v30 = vadd.f32 %v5408_v37, %v3323_v5  ;;  %4302 = vmatmul.mubr.bf16.vlgmr.msra.gmra.mxu1 %v3659_v55  ;;  %v8449_v62 = vpop.f32.mrf.mxu0 }
 0x456   : > { %5510 = vmatpush3.bf16.msra.mxu1 %v6165_v11  ;;  %v5410_v42 = vpop.f32.mrf.mxu1  ;;  %v3573_v38 = vsel %vm997_vm4, %v8389_v35, %v3572_v25  ;;  %v8494_v37 = vsel %vm1126_vm5, %v3611_v44, %v8396_v49  ;;  %v6190_v44 = vld [vmem:[%s8773_s7 + $0x1d0] sm:$0xff]  }
 0x457   : > { %v3453_v45 = vadd.f32 %v5688_v31, %v3388_v30  ;;  %v5411_v16 = vadd.f32 %v5410_v42, %v5409_v36  ;;  %5511 = vmatprep.subr.bf16.mxu1 %v6168_v2  ;;  %v8428_v8 = vpack.c.bf16 %v8414_v0, %v8401_v17  ;;  %v3575_v4 = vrot.slane %v8414_v0, 7  ;;  %v3460_v6 = vpop.f32.mrf.mxu0  ;;  %v6179_v2 = vld [vmem:[%s8773_s7 + $0x1a8] sm:$0xff]  }
 0x458   : > { %v5412_v40 = vpop.f32.mrf.mxu1  ;;  %v3662_v60 = vpack.c.bf16 %v3573_v38, %v3570_v53  ;;  %v3614_v46 = vrot.slane %v8414_v0, 1 }
 0x459   : > { %v8439_v47 = vmax.f32 %v3453_v45, 0.0  ;;  %v3393_v9 = vadd.f32 %v5411_v16, %v3328_v19  ;;  %4309 = vmatprep.mubr.bf16.mxu1 %v8428_v8  ;;  %v3576_v18 = vsel %vm997_vm4, %v8389_v35, %v3575_v4  ;;  %v3339_v45 = vadd.f32 %v5380_v27, %v8378_v7  ;;  %v6191_v27 = vld [vmem:[%s8773_s7 + $0x190] sm:$0xff]  }
 0x45a   : > { %v8451_v56 = vpack.c.bf16 %v3576_v18, %v3573_v38  ;;  %4366 = vmatprep.mubr.bf16.mxu0 %v3662_v60  ;;  %5512 = vmatpush3.bf16.msra.mxu1 %v6169_v14  ;;  %v5413_v3 = vpop.f32.mrf.mxu1  ;;  %v8482_v43 = vsel %vm1126_vm5, %v3614_v46, %v8396_v49  ;;  %v6181_v38 = vld [vmem:[%s8773_s7 + $0x118] sm:$0xff]   ;;  %v6183_v60 = vld [vmem:[%s8773_s7 + $0x1a0] sm:$0xff]  }
 0x45b   : > { %v3458_v31 = vadd.f32 %v3457_v59, %v3393_v9  ;;  %v5414_v52 = vadd.f32 %v5413_v3, %v5412_v40  ;;  %4367 = vmatmul.mubr.bf16.vlgmr.msra.gmra.mxu0 %v3661_v39  ;;  %5513 = vmatprep.subr.bf16.mxu1 %v6172_v57  ;;  %v3578_v23 = vrot.slane %v8439_v47, 7  ;;  %v8506_v19 = vpack.c.bf16 %v8482_v43, %v8494_v37  ;;  %v6184_v40 = vld [vmem:[%s8773_s7 + $0x150] sm:$0xff]   ;;  %v6186_v9 = vld [vmem:[%s8773_s7 + $0x1d8] sm:$0xff]  }
 0x45c   : > { %5550 = vmatpush3.bf16.msra.mxu0 %v6171_v48  ;;  %v5415_v12 = vpop.f32.mrf.mxu1  ;;  %v3617_v48 = vrot.slane %v8439_v47, 1 }
 0x45d   : > { %v8466_v41 = vmax.f32 %v3458_v31, 0.0  ;;  %v3396_v50 = vadd.f32 %v5414_v52, %v3331_v32  ;;  %4310 = vmatmul.mubr.bf16.gmra.mxu1 %v8451_v56  ;;  %5551 = vmatprep.subr.bf16.mxu0 %v6174_v29  ;;  %v3579_v13 = vsel %vm997_vm4, %v8389_v35, %v3578_v23  ;;  %v6185_v29 = vld [vmem:[%s8773_s7 + $0x110] sm:$0xff]   ;;  %v6188_v32 = vld [vmem:[%s8773_s7 + $0x148] sm:$0xff]  }
 0x45e   : > { %5514 = vmatpush3.bf16.msra.mxu1 %v6173_v51  ;;  %v5416_v20 = vpop.f32.mrf.mxu1  ;;  %v3668_v53 = vpack.c.bf16 %v3579_v13, %v3576_v18  ;;  %v3619_v31 = vsel %vm1126_vm5, %v3617_v48, %v8396_v49  ;;  %v6220_v48 = vld [vmem:[%s8775_s9 + $0x34] ss:$8 sps:$4 sm:$0xff]  }
 0x45f   : > { %v3461_v11 = vadd.f32 %v3460_v6, %v3396_v50  ;;  %v5417_v5 = vadd.f32 %v5416_v20, %v5415_v12  ;;  %v3581_v55 = vrot.slane %v8466_v41, 7  ;;  %5515 = vmatprep.subr.bf16.mxu1 %v6176_v10  ;;  %v8487_v26 = vpack.c.bf16 %v8466_v41, %v8439_v47 }
 0x460   : > { %5552 = vmatpush3.bf16.msra.mxu0 %v6175_v34  ;;  %v5418_v22 = vpop.f32.mrf.mxu1  ;;  %4374 = vmatprep.mubr.bf16.mxu0 %v3668_v53  ;;  %v3620_v14 = vrot.slane %v8466_v41, 1  ;;  %v6189_v34 = vld [vmem:[%s8773_s7 + $0x108] sm:$0xff]  }
 0x461   : > { %v8499_v25 = vmax.f32 %v3461_v11, 0.0  ;;  %v3401_v36 = vadd.f32 %v5417_v5, %v3336_v58  ;;  %v3582_v30 = vsel %vm997_vm4, %v8389_v35, %v3581_v55  ;;  %4317 = vmatprep.mubr.bf16.mxu1 %v8487_v26  ;;  %5553 = vmatprep.subr.bf16.mxu0 %v6178_v63  ;;  %v6192_v63 = vld [vmem:[%s8773_s7 + $0x140] sm:$0xff]   ;;  %v3664_v58 = vpack.c.bf16 %v8494_v37, %v8419_v61  ;;  %v6194_v53 = vld [vmem:[%s8773_s7 + $0x1c8] sm:$0xff]   ;;  %v6196_v5 = vld [vmem:[%s8773_s7 + $0x238] sm:$0xff]  }
 0x462   : > { %v8511_v59 = vpack.c.bf16 %v3582_v30, %v3579_v13  ;;  %5516 = vmatpush3.bf16.msra.mxu1 %v6177_v33  ;;  %v5419_v42 = vpop.f32.mrf.mxu1  ;;  %v8541_v54 = vsel %vm1126_vm5, %v3620_v14, %v8396_v49  ;;  %v6193_v33 = vld [vmem:[%s8773_s7 + $0x100] sm:$0xff]   ;;  %v6204_v14 = vld [vmem:[%s8773_s7 + $0x208] sm:$0xff]  }
 0x463   : > { %v3466_v16 = vadd.f32 %v8403_v28, %v3401_v36  ;;  %v5420_v4 = vadd.f32 %v5419_v42, %v5418_v22  ;;  %4375 = vmatmul.mubr.bf16.gmra.mxu0 %v8506_v19  ;;  %5517 = vmatprep.subr.bf16.mxu1 %v6180_v15  ;;  %v3584_v57 = vrot.slane %v8499_v25, 7  ;;  %v8563_v10 = vpack.c.bf16 %v8541_v54, %v3619_v31  ;;  %v6195_v15 = vld [vmem:[%s8773_s7 + $0x188] sm:$0xff]   ;;  %v6197_v37 = vld [vmem:[%s8773_s7 + $0x1c0] sm:$0xff]   ;;  %v6199_v36 = vld [vmem:[%s8773_s7 + $0x230] sm:$0xff]  }
 0x464   : > { %5554 = vmatpush3.bf16.msra.mxu0 %v6179_v2  ;;  %v3623_v6 = vrot.slane %v8499_v25, 1  ;;  %v3663_v2 = vpack.c.bf16 %v8401_v17, %v8386_v21  ;;  %v6200_v21 = vld [vmem:[%s8773_s7 + $0x228] sm:$0xff]   ;;  %v3669_v17 = vpack.c.bf16 %v8439_v47, %v8414_v0  ;;  %v3675_v47 = vpack.c.bf16 %v8499_v25, %v8466_v41 }
 0x465   : > { %v8528_v7 = vmax.f32 %v3466_v16, 0.0  ;;  %v3404_v28 = vadd.f32 %v5420_v4, %v3339_v45  ;;  %4318 = vmatmul.mubr.bf16.gmra.mxu1 %v8511_v59  ;;  %5555 = vmatprep.subr.bf16.mxu0 %v6182_v1  ;;  %v3585_v39 = vsel %vm997_vm4, %v8389_v35, %v3584_v57  ;;  %v6198_v1 = vld [vmem:[%s8773_s7 + $0x180] sm:$0xff]   ;;  %v6206_v16 = vld [vmem:[%s8775_s9 + $0x70] ss:$8 sps:$4 sm:$0xff]  }
 0x466   : > { %5518 = vmatpush3.bf16.msra.mxu1 %v6181_v38  ;;  %v3674_v18 = vpack.c.bf16 %v3585_v39, %v3582_v30  ;;  %v3625_v55 = vsel %vm1126_vm5, %v3623_v6, %v8396_v49  ;;  %v3670_v30 = vpack.c.bf16 %v3619_v31, %v8482_v43  ;;  %v6211_v4 = vld [vmem:[%s8775_s9 + $0x64] ss:$8 sps:$4 sm:$0xff]   ;;  %v6212_v57 = vld [vmem:[%s8775_s9 + $0x50] ss:$8 sps:$4 sm:$0xff]  }
 0x467   : > { %v3469_v3 = vadd.f32 %v8449_v62, %v3404_v28  ;;  %v3587_v51 = vrot.slane %v8528_v7, 7  ;;  %5519 = vmatprep.subr.bf16.mxu1 %v6184_v40  ;;  %v8547_v46 = vpack.c.bf16 %v8528_v7, %v8499_v25  ;;  %v6187_v62 = vld [vmem:[%s8773_s7 + $0x198] sm:$0xff]   ;;  %v3626_v50 = vrot.slane %v8528_v7, 1  ;;  %v6205_v25 = vld [vmem:[%s8773_s7 + $0x200] sm:$0xff]  }
 0x468   : > { %5556 = vmatpush3.bf16.msra.mxu0 %v6183_v60  ;;  %4382 = vmatprep.mubr.bf16.mxu0 %v3674_v18  ;;  %v3676_v43 = vpack.c.bf16 %v3625_v55, %v8541_v54  ;;  %v6215_v40 = vld [vmem:[%s8775_s9 + $0x40] ss:$8 sps:$4 sm:$0xff]   ;;  %v6217_v60 = vld [vmem:[%s8775_s9 + $0x44] ss:$8 sps:$4 sm:$0xff]   ;;  %v6226_v18 = vld [vmem:[%s8775_s9 + $0x14] ss:$8 sps:$4 sm:$0xff]  }
 0x469   : > { %v8557_v52 = vmax.f32 %v3469_v3, 0.0  ;;  %v3588_v23 = vsel %vm997_vm4, %v8389_v35, %v3587_v51  ;;  %4325 = vmatprep.mubr.bf16.mxu1 %v8547_v46  ;;  %5557 = vmatprep.subr.bf16.mxu0 %v6186_v9  ;;  %v3628_v11 = vsel %vm1126_vm5, %v3626_v50, %v8396_v49  ;;  %v6223_v28 = vld [vmem:[%s8775_s9 + $0x24] ss:$8 sps:$4 sm:$0xff]   ;;  %v6221_v9 = vld [vmem:[%s8775_s9 + $0x20] ss:$8 sps:$4 sm:$0xff]  }
 0x46a   : > { %v8568_v12 = vpack.c.bf16 %v3588_v23, %v3585_v39  ;;  %5520 = vmatpush3.bf16.msra.mxu1 %v6185_v29  ;;  %v3679_v22 = vpack.c.bf16 %v3628_v11, %v3625_v55  ;;  %v6271_v39 = vmov 0   ;;  %v6224_v29 = vld [vmem:[%s8775_s9 + $0x10] ss:$8 sps:$4 sm:$0xff]   ;;  %v6229_v54 = vld [vmem:[%s8775_s9 + $0x4] ss:$8 sps:$4 sm:$0xff]  }
 0x46b   : > { %4383 = vmatmul.mubr.bf16.gmra.mxu0 %v8563_v10  ;;  %5521 = vmatprep.subr.bf16.mxu1 %v6188_v32  ;;  %v3640_v13 = vrot.slane %v8557_v52, 7  ;;  %v3644_v42 = vrot.slane %v8557_v52, 1  ;;  %v3681_v41 = vpack.c.bf16 %v8557_v52, %v8528_v7  ;;  %v6218_v7 = vld [vmem:[%s8775_s9 + $0x30] ss:$8 sps:$4 sm:$0xff]   ;;  %v6227_v3 = vld [vmem:[%s8775_s9] ss:$8 sps:$4 sm:$0xff]  }
 0x46c   : > { %5558 = vmatpush3.bf16.msra.mxu0 %v6187_v62 }
 0x46d   : > { %4326 = vmatmul.mubr.bf16.gmra.mxu1 %v8568_v12  ;;  %5559 = vmatprep.subr.bf16.mxu0 %v6190_v44  ;;  %v8588_v20 = vsel %vm997_vm4, %v8389_v35, %v3640_v13  ;;  %v3646_v0 = vsel %vm1126_vm5, %v3644_v42, %v8396_v49 }
 0x46e   : > { %5522 = vmatpush3.bf16.msra.mxu1 %v6189_v34  ;;  %4431 = vmatprep.mubr.bf16.mxu1 %v3664_v58  ;;  %v3680_v61 = vpack.c.bf16 %v8588_v20, %v3588_v23  ;;  %v3682_v38 = vpack.c.bf16 %v3646_v0, %v3628_v11  ;;  %v3683_v45 = vpack.c.bf16 %v8389_v35, %v8588_v20  ;;  %v6209_v35 = vld [vmem:[%s8775_s9 + $0x60] ss:$8 sps:$4 sm:$0xff]  }
 0x46f   : > { %5523 = vmatprep.subr.bf16.mxu1 %v6192_v63 }
 0x470   : > { %5560 = vmatpush3.bf16.msra.mxu0 %v6191_v27  ;;  %4390 = vmatprep.mubr.bf16.mxu0 %v3680_v61 }
 0x471   : > { %5561 = vmatprep.subr.bf16.mxu0 %v6194_v53 }
 0x472   : > { %5524 = vmatpush3.bf16.msra.mxu1 %v6193_v33 }
 0x473   : > { %4391 = vmatmul.mubr.bf16.gmra.mxu0 %v3679_v22  ;;  %5693 = vmatprep.subr.bf16.mxu1 %v6196_v5 }
 0x474   : > { %5562 = vmatpush3.bf16.msra.mxu0 %v6195_v15  ;;  %4496 = vmatprep.mubr.bf16.mxu0 %v8428_v8  ;;  %v6201_v8 = vld [vmem:[%s8773_s7 + $0x220] sm:$0xff]  }
 0x475   : > { %4432 = vmatmul.mubr.bf16.vlgmr.msra.gmra.mxu1 %v3663_v2  ;;  %5563 = vmatprep.subr.bf16.mxu0 %v6197_v37 }
 0x476   : > { %5694 = vmatpush3.bf16.msra.mxu1 %v6196_v5  ;;  %4439 = vmatprep.mubr.bf16.mxu1 %v3670_v30 }
 0x477   : > { %5695 = vmatprep.subr.bf16.mxu1 %v6199_v36 }
 0x478   : > { %5564 = vmatpush3.bf16.msra.mxu0 %v6198_v1 }
 0x47a   : > { %5696 = vmatpush3.bf16.msra.mxu1 %v6199_v36 }
 0x47b   : > { %4497 = vmatmul.mubr.bf16.vlgmr.msra.gmra.mxu0 %v8451_v56  ;;  %5697 = vmatprep.subr.bf16.mxu1 %v6200_v21  ;;  %v6202_v56 = vld [vmem:[%s8773_s7 + $0x218] sm:$0xff]  }
 0x47c   : > { %4504 = vmatprep.mubr.bf16.mxu0 %v8487_v26  ;;  %v6203_v26 = vld [vmem:[%s8773_s7 + $0x210] sm:$0xff]  }
 0x47d   : > { %4440 = vmatmul.mubr.bf16.gmra.mxu1 %v3669_v17 }
 0x47e   : > { %5698 = vmatpush3.bf16.msra.mxu1 %v6200_v21  ;;  %4447 = vmatprep.mubr.bf16.mxu1 %v3676_v43 }
 0x47f   : > { %5699 = vmatprep.subr.bf16.mxu1 %v6201_v8 }
 0x482   : > { %5700 = vmatpush3.bf16.msra.mxu1 %v6201_v8 }
 0x483   : > { %4505 = vmatmul.mubr.bf16.gmra.mxu0 %v8511_v59  ;;  %5701 = vmatprep.subr.bf16.mxu1 %v6202_v56  ;;  %v3684_v59 = vpack.c.bf16 %v8937_v24, %v8557_v52  ;;  %v3685_v24 = vpack.c.bf16 %v8396_v49, %v3646_v0  ;;  %v6214_v49 = vld [vmem:[%s8775_s9 + $0x54] ss:$8 sps:$4 sm:$0xff]  }
 0x484   : > { %4512 = vmatprep.mubr.bf16.mxu0 %v8547_v46 }
 0x485   : > { %4448 = vmatmul.mubr.bf16.gmra.mxu1 %v3675_v47 }
 0x486   : > { %5702 = vmatpush3.bf16.msra.mxu1 %v6202_v56  ;;  %4455 = vmatprep.mubr.bf16.mxu1 %v3682_v38 }
 0x487   : > { %5703 = vmatprep.subr.bf16.mxu1 %v6203_v26 }
 0x48a   : > { %5704 = vmatpush3.bf16.msra.mxu1 %v6203_v26 }
 0x48b   : > { %4513 = vmatmul.mubr.bf16.gmra.mxu0 %v8568_v12  ;;  %5705 = vmatprep.subr.bf16.mxu1 %v6204_v14 }
 0x48c   : > { %4520 = vmatprep.mubr.bf16.mxu0 %v3684_v59 }
 0x48d   : > { %4456 = vmatmul.mubr.bf16.gmra.mxu1 %v3681_v41 }
 0x48e   : > { %5706 = vmatpush3.bf16.msra.mxu1 %v6204_v14  ;;  %5709 = vmatprep.mubr.bf16.mxu1 %v8506_v19  ;;  %v6208_v19 = vld [vmem:[%s8775_s9 + $0x74] ss:$8 sps:$4 sm:$0xff]  }
 0x48f   : > { %5707 = vmatprep.subr.bf16.mxu1 %v6205_v25  ;;  %4728 = vmatprep.subr.bf16.mxu0 %v6208_v19 }
 0x490   : > { %4729 = vmatpush1.bf16.msra.mxu0 %v6206_v16 }
 0x491   : > { %4730 = vmatprep.subr.bf16.mxu0 %v6211_v4 }
 0x492   : > { %5708 = vmatpush3.bf16.msra.mxu1 %v6205_v25 }
 0x493   : > { %4521 = vmatmul.mubr.bf16.gmra.mxu0 %v3683_v45 }
 0x494   : > { %4731 = vmatpush1.bf16.msra.mxu0 %v6209_v35  ;;  %4760 = vmatprep.mubr.bf16.mxu0 %v6271_v39 }
 0x495   : > { %5710 = vmatmul.mubr.bf16.vlgmr.msra.gmra.mxu1 %v8563_v10  ;;  %4732 = vmatprep.subr.bf16.mxu0 %v6214_v49 }
 0x496   : > { %5713 = vmatprep.mubr.bf16.mxu1 %v3679_v22 }
 0x498   : > { %4733 = vmatpush1.bf16.msra.mxu0 %v6212_v57 }
 0x499   : > { %4734 = vmatprep.subr.bf16.mxu0 %v6217_v60  ;;  %v4982_v60 = vld [vmem:[%s8774_s8] ss:$0 sm:$0xff] }
 0x49c   : > { %4735 = vmatpush1.bf16.msra.mxu0 %v6215_v40 }
 0x49d   : > { %5714 = vmatmul.mubr.bf16.gmra.mxu1 %v3685_v24  ;;  %4736 = vmatprep.subr.bf16.mxu0 %v6220_v48 }
 0x4a0   : > { %4737 = vmatpush1.bf16.msra.mxu0 %v6218_v7 }
 0x4a1   : > { %4738 = vmatprep.subr.bf16.mxu0 %v6223_v28 }
 0x4a4   : > { %4739 = vmatpush1.bf16.msra.mxu0 %v6221_v9 }
 0x4a5   : > { %4740 = vmatprep.subr.bf16.mxu0 %v6226_v18 }
 0x4a8   : > { %4741 = vmatpush1.bf16.msra.mxu0 %v6224_v29 }
 0x4a9   : > { %4742 = vmatprep.subr.bf16.mxu0 %v6229_v54 }
 0x4ac   : > { %4743 = vmatpush1.bf16.msra.mxu0 %v6227_v3 }
 0x515   : > { %v5445_v51 = vpop.f32.mrf.mxu1 }
 0x517   : > { %v5446_v46 = vpop.f32.mrf.mxu1 }
 0x518   : > { %v5447_v49 = vadd.f32 %v5446_v46, %v5445_v51 }
 0x519   : > { %v5448_v32 = vpop.f32.mrf.mxu1 }
 0x51a   : > { %v4304_v54 = vadd.f32 %v5447_v49, %v4982_v60 }
 0x51b   : > { %v5485_v31 = vpop.f32.mrf.mxu0  ;;  %v5449_v62 = vpop.f32.mrf.mxu1 }
 0x51c   : > { %v5450_v48 = vadd.f32 %v5449_v62, %v5448_v32 }
 0x51d   : > { %v5486_v52 = vpop.f32.mrf.mxu0  ;;  %v5451_v23 = vpop.f32.mrf.mxu1 }
 0x51e   : > { %v5487_v28 = vadd.f32 %v5486_v52, %v5485_v31 }
 0x51f   : > { %v5488_v10 = vpop.f32.mrf.mxu0  ;;  %v5452_v44 = vpop.f32.mrf.mxu1 }
 0x520   : > { %v5453_v7 = vadd.f32 %v5452_v44, %v5451_v23 }
 0x521   : > { %v5489_v12 = vpop.f32.mrf.mxu0  ;;  %v5454_v34 = vpop.f32.mrf.mxu1 }
 0x522   : > { %v5490_v3 = vadd.f32 %v5489_v12, %v5488_v10 }
 0x523   : > { %v5491_v50 = vpop.f32.mrf.mxu0  ;;  %v5455_v13 = vpop.f32.mrf.mxu1 }
 0x524   : > { %v5456_v39 = vadd.f32 %v5455_v13, %v5454_v34 }
 0x525   : > { %v5492_v63 = vpop.f32.mrf.mxu0  ;;  %v5457_v58 = vpop.f32.mrf.mxu1 }
 0x526   : > { %v5493_v29 = vadd.f32 %v5492_v63, %v5491_v50 }
 0x527   : > { %v5494_v27 = vpop.f32.mrf.mxu0  ;;  %v5458_v6 = vpop.f32.mrf.mxu1 }
 0x529   : > { %v5495_v20 = vpop.f32.mrf.mxu0  ;;  %v5460_v53 = vpop.f32.mrf.mxu1 }
 0x52a   : > { %v5496_v51 = vadd.f32 %v5495_v20, %v5494_v27 }
 0x52b   : > { %v5497_v61 = vpop.f32.mrf.mxu0  ;;  %v5461_v33 = vpop.f32.mrf.mxu1 }
 0x52c   : > { %v5462_v32 = vadd.f32 %v5461_v33, %v5460_v53 }
 0x52d   : > { %v5498_v11 = vpop.f32.mrf.mxu0  ;;  %v5463_v5 = vpop.f32.mrf.mxu1 }
 0x52e   : > { %v5499_v62 = vadd.f32 %v5498_v11, %v5497_v61 }
 0x52f   : > { %v8708_v55 = vpop.f32.mrf.mxu0  ;;  %v5464_v15 = vpop.f32.mrf.mxu1 }
 0x530   : > { %v5465_v63 = vadd.f32 %v5464_v15, %v5463_v5 }
 0x531   : > { %v8710_v22 = vpop.f32.mrf.mxu0  ;;  %v8712_v37 = vpop.f32.mrf.mxu1 }
 0x532   : > { %v4328_v15 = vadd.f32 %v5465_v63, %v4982_v60 }
 0x533   : > { %v8714_v2 = vpop.f32.mrf.mxu0  ;;  %v8716_v36 = vpop.f32.mrf.mxu1 }
 0x534   : > { %v5468_v53 = vadd.f32 %v8716_v36, %v8712_v37 }
 0x535   : > { %v8718_v30 = vpop.f32.mrf.mxu0  ;;  %v5525_v1 = vpop.f32.mrf.mxu1 }
 0x536   : > { %v5505_v61 = vadd.f32 %v8718_v30, %v8714_v2  ;;  %v4331_v30 = vadd.f32 %v5468_v53, %v4982_v60 }
 0x537   : > { %v8720_v21 = vpop.f32.mrf.mxu0  ;;  %v5526_v17 = vpop.f32.mrf.mxu1 }
 0x538   : > { %8938 = vst [vmem:[#allocation17_spill] sm:$0xff] %v8720_v21  ;;  %v4315_v21 = vadd.f32 %v5456_v39, %v4982_v60  ;;  %v5527_v44 = vadd.f32 %v5526_v17, %v5525_v1 }
 0x539   : > { %v8722_v8 = vpop.f32.mrf.mxu0  ;;  %v5528_v43 = vpop.f32.mrf.mxu1 }
 0x53a   : > { %8939 = vst [vmem:[#allocation13_spill] sm:$0xff] %v8722_v8  ;;  %v4369_v8 = vadd.f32 %v5487_v28, %v4304_v54  ;;  %v4380_v12 = vadd.f32 %v5496_v51, %v4315_v21 }
 0x53b   : > { %v5565_v42 = vpop.f32.mrf.mxu0  ;;  %v5529_v56 = vpop.f32.mrf.mxu1 }
 0x53c   : > { %v4434_v1 = vadd.f32 %v5527_v44, %v4369_v8 }
 0x53d   : > { %v5566_v0 = vpop.f32.mrf.mxu0  ;;  %v5531_v47 = vpop.f32.mrf.mxu1 }
 0x53e   : > { %v5567_v20 = vadd.f32 %v5566_v0, %v5565_v42 }
 0x53f   : > { %v5568_v26 = vpop.f32.mrf.mxu0  ;;  %v5532_v38 = vpop.f32.mrf.mxu1  ;;  %v8945_v42 = vld [vmem:[#allocation17_spill] sm:$0xff] }
 0x541   : > { %v5569_v14 = vpop.f32.mrf.mxu0  ;;  %v5534_v59 = vpop.f32.mrf.mxu1 }
 0x542   : > { %v5570_v17 = vadd.f32 %v5569_v14, %v5568_v26 }
 0x543   : > { %v5571_v41 = vpop.f32.mrf.mxu0  ;;  %v5535_v25 = vpop.f32.mrf.mxu1 }
 0x544   : > { %v5536_v34 = vadd.f32 %v5535_v25, %v5534_v59 }
 0x545   : > { %v5572_v45 = vpop.f32.mrf.mxu0  ;;  %v8724_v24 = vpop.f32.mrf.mxu1 }
 0x546   : > { %8940 = vst [vmem:[#allocation14_spill] sm:$0xff] %v8724_v24  ;;  %v5533_v24 = vadd.f32 %v5532_v38, %v5531_v47  ;;  %v5573_v50 = vadd.f32 %v5572_v45, %v5571_v41  ;;  %v4323_v38 = vadd.f32 %v5462_v32, %v4982_v60  ;;  %v4445_v21 = vadd.f32 %v5536_v34, %v4380_v12 }
 0x547   : > { %v5574_v16 = vpop.f32.mrf.mxu0  ;;  %v8726_v19 = vpop.f32.mrf.mxu1  ;;  %v4499_v45 = vadd.f32 %v5567_v20, %v4434_v1 }
 0x548   : > { %8941 = vst [vmem:[#allocation33_spill] sm:$0xff] %v8726_v19  ;;  %v4312_v19 = vadd.f32 %v5453_v7, %v4982_v60 }
 0x549   : > { %v5575_v35 = vpop.f32.mrf.mxu0  ;;  %v8728_v4 = vpop.f32.mrf.mxu1 }
 0x54a   : > { %8942 = vst [vmem:[#allocation11_spill] sm:$0xff] %v8728_v4  ;;  %v5459_v4 = vadd.f32 %v5458_v6, %v5457_v58  ;;  %v4377_v23 = vadd.f32 %v5493_v29, %v4312_v19  ;;  %v5530_v6 = vadd.f32 %v5529_v56, %v5528_v43  ;;  %v5576_v47 = vadd.f32 %v5575_v35, %v5574_v16  ;;  %v8946_v56 = vld [vmem:[#allocation13_spill] sm:$0xff] }
 0x54b   : > { %v8730_v57 = vpop.f32.mrf.mxu0  ;;  %v8732_v40 = vpop.f32.mrf.mxu1  ;;  %v5502_v43 = vadd.f32 %v8710_v22, %v8708_v55  ;;  %v5508_v0 = vadd.f32 %v8946_v56, %v8945_v42 }
 0x54c   : > { %8943 = vst [vmem:[#allocation10_spill] sm:$0xff] %v8730_v57  ;;  %8944 = vst [vmem:[#allocation12_spill] sm:$0xff] %v8732_v40  ;;  %v4307_v40 = vadd.f32 %v5450_v48, %v4982_v60  ;;  %v4320_v10 = vadd.f32 %v5459_v4, %v4982_v60  ;;  %v4442_v49 = vadd.f32 %v5533_v24, %v4377_v23 }
 0x54d   : > { %v8737_v9 = vpop.f32.mrf.mxu0  ;;  %v5543_v18 = vpop.f32.mrf.mxu1  ;;  %v4510_v2 = vadd.f32 %v5576_v47, %v4445_v21  ;;  %v4393_v24 = vadd.f32 %v5505_v61, %v4328_v15  ;;  %v8947_v8 = vld [vmem:[#allocation14_spill] sm:$0xff]  ;;  %v4396_v7 = vadd.f32 %v5508_v0, %v4331_v30 }
 0x54e   : > { %v4372_v13 = vadd.f32 %v5490_v3, %v4307_v40  ;;  %v4385_v48 = vadd.f32 %v5499_v62, %v4320_v10  ;;  %v4507_v5 = vadd.f32 %v5573_v50, %v4442_v49 }
 0x54f   : > { %v8739_v46 = vpop.f32.mrf.mxu0  ;;  %v5544_v57 = vpop.f32.mrf.mxu1  ;;  %v8948_v26 = vld [vmem:[#allocation33_spill] sm:$0xff] }
 0x550   : > { %v5545_v59 = vadd.f32 %v5544_v57, %v5543_v18  ;;  %v4437_v37 = vadd.f32 %v5530_v6, %v4372_v13  ;;  %v5539_v14 = vadd.f32 %v8948_v26, %v8947_v8 }
 0x551   : > { %v5581_v31 = vpop.f32.mrf.mxu0  ;;  %v5546_v52 = vpop.f32.mrf.mxu1  ;;  %v8949_v57 = vld [vmem:[#allocation11_spill] sm:$0xff] }
 0x552   : > { %v4502_v40 = vadd.f32 %v5570_v17, %v4437_v37  ;;  %v4458_v54 = vadd.f32 %v5545_v59, %v4393_v24  ;;  %v4450_v23 = vadd.f32 %v5539_v14, %v4385_v48  ;;  %v5582_v44 = vadd.f32 %v5581_v31, %v8739_v46 }
 0x553   : > { %v5583_v58 = vpop.f32.mrf.mxu0  ;;  %v5547_v27 = vpop.f32.mrf.mxu1  ;;  %v8950_v28 = vld [vmem:[#allocation12_spill] sm:$0xff]  ;;  %v8951_v18 = vld [vmem:[#allocation10_spill] sm:$0xff] }
 0x554   : > { %v5548_v16 = vadd.f32 %v5547_v27, %v5546_v52  ;;  %v5542_v39 = vadd.f32 %v8950_v28, %v8949_v57  ;;  %v5579_v29 = vadd.f32 %v8737_v9, %v8951_v18  ;;  %v4388_v52 = vadd.f32 %v5502_v43, %v4323_v38 }
 0x555   : > { %v5584_v33 = vpop.f32.mrf.mxu0  ;;  %v5711_v11 = vpop.f32.mrf.mxu1 }
 0x556   : > { %v4572_v36 = vadd.f32 %v5711_v11, %v4507_v5  ;;  %v5585_v4 = vadd.f32 %v5584_v33, %v5583_v58  ;;  %v4461_v34 = vadd.f32 %v5548_v16, %v4396_v7  ;;  %v4453_v58 = vadd.f32 %v5542_v39, %v4388_v52 }
 0x557   : > { %v5586_v41 = vpop.f32.mrf.mxu0  ;;  %v4563_v25 = vpop.f32.mrf.mxu1  ;;  %v4515_v20 = vadd.f32 %v5579_v29, %v4450_v23 }
 0x558   : > { %v4564_v55 = vadd.f32 %v4563_v25, %v4499_v45  ;;  %v4596_v3 = vmax.f32 %v4572_v36, 0.0  ;;  %v4523_v63 = vadd.f32 %v5585_v4, %v4458_v54  ;;  %v4518_v48 = vadd.f32 %v5582_v44, %v4453_v58  ;;  %v4636_v36 = vld [vmem:[%s8776_s10] sm:$0x3] }
 0x559   : > { %v5587_v19 = vpop.f32.mrf.mxu0  ;;  %v5712_v35 = vpop.f32.mrf.mxu1 }
 0x55a   : > { %v4575_v22 = vadd.f32 %v5712_v35, %v4510_v2  ;;  %v5588_v51 = vadd.f32 %v5587_v19, %v5586_v41  ;;  %v4594_v13 = vmax.f32 %v4564_v55, 0.0  ;;  %v4638_v41 = vlaneseq }
 0x55b   : > { %v4566_v60 = vpop.f32.mrf.mxu1 }
 0x55c   : > { %v4597_v32 = vmax.f32 %v4575_v22, 0.0  ;;  %v4567_v62 = vadd.f32 %v4566_v60, %v4502_v40  ;;  %v4526_v49 = vadd.f32 %v5588_v51, %v4461_v34  ;;  %v4639_v25 = vshrl.u32 %v4638_v41, 7 }
 0x55d   : > { %v5715_v50 = vpop.f32.mrf.mxu1 }
 0x55e   : > { %v4603_v10 = vmax.f32 %v4596_v3, %v4597_v32  ;;  %v4595_v12 = vmax.f32 %v4567_v62, 0.0  ;;  %v4588_v6 = vadd.f32 %v5715_v50, %v4523_v63  ;;  %v4640_v37 = vsub.s32 0, %v4639_v25 }
 0x55f   : > { %v4579_v27 = vpop.f32.mrf.mxu1  ;;  %v4644_v45 = vsub.s32 1, %v4639_v25 }
 0x560   : > { %4607 = vst [vmem:[#allocation6 + $0x8] sm:$0xff] %v4603_v10  ;;  %v4602_v9 = vmax.f32 %v4594_v13, %v4595_v12  ;;  %v4580_v53 = vadd.f32 %v4579_v27, %v4515_v20  ;;  %v4600_v46 = vmax.f32 %v4588_v6, 0.0  ;;  %v4641_v2 = vrot.slane %v4636_v36, %v4640_v37 }
 0x561   : > { %v5716_v47 = vpop.f32.mrf.mxu1  ;;  %v4645_v30 = vrot.slane %v4636_v36, %v4644_v45 }
 0x562   : > { %4606 = vst [vmem:[#allocation6] sm:$0xff] %v4602_v9  ;;  %v4591_v38 = vadd.f32 %v5716_v47, %v4526_v49  ;;  %v4598_v11 = vmax.f32 %v4580_v53, 0.0 }
 0x563   : > { %v4582_v61 = vpop.f32.mrf.mxu1 }
 0x564   : > { %v4601_v31 = vmax.f32 %v4591_v38, 0.0  ;;  %v4583_v33 = vadd.f32 %v4582_v61, %v4518_v48 }
 0x566   : > { %v4605_v1 = vmax.f32 %v4600_v46, %v4601_v31  ;;  %v4599_v17 = vmax.f32 %v4583_v33, 0.0 }
 0x568   : > { %4609 = vst [vmem:[#allocation6 + $0x18] sm:$0xff] %v4605_v1  ;;  %v4604_v21 = vmax.f32 %v4598_v11, %v4599_v17 }
 0x569   : > { %v4610_v5 = vld [vmem:[#allocation6] ss:$2 sm:$0xff]  ;;  %v4614_v15 = vld [vmem:[#allocation6 + $0x1] ss:$2 sm:$0xff] }
 0x56a   : > { %4608 = vst [vmem:[#allocation6 + $0x10] sm:$0xff] %v4604_v21  ;;  %v4617_v56 = vmax.f32 %v4610_v5, %v4614_v15 }
 0x571   : > { %v4612_v43 = vld [vmem:[#allocation6 + $0x10] ss:$2 sm:$0xff]  ;;  %v4616_v42 = vld [vmem:[#allocation6 + $0x11] ss:$2 sm:$0xff] }
 0x572   : > { %v4618_v0 = vmax.f32 %v4612_v43, %v4616_v42 }
 0x574   : > { %v4619_v59 = vpack.c.bf16 %v4618_v0, %v4617_v56 }
 0x576   : > { %4761 = vmatmul.mubr.bf16.vlgmr.msra.gmra.mxu0 %v4619_v59 }
 0x636   : > { %v4762_v24 = vpop.f32.mrf.mxu0 }
 0x637   : > { %v4763_v8 = vadd.f32 %v4762_v24, %v4641_v2 }
 0x638   : > { %v4764_v26 = vpop.f32.mrf.mxu0 }
 0x639   : > { %v4765_v14 = vadd.f32 %v4764_v26, %v4645_v30  ;;  %v4771_v19 = vmax.f32 %v4763_v8, 0.0 }
 0x63a   : > { %v4766_v16 = vpop.f32.mrf.mxu0 }
 0x63b   : > { %v4772_v35 = vmax.f32 %v4765_v14, 0.0  ;;  %v4767_v4 = vadd.f32 %v4766_v16, %v4641_v2 }
 0x63c   : > { %v4768_v55 = vpop.f32.mrf.mxu0 }
 0x63d   : > { %v5077_v22 = vpack.c.bf16 %v4772_v35, %v4771_v19  ;;  %v4769_v40 = vadd.f32 %v4768_v55, %v4645_v30  ;;  %v4773_v7 = vmax.f32 %v4767_v4, 0.0 }
 0x63f   : > { %4787 = vst [vmem:[%s386_s26] sm:$0xff] %v5077_v22  ;;  %v4774_v57 = vmax.f32 %v4769_v40, 0.0 }
 0x641   : > { %v5078_v28 = vpack.c.bf16 %v4774_v57, %v4773_v7 }
 0x643   : > { %4788 = vst [vmem:[%s386_s26 + $0x8] sm:$0xff] %v5078_v28 }
 0x644 PF: > { %s21_s17 = sadd.s32 1, %s6266_s17  }
 0x645   : > { %p18_p4 = scmp.ge.s32.totalorder %s21_s17, 4  }
 0x647   :  { %20 = sbr.rel (!%p18_p4) target bundleno = 1 (0x1), region = 115 }

</bundles_post_ra>
